<compile_context>
chip_gen: v5e
topology: v5e:2x2
jax: 0.10.0
libtpu: 0.0.40
codegen_flags: <defaults>
</compile_context>

<pallas_src>
import functools

import jax
import jax.numpy as jnp
from jax.experimental import pallas as pl
from jax.experimental.pallas import tpu as pltpu


# Model dims (from the PyTorch generator)
D_NOISE = 100
D_LABEL = 9
D_IN = D_NOISE + D_LABEL      # 109: fused fc1 input = concat([noise, label])
D_H1 = 256                    # 128 (fc1_1) + 128 (fc1_2)
D_H2 = 512
D_H3 = 1024
D_OUT = 103
D_OUT_PAD = 128               # lane-dense padded output width
BN_EPS = 1e-5

_MATMUL_MACS = D_IN * D_H1 + D_H1 * D_H2 + D_H2 * D_H3 + D_H3 * D_OUT_PAD
_WEIGHT_BYTES = 2 * _MATMUL_MACS                               # bf16 weights
_BN_PARAM_BYTES = 4 * (2 * (D_H1 + D_H2 + D_H3) + D_OUT_PAD)   # f32 gamma/beta/b4


def _cost_estimate(batch):
    return pl.CostEstimate(
        flops=2 * batch * _MATMUL_MACS,
        transcendentals=batch * D_OUT_PAD + (D_H1 + D_H2 + D_H3),  # tanh + rsqrt
        bytes_accessed=(_WEIGHT_BYTES + _BN_PARAM_BYTES
                        + batch * D_IN * 2 + batch * D_OUT_PAD * 4),
    )


# --------------------------------------------------------------------------------------
# Path 1: small batch — whole batch in ONE grid step (exact BN stats, minimum overhead).
# --------------------------------------------------------------------------------------
def _fused_kernel(z_ref,
                  w1_ref, g1_ref, be1_ref,
                  w2_ref, g2_ref, be2_ref,
                  w3_ref, g3_ref, be3_ref,
                  w4_ref, b4_ref,
                  out_ref):
    inv_b = jnp.float32(1.0 / z_ref.shape[0])

    def bn_relu(x, gamma, beta):
        # One-pass batch stats; BN folded into a single FMA per element.
        s = jnp.sum(x, axis=0, keepdims=True)
        q = jnp.sum(x * x, axis=0, keepdims=True)
        mean = s * inv_b
        var = jnp.maximum(q * inv_b - mean * mean, 0.0)   # biased var, clamp cancellation
        scale = jax.lax.rsqrt(var + BN_EPS) * gamma
        shift = beta - mean * scale
        return jnp.maximum(x * scale + shift, 0.0)

    def mm(a_f32, w_ref):
        # bf16 MXU operands, f32 accumulation.
        return jnp.dot(a_f32.astype(jnp.bfloat16), w_ref[...],
                       preferred_element_type=jnp.float32)

    # fused fc1_1/fc1_2 (block-diagonal weight, no bias: cancelled by BN) -> BN -> relu
    h = bn_relu(jnp.dot(z_ref[...], w1_ref[...], preferred_element_type=jnp.float32),
                g1_ref[...], be1_ref[...])
    # fc2 (no bias) -> BN -> relu
    h = bn_relu(mm(h, w2_ref), g2_ref[...], be2_ref[...])
    # fc3 (no bias) -> BN -> relu
    h = bn_relu(mm(h, w3_ref), g3_ref[...], be3_ref[...])
    # fc4 (bias kept; padded to 128 lanes) -> tanh
    out_ref[...] = jnp.tanh(mm(h, w4_ref) + b4_ref[...])


def _forward_single(z, params, batch):
    args = (
        z,
        params["w1"], params["g1"], params["be1"],
        params["w2"], params["g2"], params["be2"],
        params["w3"], params["g3"], params["be3"],
        params["w4p"], params["b4p"],
    )

    def full_spec(a):
        n = a.ndim
        return pl.BlockSpec(a.shape, lambda i, _n=n: (0,) * _n)

    return pl.pallas_call(
        _fused_kernel,
        out_shape=jax.ShapeDtypeStruct((batch, D_OUT_PAD), jnp.float32),
        grid=(1,),
        in_specs=[full_spec(a) for a in args],
        out_specs=pl.BlockSpec((batch, D_OUT_PAD), lambda i: (0, 0)),
        compiler_params=pltpu.CompilerParams(dimension_semantics=("arbitrary",)),
        cost_estimate=_cost_estimate(batch),
    )(*args)


# --------------------------------------------------------------------------------------
# Path 2: large batch — grid over (sweep, batch tile); weights pinned/resident;
# one sweep per layer so the whole-batch BN statistics stay exact.
# --------------------------------------------------------------------------------------
def _tiled_kernel(b_valid, tile_b, n_tiles,
                  z_ref,
                  w1_ref, g1_ref, be1_ref,
                  w2_ref, g2_ref, be2_ref,
                  w3_ref, g3_ref, be3_ref,
                  w4_ref, b4_ref,
                  out_ref,
                  a1_ref, a2_ref, a3_ref,
                  s1_ref, q1_ref, s2_ref, q2_ref, s3_ref, q3_ref):
    sweep = pl.program_id(0)
    t = pl.program_id(1)
    inv_b = jnp.float32(1.0 / b_valid)
    need_mask = (tile_b * n_tiles) != b_valid   # static (Python) padding check

    def mask_pad_rows(h):
        # Zero out padded batch rows so they never contaminate the next layer's stats.
        rows = jax.lax.broadcasted_iota(jnp.int32, h.shape, 0) + t * tile_b
        return jnp.where(rows < b_valid, h, 0.0)

    def accumulate(pre, s_ref, q_ref):
        s_ref[...] += jnp.sum(pre, axis=0, keepdims=True)
        q_ref[...] += jnp.sum(pre * pre, axis=0, keepdims=True)

    def normalized_relu(a_ref, s_ref, q_ref, g_ref, be_ref):
        mean = s_ref[...] * inv_b
        var = jnp.maximum(q_ref[...] * inv_b - mean * mean, 0.0)
        scale = jax.lax.rsqrt(var + BN_EPS) * g_ref[...]
        shift = be_ref[...] - mean * scale
        return jnp.maximum(a_ref[t] * scale + shift, 0.0)

    @pl.when(jnp.logical_and(sweep == 0, t == 0))
    def _():
        s1_ref[...] = jnp.zeros_like(s1_ref)
        q1_ref[...] = jnp.zeros_like(q1_ref)
        s2_ref[...] = jnp.zeros_like(s2_ref)
        q2_ref[...] = jnp.zeros_like(q2_ref)
        s3_ref[...] = jnp.zeros_like(s3_ref)
        q3_ref[...] = jnp.zeros_like(q3_ref)

    # Sweep 0: fused fc1 on every tile; accumulate layer-1 sum / sum-of-squares.
    # (z padding rows are exactly zero and there is no bias, so no mask needed here.)
    @pl.when(sweep == 0)
    def _():
        pre = jnp.dot(z_ref[...], w1_ref[...], preferred_element_type=jnp.float32)
        a1_ref[t] = pre
        accumulate(pre, s1_ref, q1_ref)

    # Sweep 1: BN1+relu (exact whole-batch stats now available) -> fc2; layer-2 stats.
    @pl.when(sweep == 1)
    def _():
        h = normalized_relu(a1_ref, s1_ref, q1_ref, g1_ref, be1_ref)
        if need_mask:
            h = mask_pad_rows(h)
        pre = jnp.dot(h.astype(jnp.bfloat16), w2_ref[...],
                      preferred_element_type=jnp.float32)
        a2_ref[t] = pre
        accumulate(pre, s2_ref, q2_ref)

    # Sweep 2: BN2+relu -> fc3; layer-3 stats.
    @pl.when(sweep == 2)
    def _():
        h = normalized_relu(a2_ref, s2_ref, q2_ref, g2_ref, be2_ref)
        if need_mask:
            h = mask_pad_rows(h)
        pre = jnp.dot(h.astype(jnp.bfloat16), w3_ref[...],
                      preferred_element_type=jnp.float32)
        a3_ref[t] = pre
        accumulate(pre, s3_ref, q3_ref)

    # Sweep 3: BN3+relu -> fc4 (+bias) -> tanh -> output tile (padded rows sliced off
    # in the wrapper, so no mask needed).
    @pl.when(sweep == 3)
    def _():
        h = normalized_relu(a3_ref, s3_ref, q3_ref, g3_ref, be3_ref)
        out_ref[...] = jnp.tanh(
            jnp.dot(h.astype(jnp.bfloat16), w4_ref[...],
                    preferred_element_type=jnp.float32) + b4_ref[...])


def _forward_tiled(z, params, batch, tile_b):
    n_tiles = -(-batch // tile_b)
    b_pad = n_tiles * tile_b
    if b_pad != batch:
        z = jnp.pad(z, ((0, b_pad - batch), (0, 0)))   # zero rows (masked in-kernel)

    args = (
        z,
        params["w1"], params["g1"], params["be1"],
        params["w2"], params["g2"], params["be2"],
        params["w3"], params["g3"], params["be3"],
        params["w4p"], params["b4p"],
    )

    def pinned(a):
        # Constant block index -> DMA'd once, kept resident across the whole grid.
        return pl.BlockSpec(a.shape, lambda s, t: (0, 0))

    in_specs = ([pl.BlockSpec((tile_b, D_IN), lambda s, t: (t, 0))]
                + [pinned(a) for a in args[1:]])

    # TODO(synk): for very large batches, spill a1/a2/a3 to HBM (pl.ANY + manual DMA)
    #             instead of keeping the whole batch's pre-activations in VMEM.
    scratch_shapes = [
        pltpu.VMEM((n_tiles, tile_b, D_H1), jnp.float32),   # fc1 pre-activations
        pltpu.VMEM((n_tiles, tile_b, D_H2), jnp.float32),   # fc2 pre-activations
        pltpu.VMEM((n_tiles, tile_b, D_H3), jnp.float32),   # fc3 pre-activations
        pltpu.VMEM((1, D_H1), jnp.float32), pltpu.VMEM((1, D_H1), jnp.float32),
        pltpu.VMEM((1, D_H2), jnp.float32), pltpu.VMEM((1, D_H2), jnp.float32),
        pltpu.VMEM((1, D_H3), jnp.float32), pltpu.VMEM((1, D_H3), jnp.float32),
    ]

    kernel = functools.partial(_tiled_kernel, batch, tile_b, n_tiles)

    return pl.pallas_call(
        kernel,
        out_shape=jax.ShapeDtypeStruct((b_pad, D_OUT_PAD), jnp.float32),
        grid=(4, n_tiles),
        in_specs=in_specs,
        out_specs=pl.BlockSpec((tile_b, D_OUT_PAD), lambda s, t: (t, 0)),
        scratch_shapes=scratch_shapes,
        compiler_params=pltpu.CompilerParams(
            dimension_semantics=("arbitrary", "arbitrary")),
        cost_estimate=_cost_estimate(b_pad),
    )(*args)


# --------------------------------------------------------------------------------------
# Public wrapper
# --------------------------------------------------------------------------------------
def generator_forward(noise, label, params, tile_b=None):
    batch = noise.shape[0]
    # Cast once in the wrapper; MXU consumes bf16 natively (weights are already bf16).
    z = jnp.concatenate([noise, label], axis=1).astype(jnp.bfloat16)   # (B, 109)

    if tile_b is None:
        tile_b = 256   # MXU-friendly on v6e/v7x; use 128 on v5e

    if batch <= tile_b:
        out_pad = _forward_single(z, params, batch)
    else:
        out_pad = _forward_tiled(z, params, batch, tile_b)
    return out_pad[:batch, :D_OUT]


def init_params(key):
    # PyTorch-style Linear init: uniform(-1/sqrt(fan_in), +1/sqrt(fan_in)).
    def linear(k, fan_in, fan_out):
        k1, k2 = jax.random.split(k)
        bound = 1.0 / jnp.sqrt(jnp.float32(fan_in))
        w = jax.random.uniform(k1, (fan_in, fan_out), jnp.float32, -bound, bound)
        b = jax.random.uniform(k2, (1, fan_out), jnp.float32, -bound, bound)
        return w, b

    ks = jax.random.split(key, 5)
    w11, b11 = linear(ks[0], D_NOISE, 128)
    w12, b12 = linear(ks[1], D_LABEL, 128)
    w2, b2 = linear(ks[2], D_H1, D_H2)
    w3, b3 = linear(ks[3], D_H2, D_H3)
    w4, b4 = linear(ks[4], D_H3, D_OUT)

    # Fuse fc1_1 / fc1_2 into one block-diagonal matmul on concat([noise, label]).
    w1 = jnp.zeros((D_IN, D_H1), jnp.float32)
    w1 = w1.at[:D_NOISE, :128].set(w11)
    w1 = w1.at[D_NOISE:, 128:].set(w12)

    # Pad fc4 to a lane-dense 128-wide output (extra columns give tanh(0)=0, sliced off).
    w4p = jnp.zeros((D_H3, D_OUT_PAD), jnp.float32).at[:, :D_OUT].set(w4)
    b4p = jnp.zeros((1, D_OUT_PAD), jnp.float32).at[:, :D_OUT].set(b4)

    bf16 = jnp.bfloat16
    return {
        # NOTE: fc1/fc2/fc3 biases are intentionally NOT kernel parameters — training
        # mode BatchNorm subtracts the batch mean, so those biases cancel exactly.
        "w1": w1.astype(bf16),
        "g1": jnp.ones((1, D_H1), jnp.float32), "be1": jnp.zeros((1, D_H1), jnp.float32),
        "w2": w2.astype(bf16),
        "g2": jnp.ones((1, D_H2), jnp.float32), "be2": jnp.zeros((1, D_H2), jnp.float32),
        "w3": w3.astype(bf16),
        "g3": jnp.ones((1, D_H3), jnp.float32), "be3": jnp.zeros((1, D_H3), jnp.float32),
        "w4p": w4p.astype(bf16), "b4p": b4p,
        # Unfused f32 copies (with biases) kept only for the pure-JAX reference check.
        "_w1_1": w11, "_b1_1": b11, "_w1_2": w12, "_b1_2": b12,
        "_w2": w2, "_b2": b2, "_w3": w3, "_b3": b3, "_w4": w4, "_b4": b4,
    }


def reference_forward(noise, label, p):
    # Pure-JAX replica of the PyTorch generator.forward (training-mode BatchNorm),
    # with matmul operands rounded to bf16 to match the kernel's MXU input dtype.
    def mm(a, w):
        return jnp.dot(a.astype(jnp.bfloat16).astype(jnp.float32),
                       w.astype(jnp.bfloat16).astype(jnp.float32))

    def bn(x):
        m = jnp.mean(x, axis=0, keepdims=True)
        v = jnp.mean((x - m) ** 2, axis=0, keepdims=True)
        return (x - m) / jnp.sqrt(v + BN_EPS)     # gamma=1, beta=0 at init

    relu = lambda tns: jnp.maximum(tns, 0.0)
    x = relu(bn(mm(noise, p["_w1_1"]) + p["_b1_1"]))
    y = relu(bn(mm(label, p["_w1_2"]) + p["_b1_2"]))
    h = jnp.concatenate([x, y], axis=1)
    h = relu(bn(mm(h, p["_w2"]) + p["_b2"]))
    h = relu(bn(mm(h, p["_w3"]) + p["_b3"]))
    return jnp.tanh(mm(h, p["_w4"]) + p["_b4"])


if __name__ == "__main__":
    key = jax.random.PRNGKey(0)
    kp, kn, kl = jax.random.split(key, 3)
    params = init_params(kp)

    # ---- Small-batch path: single fused grid step ----
    B = 8
    noise = jax.random.normal(kn, (B, D_NOISE), jnp.float32)
    label = jax.nn.one_hot(jax.random.randint(kl, (B,), 0, D_LABEL),
                           D_LABEL, dtype=jnp.float32)
    out = jax.block_until_ready(generator_forward(noise, label, params))
    ref = reference_forward(noise, label, params)
    assert out.shape == (B, D_OUT)
    err = float(jnp.max(jnp.abs(out - ref)))
    assert jnp.allclose(out, ref, atol=2e-3, rtol=2e-3), err

    # ---- Batch-tiled path: pinned weights, multi-sweep exact BN, padding mask ----
    B2 = 200   # not a multiple of the tile -> exercises the padded-row mask
    kn2, kl2 = jax.random.split(jax.random.PRNGKey(1))
    noise2 = jax.random.normal(kn2, (B2, D_NOISE), jnp.float32)
    label2 = jax.nn.one_hot(jax.random.randint(kl2, (B2,), 0, D_LABEL),
                            D_LABEL, dtype=jnp.float32)
    out2 = jax.block_until_ready(generator_forward(noise2, label2, params, tile_b=128))
    ref2 = reference_forward(noise2, label2, params)
    assert out2.shape == (B2, D_OUT)
    err2 = float(jnp.max(jnp.abs(out2 - ref2)))
    assert jnp.allclose(out2, ref2, atol=2e-3, rtol=2e-3), err2

    print("KERNEL_OK")
</pallas_src>

<mosaic_0001>
module attributes {stable_mosaic.version = 11 : i64} {
  func.func @_fused_kernel(%arg0: i32, %arg1: memref<8x109xbf16, #tpu.memory_space<vmem>>, %arg2: memref<109x256xbf16, #tpu.memory_space<vmem>>, %arg3: memref<1x256xf32, #tpu.memory_space<vmem>>, %arg4: memref<1x256xf32, #tpu.memory_space<vmem>>, %arg5: memref<256x512xbf16, #tpu.memory_space<vmem>>, %arg6: memref<1x512xf32, #tpu.memory_space<vmem>>, %arg7: memref<1x512xf32, #tpu.memory_space<vmem>>, %arg8: memref<512x1024xbf16, #tpu.memory_space<vmem>>, %arg9: memref<1x1024xf32, #tpu.memory_space<vmem>>, %arg10: memref<1x1024xf32, #tpu.memory_space<vmem>>, %arg11: memref<1024x128xbf16, #tpu.memory_space<vmem>>, %arg12: memref<1x128xf32, #tpu.memory_space<vmem>>, %arg13: memref<8x128xf32, #tpu.memory_space<vmem>>) attributes {dimension_semantics = [#tpu.dimension_semantics<arbitrary>], iteration_bounds = array<i64: 1>, scalar_prefetch = 0 : i64, scratch_operands = 0 : i64, tpu.core_type = #tpu.core_type<tc>, window_params = [{pipeline_mode = #tpu.pipeline_mode<synchronous>, transform_indices = @transform_0, window_bounds = array<i64: 8, 109>}, {pipeline_mode = #tpu.pipeline_mode<synchronous>, transform_indices = @transform_1, window_bounds = array<i64: 109, 256>}, {pipeline_mode = #tpu.pipeline_mode<synchronous>, transform_indices = @transform_2, window_bounds = array<i64: 1, 256>}, {pipeline_mode = #tpu.pipeline_mode<synchronous>, transform_indices = @transform_3, window_bounds = array<i64: 1, 256>}, {pipeline_mode = #tpu.pipeline_mode<synchronous>, transform_indices = @transform_4, window_bounds = array<i64: 256, 512>}, {pipeline_mode = #tpu.pipeline_mode<synchronous>, transform_indices = @transform_5, window_bounds = array<i64: 1, 512>}, {pipeline_mode = #tpu.pipeline_mode<synchronous>, transform_indices = @transform_6, window_bounds = array<i64: 1, 512>}, {pipeline_mode = #tpu.pipeline_mode<synchronous>, transform_indices = @transform_7, window_bounds = array<i64: 512, 1024>}, {pipeline_mode = #tpu.pipeline_mode<synchronous>, transform_indices = @transform_8, window_bounds = array<i64: 1, 1024>}, {pipeline_mode = #tpu.pipeline_mode<synchronous>, transform_indices = @transform_9, window_bounds = array<i64: 1, 1024>}, {pipeline_mode = #tpu.pipeline_mode<synchronous>, transform_indices = @transform_10, window_bounds = array<i64: 1024, 128>}, {pipeline_mode = #tpu.pipeline_mode<synchronous>, transform_indices = @transform_11, window_bounds = array<i64: 1, 128>}, {pipeline_mode = #tpu.pipeline_mode<synchronous>, transform_indices = @transform_12, window_bounds = array<i64: 8, 128>}]} {
    %c0 = arith.constant 0 : index
    %c0_0 = arith.constant 0 : index
    %0 = vector.load %arg1[%c0, %c0_0] : memref<8x109xbf16, #tpu.memory_space<vmem>>, vector<8x109xbf16>
    %c0_1 = arith.constant 0 : index
    %c0_2 = arith.constant 0 : index
    %1 = vector.load %arg2[%c0_1, %c0_2] : memref<109x256xbf16, #tpu.memory_space<vmem>>, vector<109x256xbf16>
    %cst = arith.constant dense<0.000000e+00> : vector<8x256xf32>
    %2 = tpu.matmul %0, %1, %cst {dimension_numbers = #tpu.dot_dimension_numbers<[1], [0], [0], [1], [0, 0, 1, 1], [], []>} : vector<8x109xbf16>, vector<109x256xbf16>, vector<8x256xf32> -> vector<8x256xf32>
    %c0_3 = arith.constant 0 : index
    %c0_4 = arith.constant 0 : index
    %3 = vector.load %arg3[%c0_3, %c0_4] : memref<1x256xf32, #tpu.memory_space<vmem>>, vector<1x256xf32>
    %c0_5 = arith.constant 0 : index
    %c0_6 = arith.constant 0 : index
    %4 = vector.load %arg4[%c0_5, %c0_6] : memref<1x256xf32, #tpu.memory_space<vmem>>, vector<1x256xf32>
    %cst_7 = arith.constant dense<0.000000e+00> : vector<256xf32>
    %5 = vector.multi_reduction <add>, %2, %cst_7 [0] : vector<8x256xf32> to vector<256xf32>
    %6 = vector.shape_cast %5 : vector<256xf32> to vector<1x256xf32>
    %7 = arith.mulf %2, %2 : vector<8x256xf32>
    %cst_8 = arith.constant dense<0.000000e+00> : vector<256xf32>
    %8 = vector.multi_reduction <add>, %7, %cst_8 [0] : vector<8x256xf32> to vector<256xf32>
    %9 = vector.shape_cast %8 : vector<256xf32> to vector<1x256xf32>
    %cst_9 = arith.constant 1.250000e-01 : f32
    %10 = vector.broadcast %cst_9 : f32 to vector<1x256xf32>
    %11 = arith.mulf %6, %10 : vector<1x256xf32>
    %cst_10 = arith.constant 1.250000e-01 : f32
    %12 = vector.broadcast %cst_10 : f32 to vector<1x256xf32>
    %13 = arith.mulf %9, %12 : vector<1x256xf32>
    %14 = arith.mulf %11, %11 : vector<1x256xf32>
    %15 = arith.subf %13, %14 : vector<1x256xf32>
    %cst_11 = arith.constant 0.000000e+00 : f32
    %16 = vector.broadcast %cst_11 : f32 to vector<1x256xf32>
    %17 = arith.maximumf %15, %16 : vector<1x256xf32>
    %cst_12 = arith.constant 9.99999974E-6 : f32
    %18 = vector.broadcast %cst_12 : f32 to vector<1x256xf32>
    %19 = arith.addf %17, %18 : vector<1x256xf32>
    %20 = math.rsqrt %19 : vector<1x256xf32>
    %21 = arith.mulf %20, %3 : vector<1x256xf32>
    %22 = arith.mulf %11, %21 : vector<1x256xf32>
    %23 = arith.subf %4, %22 : vector<1x256xf32>
    %24 = vector.broadcast %21 : vector<1x256xf32> to vector<8x256xf32>
    %25 = arith.mulf %2, %24 : vector<8x256xf32>
    %26 = vector.broadcast %23 : vector<1x256xf32> to vector<8x256xf32>
    %27 = arith.addf %25, %26 : vector<8x256xf32>
    %cst_13 = arith.constant 0.000000e+00 : f32
    %28 = vector.broadcast %cst_13 : f32 to vector<8x256xf32>
    %29 = arith.maximumf %27, %28 : vector<8x256xf32>
    %30 = arith.truncf %29 : vector<8x256xf32> to vector<8x256xbf16>
    %c0_14 = arith.constant 0 : index
    %c0_15 = arith.constant 0 : index
    %31 = vector.load %arg5[%c0_14, %c0_15] : memref<256x512xbf16, #tpu.memory_space<vmem>>, vector<256x512xbf16>
    %cst_16 = arith.constant dense<0.000000e+00> : vector<8x512xf32>
    %32 = tpu.matmul %30, %31, %cst_16 {dimension_numbers = #tpu.dot_dimension_numbers<[1], [0], [0], [1], [0, 0, 1, 1], [], []>} : vector<8x256xbf16>, vector<256x512xbf16>, vector<8x512xf32> -> vector<8x512xf32>
    %c0_17 = arith.constant 0 : index
    %c0_18 = arith.constant 0 : index
    %33 = vector.load %arg6[%c0_17, %c0_18] : memref<1x512xf32, #tpu.memory_space<vmem>>, vector<1x512xf32>
    %c0_19 = arith.constant 0 : index
    %c0_20 = arith.constant 0 : index
    %34 = vector.load %arg7[%c0_19, %c0_20] : memref<1x512xf32, #tpu.memory_space<vmem>>, vector<1x512xf32>
    %cst_21 = arith.constant dense<0.000000e+00> : vector<512xf32>
    %35 = vector.multi_reduction <add>, %32, %cst_21 [0] : vector<8x512xf32> to vector<512xf32>
    %36 = vector.shape_cast %35 : vector<512xf32> to vector<1x512xf32>
    %37 = arith.mulf %32, %32 : vector<8x512xf32>
    %cst_22 = arith.constant dense<0.000000e+00> : vector<512xf32>
    %38 = vector.multi_reduction <add>, %37, %cst_22 [0] : vector<8x512xf32> to vector<512xf32>
    %39 = vector.shape_cast %38 : vector<512xf32> to vector<1x512xf32>
    %cst_23 = arith.constant 1.250000e-01 : f32
    %40 = vector.broadcast %cst_23 : f32 to vector<1x512xf32>
    %41 = arith.mulf %36, %40 : vector<1x512xf32>
    %cst_24 = arith.constant 1.250000e-01 : f32
    %42 = vector.broadcast %cst_24 : f32 to vector<1x512xf32>
    %43 = arith.mulf %39, %42 : vector<1x512xf32>
    %44 = arith.mulf %41, %41 : vector<1x512xf32>
    %45 = arith.subf %43, %44 : vector<1x512xf32>
    %cst_25 = arith.constant 0.000000e+00 : f32
    %46 = vector.broadcast %cst_25 : f32 to vector<1x512xf32>
    %47 = arith.maximumf %45, %46 : vector<1x512xf32>
    %cst_26 = arith.constant 9.99999974E-6 : f32
    %48 = vector.broadcast %cst_26 : f32 to vector<1x512xf32>
    %49 = arith.addf %47, %48 : vector<1x512xf32>
    %50 = math.rsqrt %49 : vector<1x512xf32>
    %51 = arith.mulf %50, %33 : vector<1x512xf32>
    %52 = arith.mulf %41, %51 : vector<1x512xf32>
    %53 = arith.subf %34, %52 : vector<1x512xf32>
    %54 = vector.broadcast %51 : vector<1x512xf32> to vector<8x512xf32>
    %55 = arith.mulf %32, %54 : vector<8x512xf32>
    %56 = vector.broadcast %53 : vector<1x512xf32> to vector<8x512xf32>
    %57 = arith.addf %55, %56 : vector<8x512xf32>
    %cst_27 = arith.constant 0.000000e+00 : f32
    %58 = vector.broadcast %cst_27 : f32 to vector<8x512xf32>
    %59 = arith.maximumf %57, %58 : vector<8x512xf32>
    %60 = arith.truncf %59 : vector<8x512xf32> to vector<8x512xbf16>
    %c0_28 = arith.constant 0 : index
    %c0_29 = arith.constant 0 : index
    %61 = vector.load %arg8[%c0_28, %c0_29] : memref<512x1024xbf16, #tpu.memory_space<vmem>>, vector<512x1024xbf16>
    %cst_30 = arith.constant dense<0.000000e+00> : vector<8x1024xf32>
    %62 = tpu.matmul %60, %61, %cst_30 {dimension_numbers = #tpu.dot_dimension_numbers<[1], [0], [0], [1], [0, 0, 1, 1], [], []>} : vector<8x512xbf16>, vector<512x1024xbf16>, vector<8x1024xf32> -> vector<8x1024xf32>
    %c0_31 = arith.constant 0 : index
    %c0_32 = arith.constant 0 : index
    %63 = vector.load %arg9[%c0_31, %c0_32] : memref<1x1024xf32, #tpu.memory_space<vmem>>, vector<1x1024xf32>
    %c0_33 = arith.constant 0 : index
    %c0_34 = arith.constant 0 : index
    %64 = vector.load %arg10[%c0_33, %c0_34] : memref<1x1024xf32, #tpu.memory_space<vmem>>, vector<1x1024xf32>
    %cst_35 = arith.constant dense<0.000000e+00> : vector<1024xf32>
    %65 = vector.multi_reduction <add>, %62, %cst_35 [0] : vector<8x1024xf32> to vector<1024xf32>
    %66 = vector.shape_cast %65 : vector<1024xf32> to vector<1x1024xf32>
    %67 = arith.mulf %62, %62 : vector<8x1024xf32>
    %cst_36 = arith.constant dense<0.000000e+00> : vector<1024xf32>
    %68 = vector.multi_reduction <add>, %67, %cst_36 [0] : vector<8x1024xf32> to vector<1024xf32>
    %69 = vector.shape_cast %68 : vector<1024xf32> to vector<1x1024xf32>
    %cst_37 = arith.constant 1.250000e-01 : f32
    %70 = vector.broadcast %cst_37 : f32 to vector<1x1024xf32>
    %71 = arith.mulf %66, %70 : vector<1x1024xf32>
    %cst_38 = arith.constant 1.250000e-01 : f32
    %72 = vector.broadcast %cst_38 : f32 to vector<1x1024xf32>
    %73 = arith.mulf %69, %72 : vector<1x1024xf32>
    %74 = arith.mulf %71, %71 : vector<1x1024xf32>
    %75 = arith.subf %73, %74 : vector<1x1024xf32>
    %cst_39 = arith.constant 0.000000e+00 : f32
    %76 = vector.broadcast %cst_39 : f32 to vector<1x1024xf32>
    %77 = arith.maximumf %75, %76 : vector<1x1024xf32>
    %cst_40 = arith.constant 9.99999974E-6 : f32
    %78 = vector.broadcast %cst_40 : f32 to vector<1x1024xf32>
    %79 = arith.addf %77, %78 : vector<1x1024xf32>
    %80 = math.rsqrt %79 : vector<1x1024xf32>
    %81 = arith.mulf %80, %63 : vector<1x1024xf32>
    %82 = arith.mulf %71, %81 : vector<1x1024xf32>
    %83 = arith.subf %64, %82 : vector<1x1024xf32>
    %84 = vector.broadcast %81 : vector<1x1024xf32> to vector<8x1024xf32>
    %85 = arith.mulf %62, %84 : vector<8x1024xf32>
    %86 = vector.broadcast %83 : vector<1x1024xf32> to vector<8x1024xf32>
    %87 = arith.addf %85, %86 : vector<8x1024xf32>
    %cst_41 = arith.constant 0.000000e+00 : f32
    %88 = vector.broadcast %cst_41 : f32 to vector<8x1024xf32>
    %89 = arith.maximumf %87, %88 : vector<8x1024xf32>
    %90 = arith.truncf %89 : vector<8x1024xf32> to vector<8x1024xbf16>
    %c0_42 = arith.constant 0 : index
    %c0_43 = arith.constant 0 : index
    %91 = vector.load %arg11[%c0_42, %c0_43] : memref<1024x128xbf16, #tpu.memory_space<vmem>>, vector<1024x128xbf16>
    %cst_44 = arith.constant dense<0.000000e+00> : vector<8x128xf32>
    %92 = tpu.matmul %90, %91, %cst_44 {dimension_numbers = #tpu.dot_dimension_numbers<[1], [0], [0], [1], [0, 0, 1, 1], [], []>} : vector<8x1024xbf16>, vector<1024x128xbf16>, vector<8x128xf32> -> vector<8x128xf32>
    %c0_45 = arith.constant 0 : index
    %c0_46 = arith.constant 0 : index
    %93 = vector.load %arg12[%c0_45, %c0_46] : memref<1x128xf32, #tpu.memory_space<vmem>>, vector<1x128xf32>
    %94 = vector.broadcast %93 : vector<1x128xf32> to vector<8x128xf32>
    %95 = arith.addf %92, %94 : vector<8x128xf32>
    %96 = math.tanh %95 : vector<8x128xf32>
    %c0_47 = arith.constant 0 : index
    %c0_48 = arith.constant 0 : index
    %97 = vector.load %arg13[%c0_47, %c0_48] : memref<8x128xf32, #tpu.memory_space<vmem>>, vector<8x128xf32>
    tpu.vector_store %arg13[%c0_47, %c0_48], %96 {strides = array<i32>} : memref<8x128xf32, #tpu.memory_space<vmem>>, vector<8x128xf32>,
    return
  }
  func.func @transform_0(%arg0: i32) -> (i32, i32) {
    %c0_i32 = arith.constant 0 : i32
    %c0_i32_0 = arith.constant 0 : i32
    %c0_i32_1 = arith.constant 0 : i32
    return %c0_i32, %c0_i32_0 : i32, i32
  }
  func.func @transform_1(%arg0: i32) -> (i32, i32) {
    %c0_i32 = arith.constant 0 : i32
    %c0_i32_0 = arith.constant 0 : i32
    %c0_i32_1 = arith.constant 0 : i32
    return %c0_i32, %c0_i32_0 : i32, i32
  }
  func.func @transform_2(%arg0: i32) -> (i32, i32) {
    %c0_i32 = arith.constant 0 : i32
    %c0_i32_0 = arith.constant 0 : i32
    %c0_i32_1 = arith.constant 0 : i32
    return %c0_i32, %c0_i32_0 : i32, i32
  }
  func.func @transform_3(%arg0: i32) -> (i32, i32) {
    %c0_i32 = arith.constant 0 : i32
    %c0_i32_0 = arith.constant 0 : i32
    %c0_i32_1 = arith.constant 0 : i32
    return %c0_i32, %c0_i32_0 : i32, i32
  }
  func.func @transform_4(%arg0: i32) -> (i32, i32) {
    %c0_i32 = arith.constant 0 : i32
    %c0_i32_0 = arith.constant 0 : i32
    %c0_i32_1 = arith.constant 0 : i32
    return %c0_i32, %c0_i32_0 : i32, i32
  }
  func.func @transform_5(%arg0: i32) -> (i32, i32) {
    %c0_i32 = arith.constant 0 : i32
    %c0_i32_0 = arith.constant 0 : i32
    %c0_i32_1 = arith.constant 0 : i32
    return %c0_i32, %c0_i32_0 : i32, i32
  }
  func.func @transform_6(%arg0: i32) -> (i32, i32) {
    %c0_i32 = arith.constant 0 : i32
    %c0_i32_0 = arith.constant 0 : i32
    %c0_i32_1 = arith.constant 0 : i32
    return %c0_i32, %c0_i32_0 : i32, i32
  }
  func.func @transform_7(%arg0: i32) -> (i32, i32) {
    %c0_i32 = arith.constant 0 : i32
    %c0_i32_0 = arith.constant 0 : i32
    %c0_i32_1 = arith.constant 0 : i32
    return %c0_i32, %c0_i32_0 : i32, i32
  }
  func.func @transform_8(%arg0: i32) -> (i32, i32) {
    %c0_i32 = arith.constant 0 : i32
    %c0_i32_0 = arith.constant 0 : i32
    %c0_i32_1 = arith.constant 0 : i32
    return %c0_i32, %c0_i32_0 : i32, i32
  }
  func.func @transform_9(%arg0: i32) -> (i32, i32) {
    %c0_i32 = arith.constant 0 : i32
    %c0_i32_0 = arith.constant 0 : i32
    %c0_i32_1 = arith.constant 0 : i32
    return %c0_i32, %c0_i32_0 : i32, i32
  }
  func.func @transform_10(%arg0: i32) -> (i32, i32) {
    %c0_i32 = arith.constant 0 : i32
    %c0_i32_0 = arith.constant 0 : i32
    %c0_i32_1 = arith.constant 0 : i32
    return %c0_i32, %c0_i32_0 : i32, i32
  }
  func.func @transform_11(%arg0: i32) -> (i32, i32) {
    %c0_i32 = arith.constant 0 : i32
    %c0_i32_0 = arith.constant 0 : i32
    %c0_i32_1 = arith.constant 0 : i32
    return %c0_i32, %c0_i32_0 : i32, i32
  }
  func.func @transform_12(%arg0: i32) -> (i32, i32) {
    %c0_i32 = arith.constant 0 : i32
    %c0_i32_0 = arith.constant 0 : i32
    %c0_i32_1 = arith.constant 0 : i32
    return %c0_i32, %c0_i32_0 : i32, i32
  }
}

</mosaic_0001>

<bundles_post_ra>
// kernel: tpu_custom_call.1
= control target key start
LH: loop header
LB: loop body
LE: loop exit
PB: predicated region body
PF: predicated region fallthrough
CT: control target
= control target key end

     0   :  { %17 = vsyncpa [#allocation3], 0  ;;  %s6817_s0 = inlined_call_operand.hbm [shape: bf16[8,109], index: 0, kind: input, shape index: {}]   ;;  %s6818_s1 = inlined_call_operand.hbm [shape: bf16[109,256], index: 1, kind: input, shape index: {}]   ;;  %s6819_s2 = inlined_call_operand.hbm [shape: f32[1,256], index: 2, kind: input, shape index: {}]   ;;  %s6820_s3 = inlined_call_operand.hbm [shape: f32[1,256], index: 3, kind: input, shape index: {}]   ;;  %s6821_s4 = inlined_call_operand.hbm [shape: bf16[256,512], index: 4, kind: input, shape index: {}]   ;;  %s6822_s5 = inlined_call_operand.hbm [shape: f32[1,512], index: 5, kind: input, shape index: {}]   ;;  %s6823_s6 = inlined_call_operand.hbm [shape: f32[1,512], index: 6, kind: input, shape index: {}]   ;;  %s6824_s7 = inlined_call_operand.hbm [shape: bf16[512,1024], index: 7, kind: input, shape index: {}]   ;;  %s6825_s8 = inlined_call_operand.hbm [shape: f32[1,1024], index: 8, kind: input, shape index: {}]   ;;  %s6826_s9 = inlined_call_operand.vmem [shape: f32[1,1024], index: 9, kind: input, shape index: {}]   ;;  %s6827_s10 = inlined_call_operand.hbm [shape: bf16[1024,128], index: 10, kind: input, shape index: {}]   ;;  %s6828_s11 = inlined_call_operand.vmem [shape: f32[1,128], index: 11, kind: input, shape index: {}]   ;;  %s6829_s12 = inlined_call_operand.hbm [shape: f32[8,128], index: 12, kind: output, shape index: {}]  }
   0x1   :  { %18 = vsyncpa [#allocation6], 0 }
   0x2   :  { %19 = vsyncpa [#allocation9], 0 }
   0x3   :  { %20 = vsyncpa [#allocation12], 0 }
   0x4   :  { %21 = vsyncpa [#allocation15], 0 }
   0x5   :  { %22 = vsyncpa [#allocation18], 0  ;;  %s39_s23 = sshll.u32 %s6818_s1, 4  ;;  %s40_s23 = int_to_ptr.hbm [resolvable:$true] %s39_s23 }
   0x6   :  { %23 = vsyncpa [#allocation4], 0  ;;  %s6336_s24 = smov [#allocation5]   ;;  %s64_s28 = sshll.u32 %s6820_s3, 4  ;;  %s65_s28 = int_to_ptr.hbm [resolvable:$true] %s64_s28 }
   0x7   :  { %s41_s25 = sshll.u32 %s6336_s24, 4  ;;  %s6337_s29 = smov 128   ;;  %s42_s25 = int_to_ptr.vmem [resolvable:$true] %s41_s25 }
   0x8   :  { %s6338_s30 = smov 8   ;;  %s6339_s13 = smov [#allocation8]  }
   0x9   :  { %47 = dma.hbm_to_vmem [thread:$0]  %s40_s23, 1792, %s42_s25, [#allocation6], %s6337_s29, %s6337_s29, %s6338_s30  }
   0xa   :  { %s66_s14 = sshll.u32 %s6339_s13, 4  ;;  %s88_s17 = sshll.u32 %s6822_s5, 4  ;;  %s67_s14 = int_to_ptr.vmem [resolvable:$true] %s66_s14  ;;  %s89_s17 = int_to_ptr.hbm [resolvable:$true] %s88_s17 }
   0xb   :  { %69 = dma.hbm_to_vmem [thread:$0]  %s65_s28, 32, %s67_s14, [#allocation9]  }
   0xc   :  { %s109_s19 = sshll.u32 %s6824_s7, 4  ;;  %s6340_s20 = smov [#allocation11]   ;;  %s110_s19 = int_to_ptr.hbm [resolvable:$true] %s109_s19 }
   0xd   :  { %s90_s21 = sshll.u32 %s6340_s20, 4  ;;  %s6341_s3 = smov [#allocation14]   ;;  %s91_s21 = int_to_ptr.vmem [resolvable:$true] %s90_s21 }
   0xe   :  { %93 = dma.hbm_to_vmem [thread:$0]  %s89_s17, 64, %s91_s21, [#allocation12]  }
   0xf   :  { %s111_s22 = sshll.u32 %s6341_s3, 4  ;;  %s6342_s23 = smov 512   ;;  %s112_s22 = int_to_ptr.vmem [resolvable:$true] %s111_s22 }
  0x10   :  { %s6343_s24 = smov 32   ;;  %s29_s26 = sshll.u32 %s6817_s0, 4  ;;  %s30_s26 = int_to_ptr.hbm [resolvable:$true] %s29_s26 }
  0x11   :  { %117 = dma.hbm_to_vmem [thread:$0]  %s110_s19, 32768, %s112_s22, [#allocation15], %s6342_s23, %s6342_s23, %s6343_s24  }
  0x12   :  { %s6344_s27 = smov [#allocation2]   ;;  %s53_s30 = sshll.u32 %s6819_s2, 4  ;;  %s54_s30 = int_to_ptr.hbm [resolvable:$true] %s53_s30 }
  0x13   :  { %s31_s28 = sshll.u32 %s6344_s27, 4  ;;  %s6345_s13 = smov [#allocation7]   ;;  %s32_s28 = int_to_ptr.vmem [resolvable:$true] %s31_s28 }
  0x14   :  { %34 = dma.hbm_to_vmem [thread:$0]  %s30_s26, 64, %s32_s28, [#allocation3]  }
  0x15   :  { %s55_s14 = sshll.u32 %s6345_s13, 4  ;;  %s74_s17 = sshll.u32 %s6821_s4, 4  ;;  %s56_s14 = int_to_ptr.vmem [resolvable:$true] %s55_s14  ;;  %s75_s17 = int_to_ptr.hbm [resolvable:$true] %s74_s17 }
  0x16   :  { %58 = dma.hbm_to_vmem [thread:$0]  %s54_s30, 32, %s56_s14, [#allocation6]  }
  0x17   :  { %s6346_s0 = smov [#allocation10]   ;;  %s99_s20 = sshll.u32 %s6823_s6, 4  ;;  %s100_s20 = int_to_ptr.hbm [resolvable:$true] %s99_s20 }
  0x18   :  { %s76_s1 = sshll.u32 %s6346_s0, 4  ;;  %s6347_s21 = smov 256   ;;  %s77_s1 = int_to_ptr.vmem [resolvable:$true] %s76_s1 }
  0x19   :  { %s6348_s2 = smov 16   ;;  %s6349_s3 = smov [#allocation13]  }
  0x1a   :  { %82 = dma.hbm_to_vmem [thread:$0]  %s75_s17, 8192, %s77_s1, [#allocation9], %s6347_s21, %s6347_s21, %s6348_s2  }
  0x1b   :  { %s101_s22 = sshll.u32 %s6349_s3, 4  ;;  %s123_s4 = sshll.u32 %s6825_s8, 4  ;;  %s102_s22 = int_to_ptr.vmem [resolvable:$true] %s101_s22  ;;  %s124_s4 = int_to_ptr.hbm [resolvable:$true] %s123_s4 }
  0x1c   :  { %104 = dma.hbm_to_vmem [thread:$0]  %s100_s20, 64, %s102_s22, [#allocation12]  }
  0x1d   :  { %s135_s26 = sshll.u32 %s6827_s10, 4  ;;  %s6350_s27 = smov [#allocation16]   ;;  %s136_s26 = int_to_ptr.hbm [resolvable:$true] %s135_s26 }
  0x1e   :  { %s125_s28 = sshll.u32 %s6350_s27, 4  ;;  %s6351_s6 = smov [#allocation17]   ;;  %s126_s28 = int_to_ptr.vmem [resolvable:$true] %s125_s28 }
  0x1f   :  { %128 = dma.hbm_to_vmem [thread:$0]  %s124_s4, 128, %s126_s28, [#allocation15]  }
  0x20   :  { %s137_s7 = sshll.u32 %s6351_s6, 4  ;;  %s6352_s29 = smov 64   ;;  %s138_s7 = int_to_ptr.vmem [resolvable:$true] %s137_s7 }
  0x21   :  { %s6353_s30 = smov 4  }
  0x22   :  { %143 = dma.hbm_to_vmem [thread:$0]  %s136_s26, 8192, %s138_s7, [#allocation18], %s6352_s29, %s6352_s29, %s6353_s30  }
  0x23   :  { %6322 = dma.done.wait [#allocation3], 64  }
  0x24   :  { %6323 = vsyncadd [#allocation3], 4294967232 }
  0x25   :  { %6324 = dma.done.wait [#allocation6], 1824  }
  0x26   :  { %6325 = vsyncadd [#allocation6], 4294965472 }
  0x27   :  { %6326 = dma.done.wait [#allocation9], 8224  }
  0x28   :  { %6327 = vsyncadd [#allocation9], 4294959072 }
  0x29   :  { %6328 = dma.done.wait [#allocation12], 128  }
  0x2a   :  { %6329 = vsyncadd [#allocation12], 4294967168 }
  0x2b   :  { %6330 = dma.done.wait [#allocation15], 32896  }
  0x2c   :  { %6331 = vsyncadd [#allocation15], 4294934400 }
  0x2d   :  { %6332 = dma.done.wait [#allocation18], 8192  }
  0x2e   :  { %6333 = vsyncadd [#allocation18], 4294959104  ;;  %vm274_vm0 = vcmask 1045504   ;;  %vm275_vm1 = vcmask 1046528   ;;  %v6354_v0 = vmov 65535   ;;  %vm270_vm2 = vcmask 891904  }
  0x2f   :  { %v276_v1 = vsel %vm274_vm0, 4294967295, %v6354_v0  ;;  %v4065_v3 = vld [vmem:[#allocation5 + $0x60] sm:$0xf]  ;;  %v5622_v4 = vld [vmem:[#allocation5 + $0x64] sm:$0x70]  ;;  %vm382_vm9 = vcmask 1040384  }
  0x30   :  { %v277_v2 = vsel %vm275_vm1, %v276_v1, 0  ;;  %v5621_v5 = vld [vmem:[#allocation5 + $0x64] sm:$0xf]  ;;  %v4066_v6 = vor.u32 %v5622_v4, %v4065_v3  ;;  %v4067_v7 = vld [vmem:[#allocation5 + $0x68] sm:$0x70]  ;;  %s4000_s17 = sshll.u32 %s6829_s12, 4  ;;  %s4001_s17 = int_to_ptr.hbm [resolvable:$true] %s4000_s17 }
  0x31   :  { %v4070_v8 = vor.u32 %v5621_v5, %v4067_v7  ;;  %v4057_v9 = vld [vmem:[#allocation5 + $0x50] sm:$0xf]  ;;  %v5620_v10 = vld [vmem:[#allocation5 + $0x54] sm:$0xf0]  ;;  %v5619_v12 = vld [vmem:[#allocation5 + $0x54] sm:$0xf] }
  0x32   :  { %v279_v11 = vand.u32 %v4066_v6, %v277_v2  ;;  %v4059_v13 = vld [vmem:[#allocation5 + $0x58] sm:$0xf0]  ;;  %v4058_v15 = vor.u32 %v5620_v10, %v4057_v9  ;;  %v4049_v17 = vld [vmem:[#allocation5 + $0x40] sm:$0xf]  ;;  %v5618_v18 = vld [vmem:[#allocation5 + $0x44] sm:$0xf0] }
  0x33   :  { %v282_v14 = vand.u32 %v4070_v8, %v277_v2  ;;  %v4062_v16 = vor.u32 %v5619_v12, %v4059_v13  ;;  %v5617_v19 = vld [vmem:[#allocation5 + $0x44] sm:$0xf]  ;;  %v4051_v20 = vld [vmem:[#allocation5 + $0x48] sm:$0xf0]  ;;  %v4050_v21 = vor.u32 %v5618_v18, %v4049_v17  ;;  %v4041_v23 = vld [vmem:[#allocation5 + $0x30] sm:$0xf] }
  0x34   :  { %285 = vmatpush.bf16.msra.mxu0 %v279_v11  ;;  %v4054_v22 = vor.u32 %v5617_v19, %v4051_v20  ;;  %v5616_v24 = vld [vmem:[#allocation5 + $0x34] sm:$0xf0]  ;;  %v5615_v25 = vld [vmem:[#allocation5 + $0x34] sm:$0xf]  ;;  %v4043_v26 = vld [vmem:[#allocation5 + $0x38] sm:$0xf0] }
  0x35   :  { %298 = vmatpush.bf16.msra.mxu1 %v282_v14  ;;  %v4042_v27 = vor.u32 %v5616_v24, %v4041_v23  ;;  %v4046_v28 = vor.u32 %v5615_v25, %v4043_v26  ;;  %v4033_v29 = vld [vmem:[#allocation5 + $0x20] sm:$0xf]  ;;  %v5614_v30 = vld [vmem:[#allocation5 + $0x24] sm:$0xf0]  ;;  %v5613_v31 = vld [vmem:[#allocation5 + $0x24] sm:$0xf] }
  0x36   :  { %v4035_v32 = vld [vmem:[#allocation5 + $0x28] sm:$0xf0]  ;;  %v4034_v33 = vor.u32 %v5614_v30, %v4033_v29  ;;  %v4025_v35 = vld [vmem:[#allocation5 + $0x10] sm:$0xf]  ;;  %v5612_v36 = vld [vmem:[#allocation5 + $0x14] sm:$0xf0] }
  0x37   :  { %v4038_v34 = vor.u32 %v5613_v31, %v4035_v32  ;;  %v5611_v37 = vld [vmem:[#allocation5 + $0x14] sm:$0xf]  ;;  %v4027_v38 = vld [vmem:[#allocation5 + $0x18] sm:$0xf0]  ;;  %v4026_v39 = vor.u32 %v5612_v36, %v4025_v35  ;;  %v4017_v41 = vld [vmem:[#allocation5] sm:$0xf] }
  0x38   :  { %286 = vmatpush.bf16.msra.mxu0 %v4058_v15  ;;  %v4030_v40 = vor.u32 %v5611_v37, %v4027_v38  ;;  %v5610_v42 = vld [vmem:[#allocation5 + $0x4] sm:$0xf0]  ;;  %v5609_v43 = vld [vmem:[#allocation5 + $0x4] sm:$0xf]  ;;  %v4019_v44 = vld [vmem:[#allocation5 + $0x8] sm:$0xf0] }
  0x39   :  { %299 = vmatpush.bf16.msra.mxu1 %v4062_v16  ;;  %v4018_v45 = vor.u32 %v5610_v42, %v4017_v41  ;;  %v4022_v46 = vor.u32 %v5609_v43, %v4019_v44  ;;  %v187_v47 = vld [vmem:[#allocation2] sm:$0xf]  ;;  %v4187_v48 = vld [vmem:[#allocation10 + $0xe0] sm:$0xf]  ;;  %v5653_v49 = vld [vmem:[#allocation10 + $0xec] sm:$0xf0] }
  0x3a   :  { %v4315_v50 = vld [vmem:[#allocation10 + $0x1e0] sm:$0xf]  ;;  %v4188_v51 = vor.u32 %v5653_v49, %v4187_v48  ;;  %v5685_v52 = vld [vmem:[#allocation10 + $0x1ec] sm:$0xf0]  ;;  %v5651_v53 = vld [vmem:[#allocation10 + $0xe4] sm:$0xf] }
  0x3b   :  { %v4189_v54 = vld [vmem:[#allocation10 + $0xf0] sm:$0xf0]  ;;  %v4316_v55 = vor.u32 %v5685_v52, %v4315_v50  ;;  %v5683_v57 = vld [vmem:[#allocation10 + $0x1e4] sm:$0xf]  ;;  %v4171_v60 = vld [vmem:[#allocation10 + $0xc0] sm:$0xf] }
  0x3c   :  { %287 = vmatpush.bf16.msra.mxu0 %v4050_v21  ;;  %v4192_v56 = vor.u32 %v5651_v53, %v4189_v54  ;;  %v4317_v58 = vld [vmem:[#allocation10 + $0x1f0] sm:$0xf0]  ;;  %785 = vmatpush.bf16.msra.mxu2 %v4188_v51  ;;  %v5649_v61 = vld [vmem:[#allocation10 + $0xcc] sm:$0xf0]  ;;  %v4299_v62 = vld [vmem:[#allocation10 + $0x1c0] sm:$0xf] }
  0x3d   :  { %300 = vmatpush.bf16.msra.mxu1 %v4054_v22  ;;  %v4320_v59 = vor.u32 %v5683_v57, %v4317_v58  ;;  %798 = vmatpush.bf16.msra.mxu3 %v4316_v55  ;;  %v4172_v63 = vor.u32 %v5649_v61, %v4171_v60  ;;  %v5681_v0 = vld [vmem:[#allocation10 + $0x1cc] sm:$0xf0]  ;;  %v5647_v1 = vld [vmem:[#allocation10 + $0xc4] sm:$0xf]  ;;  %v4173_v2 = vld [vmem:[#allocation10 + $0xd0] sm:$0xf0] }
  0x3e   :  { %v4300_v3 = vor.u32 %v5681_v0, %v4299_v62  ;;  %v4176_v4 = vor.u32 %v5647_v1, %v4173_v2  ;;  %v5679_v5 = vld [vmem:[#allocation10 + $0x1c4] sm:$0xf]  ;;  %v4301_v6 = vld [vmem:[#allocation10 + $0x1d0] sm:$0xf0]  ;;  %v4155_v8 = vld [vmem:[#allocation10 + $0xa0] sm:$0xf] }
  0x3f   :  { %v4304_v7 = vor.u32 %v5679_v5, %v4301_v6  ;;  %v5645_v9 = vld [vmem:[#allocation10 + $0xac] sm:$0xf0]  ;;  %v4283_v10 = vld [vmem:[#allocation10 + $0x1a0] sm:$0xf]  ;;  %v5643_v13 = vld [vmem:[#allocation10 + $0xa4] sm:$0xf] }
  0x40   :  { %288 = vmatpush.bf16.msra.mxu0 %v4042_v27  ;;  %786 = vmatpush.bf16.msra.mxu2 %v4172_v63  ;;  %v4156_v11 = vor.u32 %v5645_v9, %v4155_v8  ;;  %v5677_v12 = vld [vmem:[#allocation10 + $0x1ac] sm:$0xf0]  ;;  %v4157_v14 = vld [vmem:[#allocation10 + $0xb0] sm:$0xf0]  ;;  %v5675_v17 = vld [vmem:[#allocation10 + $0x1a4] sm:$0xf] }
  0x41   :  { %301 = vmatpush.bf16.msra.mxu1 %v4046_v28  ;;  %799 = vmatpush.bf16.msra.mxu3 %v4300_v3  ;;  %v4284_v15 = vor.u32 %v5677_v12, %v4283_v10  ;;  %v4160_v16 = vor.u32 %v5643_v13, %v4157_v14  ;;  %v4285_v18 = vld [vmem:[#allocation10 + $0x1b0] sm:$0xf0]  ;;  %v4139_v20 = vld [vmem:[#allocation10 + $0x80] sm:$0xf]  ;;  %v5641_v21 = vld [vmem:[#allocation10 + $0x8c] sm:$0xf0] }
  0x42   :  { %v4288_v19 = vor.u32 %v5675_v17, %v4285_v18  ;;  %v4267_v22 = vld [vmem:[#allocation10 + $0x180] sm:$0xf]  ;;  %v4140_v23 = vor.u32 %v5641_v21, %v4139_v20  ;;  %v5673_v24 = vld [vmem:[#allocation10 + $0x18c] sm:$0xf0]  ;;  %v5639_v25 = vld [vmem:[#allocation10 + $0x84] sm:$0xf] }
  0x43   :  { %v4141_v26 = vld [vmem:[#allocation10 + $0x90] sm:$0xf0]  ;;  %v4268_v27 = vor.u32 %v5673_v24, %v4267_v22  ;;  %v5671_v29 = vld [vmem:[#allocation10 + $0x184] sm:$0xf]  ;;  %v4123_v32 = vld [vmem:[#allocation10 + $0x60] sm:$0xf] }
  0x44   :  { %289 = vmatpush.bf16.msra.mxu0 %v4034_v33  ;;  %787 = vmatpush.bf16.msra.mxu2 %v4156_v11  ;;  %v4144_v28 = vor.u32 %v5639_v25, %v4141_v26  ;;  %v4269_v30 = vld [vmem:[#allocation10 + $0x190] sm:$0xf0]  ;;  %v5637_v33 = vld [vmem:[#allocation10 + $0x6c] sm:$0xf0]  ;;  %v5635_v37 = vld [vmem:[#allocation10 + $0x64] sm:$0xf] }
  0x45   :  { %302 = vmatpush.bf16.msra.mxu1 %v4038_v34  ;;  %800 = vmatpush.bf16.msra.mxu3 %v4284_v15  ;;  %v4272_v31 = vor.u32 %v5671_v29, %v4269_v30  ;;  %v4251_v34 = vld [vmem:[#allocation10 + $0x160] sm:$0xf]  ;;  %v4124_v35 = vor.u32 %v5637_v33, %v4123_v32  ;;  %v5669_v36 = vld [vmem:[#allocation10 + $0x16c] sm:$0xf0]  ;;  %v4125_v38 = vld [vmem:[#allocation10 + $0x70] sm:$0xf0] }
  0x46   :  { %v5667_v41 = vld [vmem:[#allocation10 + $0x164] sm:$0xf]  ;;  %v4253_v42 = vld [vmem:[#allocation10 + $0x170] sm:$0xf0]  ;;  %v5665_v52 = vld [vmem:[#allocation10 + $0x14c] sm:$0xf0] }
  0x47   :  { %v4256_v43 = vor.u32 %v5667_v41, %v4253_v42  ;;  %v5631_v53 = vld [vmem:[#allocation10 + $0x44] sm:$0xf]  ;;  %v4109_v57 = vld [vmem:[#allocation10 + $0x50] sm:$0xf0]  ;;  %v4091_v2 = vld [vmem:[#allocation10 + $0x20] sm:$0xf] }
  0x48   :  { %290 = vmatpush.bf16.msra.mxu0 %v4026_v39  ;;  %788 = vmatpush.bf16.msra.mxu2 %v4140_v23  ;;  %v4252_v39 = vor.u32 %v5669_v36, %v4251_v34  ;;  %v5663_v58 = vld [vmem:[#allocation10 + $0x144] sm:$0xf]  ;;  %v4112_v61 = vor.u32 %v5631_v53, %v4109_v57  ;;  %v4237_v62 = vld [vmem:[#allocation10 + $0x150] sm:$0xf0]  ;;  %v5629_v3 = vld [vmem:[#allocation10 + $0x2c] sm:$0xf0] }
  0x49   :  { %303 = vmatpush.bf16.msra.mxu1 %v4030_v40  ;;  %801 = vmatpush.bf16.msra.mxu3 %v4268_v27  ;;  %v4128_v40 = vor.u32 %v5635_v37, %v4125_v38  ;;  %v4240_v1 = vor.u32 %v5663_v58, %v4237_v62  ;;  %v4092_v6 = vor.u32 %v5629_v3, %v4091_v2  ;;  %v5661_v8 = vld [vmem:[#allocation10 + $0x12c] sm:$0xf0]  ;;  %v5627_v12 = vld [vmem:[#allocation10 + $0x24] sm:$0xf]  ;;  %v4093_v13 = vld [vmem:[#allocation10 + $0x30] sm:$0xf0] }
  0x4a   :  { %v5659_v17 = vld [vmem:[#allocation10 + $0x124] sm:$0xf]  ;;  %v4221_v18 = vld [vmem:[#allocation10 + $0x130] sm:$0xf0]  ;;  %v4075_v22 = vld [vmem:[#allocation10] sm:$0xf] }
  0x4b   :  { %v4224_v26 = vor.u32 %v5659_v17, %v4221_v18  ;;  %v5625_v27 = vld [vmem:[#allocation10 + $0xc] sm:$0xf0]  ;;  %v5623_v33 = vld [vmem:[#allocation10 + $0x4] sm:$0xf]  ;;  %v4077_v37 = vld [vmem:[#allocation10 + $0x10] sm:$0xf0] }
  0x4c   :  { %291 = vmatpush.bf16.msra.mxu0 %v4018_v45  ;;  %789 = vmatpush.bf16.msra.mxu2 %v4124_v35  ;;  %v4107_v45 = vld [vmem:[#allocation10 + $0x40] sm:$0xf]  ;;  %v5657_v32 = vld [vmem:[#allocation10 + $0x10c] sm:$0xf0]  ;;  %v5655_v38 = vld [vmem:[#allocation10 + $0x104] sm:$0xf]  ;;  %v4080_v41 = vor.u32 %v5623_v33, %v4077_v37 }
  0x4d   :  { %304 = vmatpush.bf16.msra.mxu1 %v4022_v46  ;;  %802 = vmatpush.bf16.msra.mxu3 %v4252_v39  ;;  %v5633_v46 = vld [vmem:[#allocation10 + $0x4c] sm:$0xf0]  ;;  %v4205_v42 = vld [vmem:[#allocation10 + $0x110] sm:$0xf0]  ;;  %v4323_v53 = vld [vmem:[#allocation10 + $0x1e8] sm:$0xf] }
  0x4e   :  { %v4108_v51 = vor.u32 %v5633_v46, %v4107_v45  ;;  %v5652_v58 = vld [vmem:[#allocation10 + $0xec] sm:$0xf]  ;;  %v4179_v3 = vld [vmem:[#allocation10 + $0xc8] sm:$0xf]  ;;  %v5642_v33 = vld [vmem:[#allocation10 + $0x94] sm:$0xf0] }
  0x4f   :  { %4071 = vmatmul.msk.bf16.vlgmr.msra.gmra.mxu0 %vm270_vm2, %v187_v47  ;;  %v4163_v18 = vld [vmem:[#allocation10 + $0xa8] sm:$0xf] }
  0x50   :  { %4072 = vmatmul.msk.bf16.vlgmr.msra.gmra.mxu1 %vm270_vm2, %v187_v47  ;;  %811 = vmatpush.bf16.msrb.mxu0 %v4192_v56  ;;  %v4235_v47 = vld [vmem:[#allocation10 + $0x140] sm:$0xf] }
  0x51   :  { %824 = vmatpush.bf16.msrb.mxu1 %v4320_v59  ;;  %v4236_v56 = vor.u32 %v5665_v52, %v4235_v47  ;;  %790 = vmatpush.bf16.msra.mxu2 %v4108_v51  ;;  %v4208_v47 = vor.u32 %v5655_v38, %v4205_v42  ;;  %v5640_v38 = vld [vmem:[#allocation10 + $0x8c] sm:$0xf]  ;;  %v4277_v42 = vld [vmem:[#allocation10 + $0x198] sm:$0xf0] }
  0x53   :  { %803 = vmatpush.bf16.msra.mxu3 %v4236_v56 }
  0x54   :  { %812 = vmatpush.bf16.msrb.mxu0 %v4176_v4 }
  0x55   :  { %825 = vmatpush.bf16.msrb.mxu1 %v4304_v7  ;;  %v4219_v7 = vld [vmem:[#allocation10 + $0x120] sm:$0xf]  ;;  %791 = vmatpush.bf16.msra.mxu2 %v4092_v6 }
  0x56   :  { %v4220_v11 = vor.u32 %v5661_v8, %v4219_v7  ;;  %v5682_v8 = vld [vmem:[#allocation10 + $0x1d4] sm:$0xf0] }
  0x58   :  { %813 = vmatpush.bf16.msrb.mxu0 %v4160_v16  ;;  %v4096_v16 = vor.u32 %v5627_v12, %v4093_v13  ;;  %804 = vmatpush.bf16.msra.mxu3 %v4220_v11 }
  0x59   :  { %826 = vmatpush.bf16.msrb.mxu1 %v4288_v19 }
  0x5c   :  { %814 = vmatpush.bf16.msrb.mxu0 %v4144_v28  ;;  %v4203_v28 = vld [vmem:[#allocation10 + $0x100] sm:$0xf] }
  0x5d   :  { %827 = vmatpush.bf16.msrb.mxu1 %v4272_v31  ;;  %v4076_v31 = vor.u32 %v5625_v27, %v4075_v22  ;;  %v4204_v36 = vor.u32 %v5657_v32, %v4203_v28  ;;  %v4291_v22 = vld [vmem:[#allocation10 + $0x1a8] sm:$0xf]  ;;  %v4165_v27 = vld [vmem:[#allocation10 + $0xb8] sm:$0xf0] }
  0x5f   :  { %792 = vmatpush.bf16.msra.mxu2 %v4076_v31  ;;  %805 = vmatpush.bf16.msra.mxu3 %v4204_v36  ;;  %v4147_v31 = vld [vmem:[#allocation10 + $0x88] sm:$0xf] }
  0x60   :  { %815 = vmatpush.bf16.msrb.mxu0 %v4128_v40  ;;  %v4148_v36 = vor.u32 %v5642_v33, %v4147_v31  ;;  %v5626_v33 = vld [vmem:[#allocation10 + $0x14] sm:$0xf0] }
  0x61   :  { %828 = vmatpush.bf16.msrb.mxu1 %v4256_v43  ;;  %v4195_v43 = vld [vmem:[#allocation10 + $0xe8] sm:$0xf] }
  0x64   :  { %816 = vmatpush.bf16.msrb.mxu0 %v4112_v61 }
  0x65   :  { %829 = vmatpush.bf16.msrb.mxu1 %v4240_v1 }
  0x68   :  { %817 = vmatpush.bf16.msrb.mxu0 %v4096_v16 }
  0x69   :  { %830 = vmatpush.bf16.msrb.mxu1 %v4224_v26  ;;  %v5644_v26 = vld [vmem:[#allocation10 + $0xac] sm:$0xf] }
  0x6a   :  { %v4168_v28 = vor.u32 %v5644_v26, %v4165_v27  ;;  %v5660_v27 = vld [vmem:[#allocation10 + $0x12c] sm:$0xf] }
  0x6c   :  { %818 = vmatpush.bf16.msrb.mxu0 %v4080_v41 }
  0x6d   :  { %831 = vmatpush.bf16.msrb.mxu1 %v4208_v47 }
  0xcc   :  { %v6451_v44 = vpop.f32.mrf.mxu0 }
  0xcd   :  { %v312_v48 = vrot.slane %v6451_v44, 4  ;;  %v324_v49 = vmul.f32 %v6451_v44, %v6451_v44  ;;  %v6456_v50 = vpop.f32.mrf.mxu1 }
  0xce   :  { %v318_v54 = vrot.slane %v6456_v50, 4  ;;  %v325_v55 = vmul.f32 %v6456_v50, %v6456_v50 }
  0xcf   :  { %v313_v59 = vadd.f32 %v312_v48, %v6451_v44  ;;  %v326_v60 = vrot.slane %v324_v49, 4  ;;  %v5654_v48 = vld [vmem:[#allocation10 + $0xf4] sm:$0xf0] }
  0xd0   :  { %v319_v63 = vadd.f32 %v318_v54, %v6456_v50  ;;  %v332_v0 = vrot.slane %v325_v55, 4  ;;  %v4196_v52 = vor.u32 %v5654_v48, %v4195_v43  ;;  %v5686_v54 = vld [vmem:[#allocation10 + $0x1f4] sm:$0xf0]  ;;  %v4131_v43 = vld [vmem:[#allocation10 + $0x68] sm:$0xf] }
  0xd1   :  { %v314_v4 = vrot.slane %v313_v59, 2  ;;  %v327_v5 = vadd.f32 %v326_v60, %v324_v49  ;;  %v4324_v57 = vor.u32 %v5686_v54, %v4323_v53  ;;  %v4259_v48 = vld [vmem:[#allocation10 + $0x168] sm:$0xf]  ;;  %v4133_v54 = vld [vmem:[#allocation10 + $0x78] sm:$0xf0] }
  0xd2   :  { %v320_v9 = vrot.slane %v319_v63, 2  ;;  %v333_v10 = vadd.f32 %v332_v0, %v325_v55  ;;  %837 = vmatpush.bf16.msrb.mxu2 %v4196_v52  ;;  %v4325_v0 = vld [vmem:[#allocation10 + $0x1f8] sm:$0xf0]  ;;  %v5636_v52 = vld [vmem:[#allocation10 + $0x6c] sm:$0xf] }
  0xd3   :  { %v315_v14 = vadd.f32 %v314_v4, %v313_v59  ;;  %v328_v15 = vrot.slane %v327_v5, 2  ;;  %v4197_v59 = vld [vmem:[#allocation10 + $0xf8] sm:$0xf0]  ;;  %850 = vmatpush.bf16.msrb.mxu3 %v4324_v57  ;;  %v5650_v4 = vld [vmem:[#allocation10 + $0xd4] sm:$0xf0] }
  0xd4   :  { %v321_v19 = vadd.f32 %v320_v9, %v319_v63  ;;  %v334_v20 = vrot.slane %v333_v10, 2  ;;  %v295_v21 = vpop.f32.mrf.mxu0  ;;  %v4200_v62 = vor.u32 %v5652_v58, %v4197_v59  ;;  %v5684_v63 = vld [vmem:[#allocation10 + $0x1ec] sm:$0xf]  ;;  %v4180_v7 = vor.u32 %v5650_v4, %v4179_v3  ;;  %v4115_v59 = vld [vmem:[#allocation10 + $0x48] sm:$0xf] }
  0xd5   :  { %v316_v23 = vrot.slane %v315_v14, 1  ;;  %v329_v24 = vadd.f32 %v328_v15, %v327_v5  ;;  %v308_v25 = vpop.f32.mrf.mxu1  ;;  %v4328_v2 = vor.u32 %v5684_v63, %v4325_v0  ;;  %v4307_v5 = vld [vmem:[#allocation10 + $0x1c8] sm:$0xf]  ;;  %v5648_v9 = vld [vmem:[#allocation10 + $0xcc] sm:$0xf]  ;;  %v4136_v63 = vor.u32 %v5636_v52, %v4133_v54 }
  0xd6   :  { %v322_v29 = vrot.slane %v321_v19, 1  ;;  %v335_v30 = vadd.f32 %v334_v20, %v333_v10  ;;  %863 = vmatpush.bf16.msra.mxu0 %v4200_v62  ;;  %v4181_v10 = vld [vmem:[#allocation10 + $0xd8] sm:$0xf0]  ;;  %v4308_v12 = vor.u32 %v5682_v8, %v4307_v5  ;;  %838 = vmatpush.bf16.msrb.mxu2 %v4180_v7  ;;  %v4243_v0 = vld [vmem:[#allocation10 + $0x148] sm:$0xf] }
  0xd7   :  { %v317_v34 = vadd.f32 %v316_v23, %v315_v14  ;;  %v330_v35 = vrot.slane %v329_v24, 1  ;;  %876 = vmatpush.bf16.msra.mxu1 %v4328_v2  ;;  %v4184_v13 = vor.u32 %v5648_v9, %v4181_v10  ;;  %v5680_v14 = vld [vmem:[#allocation10 + $0x1cc] sm:$0xf]  ;;  %v4309_v15 = vld [vmem:[#allocation10 + $0x1d8] sm:$0xf0] }
  0xd8   :  { %v323_v39 = vadd.f32 %v322_v29, %v321_v19  ;;  %v336_v40 = vrot.slane %v335_v30, 1  ;;  %v4312_v17 = vor.u32 %v5680_v14, %v4309_v15  ;;  %v5646_v19 = vld [vmem:[#allocation10 + $0xb4] sm:$0xf0]  ;;  %851 = vmatpush.bf16.msrb.mxu3 %v4308_v12  ;;  %v5676_v29 = vld [vmem:[#allocation10 + $0x1ac] sm:$0xf] }
  0xd9   :  { %v331_v45 = vadd.f32 %v330_v35, %v329_v24  ;;  %v6463_v46 = vmul.f32 0.125, %v317_v34  ;;  %v4164_v21 = vor.u32 %v5646_v19, %v4163_v18  ;;  %v5678_v23 = vld [vmem:[#allocation10 + $0x1b4] sm:$0xf0]  ;;  %v4275_v34 = vld [vmem:[#allocation10 + $0x188] sm:$0xf] }
  0xda   :  { %v337_v49 = vadd.f32 %v336_v40, %v335_v30  ;;  %v6465_v51 = vmul.f32 0.125, %v323_v39  ;;  %864 = vmatpush.bf16.msra.mxu0 %v4184_v13  ;;  %v4292_v25 = vor.u32 %v5678_v23, %v4291_v22  ;;  %v4293_v30 = vld [vmem:[#allocation10 + $0x1b8] sm:$0xf0]  ;;  %v5674_v35 = vld [vmem:[#allocation10 + $0x194] sm:$0xf0] }
  0xdb   :  { %v340_v55 = vmul.f32 0.125, %v331_v45  ;;  %v342_v56 = vmul.f32 %v6463_v46, %v6463_v46  ;;  %877 = vmatpush.bf16.msra.mxu1 %v4312_v17  ;;  %839 = vmatpush.bf16.msrb.mxu2 %v4164_v21  ;;  %v4296_v32 = vor.u32 %v5676_v29, %v4293_v30  ;;  %v4276_v37 = vor.u32 %v5674_v35, %v4275_v34  ;;  %v4149_v39 = vld [vmem:[#allocation10 + $0x98] sm:$0xf0]  ;;  %v5672_v40 = vld [vmem:[#allocation10 + $0x18c] sm:$0xf] }
  0xdc   :  { %v341_v60 = vmul.f32 0.125, %v337_v49  ;;  %v343_v61 = vmul.f32 %v6465_v51, %v6465_v51  ;;  %852 = vmatpush.bf16.msrb.mxu3 %v4292_v25  ;;  %v4152_v41 = vor.u32 %v5640_v38, %v4149_v39  ;;  %v5638_v45 = vld [vmem:[#allocation10 + $0x74] sm:$0xf0]  ;;  %v4280_v47 = vor.u32 %v5672_v40, %v4277_v42  ;;  %v5632_v4 = vld [vmem:[#allocation10 + $0x4c] sm:$0xf] }
  0xdd   :  { %v344_v1 = vsub.f32 %v340_v55, %v342_v56  ;;  %v5670_v49 = vld [vmem:[#allocation10 + $0x174] sm:$0xf0]  ;;  %v4132_v53 = vor.u32 %v5638_v45, %v4131_v43  ;;  %v5668_v55 = vld [vmem:[#allocation10 + $0x16c] sm:$0xf]  ;;  %v4261_v56 = vld [vmem:[#allocation10 + $0x178] sm:$0xf0] }
  0xde   :  { %v345_v6 = vsub.f32 %v341_v60, %v343_v61  ;;  %865 = vmatpush.bf16.msra.mxu0 %v4168_v28  ;;  %v4260_v58 = vor.u32 %v5670_v49, %v4259_v48  ;;  %v5634_v60 = vld [vmem:[#allocation10 + $0x54] sm:$0xf0]  ;;  %v4264_v3 = vor.u32 %v5668_v55, %v4261_v56  ;;  %v4117_v5 = vld [vmem:[#allocation10 + $0x58] sm:$0xf0]  ;;  %v5664_v8 = vld [vmem:[#allocation10 + $0x14c] sm:$0xf] }
  0xdf   :  { %v346_v11 = vmax.f32 %v344_v1, 0.0  ;;  %878 = vmatpush.bf16.msra.mxu1 %v4296_v32  ;;  %840 = vmatpush.bf16.msrb.mxu2 %v4148_v36  ;;  %v5666_v1 = vld [vmem:[#allocation10 + $0x154] sm:$0xf0]  ;;  %v4116_v7 = vor.u32 %v5634_v60, %v4115_v59  ;;  %v4245_v9 = vld [vmem:[#allocation10 + $0x158] sm:$0xf0] }
  0xe0   :  { %v347_v16 = vmax.f32 %v345_v6, 0.0  ;;  %853 = vmatpush.bf16.msrb.mxu3 %v4276_v37  ;;  %v310_v10 = vld [vmem:[#allocation7] sm:$0x3]  ;;  %v4244_v12 = vor.u32 %v5666_v1, %v4243_v0  ;;  %v4099_v13 = vld [vmem:[#allocation10 + $0x28] sm:$0xf]  ;;  %v4248_v21 = vor.u32 %v5664_v8, %v4245_v9 }
  0xe1   :  { %v6471_v20 = vadd.f32 1e-05, %v346_v11  ;;  %v5630_v14 = vld [vmem:[#allocation10 + $0x34] sm:$0xf0]  ;;  %v4227_v17 = vld [vmem:[#allocation10 + $0x128] sm:$0xf] }
  0xe2   :  { %v6473_v24 = vadd.f32 1e-05, %v347_v16  ;;  %866 = vmatpush.bf16.msra.mxu0 %v4152_v41  ;;  %v4120_v16 = vor.u32 %v5632_v4, %v4117_v5  ;;  %v5662_v18 = vld [vmem:[#allocation10 + $0x134] sm:$0xf0]  ;;  %v5628_v22 = vld [vmem:[#allocation10 + $0x2c] sm:$0xf]  ;;  %v4100_v26 = vor.u32 %v5630_v14, %v4099_v13 }
  0xe3   :  { %6028 = vrsqrt.f32 %v6471_v20  ;;  %879 = vmatpush.bf16.msra.mxu1 %v4280_v47  ;;  %841 = vmatpush.bf16.msrb.mxu2 %v4132_v53  ;;  %v4101_v23 = vld [vmem:[#allocation10 + $0x38] sm:$0xf0]  ;;  %v371_v29 = vperm.slane %v310_v10, 0  ;;  %v4228_v31 = vor.u32 %v5662_v18, %v4227_v17  ;;  %v4083_v32 = vld [vmem:[#allocation10 + $0x8] sm:$0xf]  ;;  %vm356_vm5 = vweird.f32 %v6471_v20 }
  0xe4   :  { %6030 = vrsqrt.f32 %v6473_v24  ;;  %854 = vmatpush.bf16.msrb.mxu3 %v4260_v58  ;;  %v4229_v28 = vld [vmem:[#allocation10 + $0x138] sm:$0xf0]  ;;  %v372_v35 = vperm.slane %v310_v10, 1  ;;  %v4104_v36 = vor.u32 %v5628_v22, %v4101_v23  ;;  %v4211_v37 = vld [vmem:[#allocation10 + $0x108] sm:$0xf]  ;;  %vm366_vm7 = vweird.f32 %v6473_v24 }
  0xe5   :  { %v5658_v38 = vld [vmem:[#allocation10 + $0x114] sm:$0xf0]  ;;  %v4232_v41 = vor.u32 %v5660_v27, %v4229_v28  ;;  %v5624_v42 = vld [vmem:[#allocation10 + $0xc] sm:$0xf]  ;;  %v4085_v43 = vld [vmem:[#allocation10 + $0x18] sm:$0xf0]  ;;  %v4084_v45 = vor.u32 %v5626_v33, %v4083_v32 }
  0xe6   :  { %867 = vmatpush.bf16.msra.mxu0 %v4136_v63  ;;  %v5656_v47 = vld [vmem:[#allocation10 + $0x10c] sm:$0xf]  ;;  %v4213_v48 = vld [vmem:[#allocation10 + $0x118] sm:$0xf0]  ;;  %v4212_v52 = vor.u32 %v5658_v38, %v4211_v37  ;;  %v4088_v54 = vor.u32 %v5624_v42, %v4085_v43  ;;  %v4555_v8 = vld [vmem:[#allocation14 + $0x1c0] sm:$0xf] }
  0xe7   :  { %880 = vmatpush.bf16.msra.mxu1 %v4264_v3  ;;  %842 = vmatpush.bf16.msrb.mxu2 %v4116_v7  ;;  %v4216_v55 = vor.u32 %v5656_v47, %v4213_v48  ;;  %v311_v58 = vld [vmem:[#allocation8] sm:$0x3]  ;;  %v4811_v9 = vld [vmem:[#allocation14 + $0x3c0] sm:$0xf] }
  0xe8   :  { %855 = vmatpush.bf16.msrb.mxu3 %v4244_v12  ;;  %v5811_v10 = vld [vmem:[#allocation14 + $0x3dc] sm:$0xf0] }
  0xe9   :  { %v6477_v57 = vpop.eup %6028  ;;  %v5875_v12 = vld [vmem:[#allocation14 + $0x5dc] sm:$0xf0]  ;;  %v4812_v13 = vor.u32 %v5811_v10, %v4811_v9 }
  0xea   :  { %v6479_v61 = vpop.eup %6030  ;;  %v351_v62 = vmul.f32 %v6477_v57, %v6471_v20  ;;  %vm357_vm3 = vweird.f32 %v6477_v57  ;;  %868 = vmatpush.bf16.msra.mxu0 %v4120_v16  ;;  %v5939_v16 = vld [vmem:[#allocation14 + $0x7dc] sm:$0xf0] }
  0xeb   :  { %v361_v2 = vmul.f32 %v6479_v61, %v6473_v24  ;;  %vm367_vm4 = vweird.f32 %v6479_v61  ;;  %vm6493_vm6 = vmor %vm356_vm5, %vm357_vm3  ;;  %881 = vmatpush.bf16.msra.mxu1 %v4248_v21  ;;  %843 = vmatpush.bf16.msrb.mxu2 %v4100_v26  ;;  %v4523_v18 = vld [vmem:[#allocation14 + $0x180] sm:$0xf] }
  0xec   :  { %v352_v6 = vmul.f32 %v6477_v57, %v351_v62  ;;  %vm368_vm8 = vmor %vm366_vm7, %vm367_vm4  ;;  %856 = vmatpush.bf16.msrb.mxu3 %v4228_v31  ;;  %v4779_v21 = vld [vmem:[#allocation14 + $0x380] sm:$0xf]  ;;  %vm1034_vm7 = vcmask 1041408  }
  0xed   :  { %v362_v11 = vmul.f32 %v6479_v61, %v361_v2  ;;  %v5803_v23 = vld [vmem:[#allocation14 + $0x39c] sm:$0xf0] }
  0xee   :  { %v353_v15 = vmul.f32 0.5, %v352_v6  ;;  %869 = vmatpush.bf16.msra.mxu0 %v4104_v36  ;;  %v5867_v26 = vld [vmem:[#allocation14 + $0x59c] sm:$0xf0]  ;;  %v4780_v27 = vor.u32 %v5803_v23, %v4779_v21 }
  0xef   :  { %v363_v19 = vmul.f32 0.5, %v362_v11  ;;  %882 = vmatpush.bf16.msra.mxu1 %v4232_v41  ;;  %844 = vmatpush.bf16.msrb.mxu2 %v4084_v45  ;;  %v5067_v11 = vld [vmem:[#allocation14 + $0x5c0] sm:$0xf] }
  0xf0   :  { %v354_v25 = vsub.f32 1.5, %v353_v15  ;;  %857 = vmatpush.bf16.msrb.mxu3 %v4212_v52  ;;  %v5068_v14 = vor.u32 %v5875_v12, %v5067_v11  ;;  %v5323_v15 = vld [vmem:[#allocation14 + $0x7c0] sm:$0xf] }
  0xf1   :  { %v364_v30 = vsub.f32 1.5, %v363_v19  ;;  %v5324_v17 = vor.u32 %v5939_v16, %v5323_v15  ;;  %v5739_v19 = vld [vmem:[#allocation14 + $0x19c] sm:$0xf0] }
  0xf2   :  { %v355_v34 = vmul.f32 %v6477_v57, %v354_v25  ;;  %870 = vmatpush.bf16.msra.mxu0 %v4088_v54  ;;  %v4524_v22 = vor.u32 %v5739_v19, %v4523_v18  ;;  %v5035_v25 = vld [vmem:[#allocation14 + $0x580] sm:$0xf] }
  0xf3   :  { %v365_v40 = vmul.f32 %v6479_v61, %v364_v30  ;;  %883 = vmatpush.bf16.msra.mxu1 %v4216_v55  ;;  %v5036_v28 = vor.u32 %v5867_v26, %v5035_v25  ;;  %v5931_v30 = vld [vmem:[#allocation14 + $0x79c] sm:$0xf0] }
  0xf4   :  { %v359_v20 = vsel %vm6493_vm6, %v6477_v57, %v355_v34  ;;  %v4491_v32 = vld [vmem:[#allocation14 + $0x140] sm:$0xf]  ;;  %vm1032_vm6 = vcmask 1042434  }
  0xf5   :  { %v369_v49 = vsel %vm368_vm8, %v6479_v61, %v365_v40  ;;  %v375_v24 = vmul.f32 %v371_v29, %v359_v20  ;;  %v5291_v29 = vld [vmem:[#allocation14 + $0x780] sm:$0xf] }
  0xf6   :  { %v376_v53 = vmul.f32 %v372_v35, %v369_v49  ;;  %v5292_v31 = vor.u32 %v5931_v30, %v5291_v29  ;;  %v5731_v33 = vld [vmem:[#allocation14 + $0x15c] sm:$0xf0] }
  0xf7   :  { %v377_v57 = vmul.f32 %v375_v24, %v6463_v46  ;;  %v386_v60 = vperm.slane %v375_v24, 0  ;;  %v4747_v34 = vld [vmem:[#allocation14 + $0x340] sm:$0xf]  ;;  %v4492_v35 = vor.u32 %v5731_v33, %v4491_v32 }
  0xf8   :  { %v378_v56 = vmul.f32 %v376_v53, %v6465_v51  ;;  %v387_v61 = vperm.slane %v376_v53, 0  ;;  %v5795_v36 = vld [vmem:[#allocation14 + $0x35c] sm:$0xf0] }
  0xf9   :  { %v388_v0 = vmul.f32 %v386_v60, %v6451_v44  ;;  %v5747_v44 = vld [vmem:[#allocation14 + $0x1dc] sm:$0xf0]  ;;  %v4748_v41 = vor.u32 %v5795_v36, %v4747_v34 }
  0xfa   :  { %v381_v59 = vrot.slane %v378_v56, 7  ;;  %v389_v1 = vmul.f32 %v387_v61, %v6456_v50  ;;  %v4556_v50 = vor.u32 %v5747_v44, %v4555_v8  ;;  %v5003_v37 = vld [vmem:[#allocation14 + $0x540] sm:$0xf] }
  0xfb   :  { %v5859_v38 = vld [vmem:[#allocation14 + $0x55c] sm:$0xf0] }
  0xfc   :  { %v383_v62 = vsel %vm382_vm9, %v377_v57, %v381_v59  ;;  %v5004_v42 = vor.u32 %v5859_v38, %v5003_v37  ;;  %v5259_v43 = vld [vmem:[#allocation14 + $0x740] sm:$0xf] }
  0xfd   :  { %v385_v63 = vsub.f32 %v311_v58, %v383_v62  ;;  %v5923_v20 = vld [vmem:[#allocation14 + $0x75c] sm:$0xf0] }
  0xfe   :  { %v5260_v47 = vor.u32 %v5923_v20, %v5259_v43  ;;  %v4459_v48 = vld [vmem:[#allocation14 + $0x100] sm:$0xf] }
  0xff   :  { %v392_v2 = vperm.slane %v385_v63, 1  ;;  %v391_v51 = vperm.slane %v385_v63, 0  ;;  %v5723_v49 = vld [vmem:[#allocation14 + $0x11c] sm:$0xf0] }
 0x100   :  { %v4715_v52 = vld [vmem:[#allocation14 + $0x300] sm:$0xf]  ;;  %v4460_v54 = vor.u32 %v5723_v49, %v4459_v48 }
 0x101   :  { %v396_v3 = vadd.f32 %v392_v2, %v389_v1  ;;  %v395_v4 = vadd.f32 %v391_v51, %v388_v0  ;;  %v5787_v55 = vld [vmem:[#allocation14 + $0x31c] sm:$0xf0] }
 0x102   :  { %v4971_v56 = vld [vmem:[#allocation14 + $0x500] sm:$0xf]  ;;  %v4716_v57 = vor.u32 %v5787_v55, %v4715_v52 }
 0x103   :  { %v397_v5 = vmax.f32 %v395_v4, 0.0  ;;  %v398_v6 = vmax.f32 %v396_v3, 0.0  ;;  %v5851_v58 = vld [vmem:[#allocation14 + $0x51c] sm:$0xf0] }
 0x104   :  { %v5227_v59 = vld [vmem:[#allocation14 + $0x700] sm:$0xf]  ;;  %v4972_v1 = vor.u32 %v5851_v58, %v4971_v56 }
 0x105   :  { %v399_v46 = vpack.c.bf16 %v397_v5, %v397_v5  ;;  %v400_v7 = vpack.c.bf16 %v398_v6, %v398_v6  ;;  %v5915_v60 = vld [vmem:[#allocation14 + $0x71c] sm:$0xf0] }
 0x106   :  { %v5228_v2 = vor.u32 %v5915_v60, %v5227_v59  ;;  %v4427_v3 = vld [vmem:[#allocation14 + $0xc0] sm:$0xf] }
 0x107   :  { %793 = vmatmul.bf16.vlgmr.msra.gmra.mxu2 %v399_v46  ;;  %806 = vmatmul.bf16.vlgmr.msra.gmra.mxu3 %v400_v7  ;;  %v5715_v4 = vld [vmem:[#allocation14 + $0xdc] sm:$0xf0] }
 0x108   :  { %819 = vmatmul.bf16.vlgmr.msrb.gmra.mxu0 %v399_v46  ;;  %832 = vmatmul.bf16.vlgmr.msrb.gmra.mxu1 %v400_v7  ;;  %v4683_v5 = vld [vmem:[#allocation14 + $0x2c0] sm:$0xf] }
 0x109   :  { %2603 = vmatpush.bf16.msra.mxu2 %v4556_v50  ;;  %2616 = vmatpush.bf16.msra.mxu3 %v4812_v13  ;;  %v5779_v8 = vld [vmem:[#allocation14 + $0x2dc] sm:$0xf0] }
 0x10a   :  { %2629 = vmatpush.bf16.msrb.mxu0 %v5068_v14  ;;  %2642 = vmatpush.bf16.msrb.mxu1 %v5324_v17  ;;  %v4939_v44 = vld [vmem:[#allocation14 + $0x4c0] sm:$0xf]  ;;  %v4684_v12 = vor.u32 %v5779_v8, %v4683_v5 }
 0x10b   :  { %v5843_v13 = vld [vmem:[#allocation14 + $0x4dc] sm:$0xf0] }
 0x10c   :  { %v5195_v14 = vld [vmem:[#allocation14 + $0x6c0] sm:$0xf]  ;;  %v4940_v17 = vor.u32 %v5843_v13, %v4939_v44 }
 0x10d   :  { %2604 = vmatpush.bf16.msra.mxu2 %v4524_v22  ;;  %2617 = vmatpush.bf16.msra.mxu3 %v4780_v27  ;;  %v5907_v18 = vld [vmem:[#allocation14 + $0x6dc] sm:$0xf0] }
 0x10e   :  { %2630 = vmatpush.bf16.msrb.mxu0 %v5036_v28  ;;  %2643 = vmatpush.bf16.msrb.mxu1 %v5292_v31  ;;  %v5196_v22 = vor.u32 %v5907_v18, %v5195_v14  ;;  %v4395_v23 = vld [vmem:[#allocation14 + $0x80] sm:$0xf] }
 0x10f   :  { %v5707_v25 = vld [vmem:[#allocation14 + $0x9c] sm:$0xf0] }
 0x110   :  { %v4396_v28 = vor.u32 %v5707_v25, %v4395_v23  ;;  %v4651_v29 = vld [vmem:[#allocation14 + $0x280] sm:$0xf] }
 0x111   :  { %2605 = vmatpush.bf16.msra.mxu2 %v4492_v35  ;;  %2618 = vmatpush.bf16.msra.mxu3 %v4748_v41  ;;  %v5771_v30 = vld [vmem:[#allocation14 + $0x29c] sm:$0xf0] }
 0x112   :  { %2631 = vmatpush.bf16.msrb.mxu0 %v5004_v42  ;;  %2644 = vmatpush.bf16.msrb.mxu1 %v5260_v47  ;;  %v4652_v33 = vor.u32 %v5771_v30, %v4651_v29  ;;  %v4907_v34 = vld [vmem:[#allocation14 + $0x480] sm:$0xf] }
 0x113   :  { %v5835_v35 = vld [vmem:[#allocation14 + $0x49c] sm:$0xf0] }
 0x114   :  { %v5163_v41 = vld [vmem:[#allocation14 + $0x680] sm:$0xf] }
 0x115   :  { %2606 = vmatpush.bf16.msra.mxu2 %v4460_v54  ;;  %2619 = vmatpush.bf16.msra.mxu3 %v4716_v57  ;;  %v5899_v42 = vld [vmem:[#allocation14 + $0x69c] sm:$0xf0] }
 0x116   :  { %2632 = vmatpush.bf16.msrb.mxu0 %v4972_v1  ;;  %2645 = vmatpush.bf16.msrb.mxu1 %v5228_v2  ;;  %v5164_v47 = vor.u32 %v5899_v42, %v5163_v41  ;;  %v4363_v48 = vld [vmem:[#allocation14 + $0x40] sm:$0xf] }
 0x117   :  { %845 = vmatmul.bf16.vlgmr.msrb.gmra.mxu2 %v399_v46  ;;  %858 = vmatmul.bf16.vlgmr.msrb.gmra.mxu3 %v400_v7  ;;  %v5699_v49 = vld [vmem:[#allocation14 + $0x5c] sm:$0xf0] }
 0x118   :  { %871 = vmatmul.bf16.vlgmr.msra.gmra.mxu0 %v399_v46  ;;  %884 = vmatmul.bf16.vlgmr.msra.gmra.mxu1 %v400_v7  ;;  %v4428_v7 = vor.u32 %v5715_v4, %v4427_v3  ;;  %v4619_v54 = vld [vmem:[#allocation14 + $0x240] sm:$0xf] }
 0x119   :  { %2620 = vmatpush.bf16.msra.mxu3 %v4684_v12  ;;  %v5763_v55 = vld [vmem:[#allocation14 + $0x25c] sm:$0xf0] }
 0x11a   :  { %2607 = vmatpush.bf16.msra.mxu2 %v4428_v7  ;;  %2633 = vmatpush.bf16.msrb.mxu0 %v4940_v17  ;;  %v4620_v60 = vor.u32 %v5763_v55, %v4619_v54  ;;  %v5131_v3 = vld [vmem:[#allocation14 + $0x640] sm:$0xf] }
 0x11b   :  { %2646 = vmatpush.bf16.msrb.mxu1 %v5196_v22  ;;  %v5891_v4 = vld [vmem:[#allocation14 + $0x65c] sm:$0xf0] }
 0x11c   :  { %v4331_v7 = vld [vmem:[#allocation14] sm:$0xf] }
 0x11d   :  { %2621 = vmatpush.bf16.msra.mxu3 %v4652_v33  ;;  %v5691_v8 = vld [vmem:[#allocation14 + $0x1c] sm:$0xf0]  ;;  %v4557_v33 = vld [vmem:[#allocation14 + $0x1e0] sm:$0xf0] }
 0x11e   :  { %2608 = vmatpush.bf16.msra.mxu2 %v4396_v28  ;;  %v5755_v12 = vld [vmem:[#allocation14 + $0x21c] sm:$0xf0] }
 0x11f   :  { %2647 = vmatpush.bf16.msrb.mxu1 %v5164_v47  ;;  %v5819_v17 = vld [vmem:[#allocation14 + $0x41c] sm:$0xf0]  ;;  %v5871_v47 = vld [vmem:[#allocation14 + $0x5c4] sm:$0xf] }
 0x121   :  { %2622 = vmatpush.bf16.msra.mxu3 %v4620_v60 }
 0x185   :  { %v820_v39 = vpop.f32.mrf.mxu0  ;;  %v833_v40 = vpop.f32.mrf.mxu1 }
 0x186   :  { %v6510_v45 = vadd.f32 %v833_v40, %v820_v39  ;;  %v4908_v40 = vor.u32 %v5835_v35, %v4907_v34 }
 0x188   :  { %v897_v24 = vrot.slane %v6510_v45, 4  ;;  %v916_v53 = vmul.f32 %v6510_v45, %v6510_v45  ;;  %2634 = vmatpush.bf16.msrb.mxu0 %v4908_v40 }
 0x18a   :  { %v898_v61 = vadd.f32 %v897_v24, %v6510_v45  ;;  %v925_v62 = vrot.slane %v916_v53, 4  ;;  %v794_v63 = vpop.f32.mrf.mxu2  ;;  %v807_v0 = vpop.f32.mrf.mxu3 }
 0x18b   :  { %v6516_v51 = vadd.f32 %v807_v0, %v794_v63 }
 0x18c   :  { %v899_v6 = vrot.slane %v898_v61, 2  ;;  %v926_v46 = vadd.f32 %v925_v62, %v916_v53  ;;  %v4364_v53 = vor.u32 %v5699_v49, %v4363_v48  ;;  %v5827_v62 = vld [vmem:[#allocation14 + $0x45c] sm:$0xf0] }
 0x18d   :  { %v891_v9 = vrot.slane %v6516_v51, 4  ;;  %v915_v50 = vmul.f32 %v6516_v51, %v6516_v51  ;;  %v822_v10 = vpop.f32.mrf.mxu0  ;;  %v835_v11 = vpop.f32.mrf.mxu1 }
 0x18e   :  { %v900_v15 = vadd.f32 %v899_v6, %v898_v61  ;;  %v927_v16 = vrot.slane %v926_v46, 2  ;;  %v4875_v61 = vld [vmem:[#allocation14 + $0x440] sm:$0xf]  ;;  %2609 = vmatpush.bf16.msra.mxu2 %v4364_v53  ;;  %v4332_v10 = vor.u32 %v5691_v8, %v4331_v7  ;;  %v5935_v53 = vld [vmem:[#allocation14 + $0x7c4] sm:$0xf] }
 0x18f   :  { %v892_v19 = vadd.f32 %v891_v9, %v6516_v51  ;;  %v919_v21 = vrot.slane %v915_v50, 4  ;;  %v4876_v2 = vor.u32 %v5827_v62, %v4875_v61  ;;  %v4587_v11 = vld [vmem:[#allocation14 + $0x200] sm:$0xf]  ;;  %v5735_v62 = vld [vmem:[#allocation14 + $0x184] sm:$0xf] }
 0x190   :  { %v901_v26 = vrot.slane %v900_v15, 1  ;;  %v928_v27 = vadd.f32 %v927_v16, %v926_v46  ;;  %v5132_v46 = vor.u32 %v5891_v4, %v5131_v3  ;;  %v4843_v16 = vld [vmem:[#allocation14 + $0x400] sm:$0xf] }
 0x191   :  { %v893_v31 = vrot.slane %v892_v19, 2  ;;  %v920_v32 = vadd.f32 %v919_v21, %v915_v50  ;;  %2635 = vmatpush.bf16.msrb.mxu0 %v4876_v2  ;;  %v4844_v25 = vor.u32 %v5819_v17, %v4843_v16 }
 0x192   :  { %v902_v36 = vadd.f32 %v901_v26, %v900_v15  ;;  %v929_v37 = vrot.slane %v928_v27, 1  ;;  %v796_v38 = vpop.f32.mrf.mxu2  ;;  %v809_v39 = vpop.f32.mrf.mxu3  ;;  %2648 = vmatpush.bf16.msrb.mxu1 %v5132_v46  ;;  %v4588_v15 = vor.u32 %v5755_v12, %v4587_v11  ;;  %2610 = vmatpush.bf16.msra.mxu2 %v4332_v10  ;;  %v5099_v26 = vld [vmem:[#allocation14 + $0x600] sm:$0xf]  ;;  %v5037_v12 = vld [vmem:[#allocation14 + $0x5a0] sm:$0xf0] }
 0x193   :  { %v894_v43 = vadd.f32 %v893_v31, %v892_v19  ;;  %v921_v20 = vrot.slane %v920_v32, 2  ;;  %v5807_v38 = vld [vmem:[#allocation14 + $0x3c4] sm:$0xf] }
 0x194   :  { %v930_v52 = vadd.f32 %v929_v37, %v928_v27  ;;  %v6522_v24 = vmul.f32 0.125, %v902_v36  ;;  %v5883_v27 = vld [vmem:[#allocation14 + $0x61c] sm:$0xf0]  ;;  %2623 = vmatpush.bf16.msra.mxu3 %v4588_v15 }
 0x195   :  { %v895_v56 = vrot.slane %v894_v43, 1  ;;  %v922_v57 = vadd.f32 %v921_v20, %v920_v32  ;;  %v872_v58 = vpop.f32.mrf.mxu0  ;;  %v885_v59 = vpop.f32.mrf.mxu1  ;;  %v5100_v31 = vor.u32 %v5883_v27, %v5099_v26  ;;  %v5743_v32 = vld [vmem:[#allocation14 + $0x1c4] sm:$0xf]  ;;  %2636 = vmatpush.bf16.msrb.mxu0 %v4844_v25 }
 0x196   :  { %v948_v63 = vmul.f32 0.125, %v930_v52  ;;  %v952_v0 = vmul.f32 %v6522_v24, %v6522_v24  ;;  %v6526_v1 = vadd.f32 %v885_v59, %v872_v58  ;;  %v4560_v37 = vor.u32 %v5743_v32, %v4557_v33  ;;  %v4813_v20 = vld [vmem:[#allocation14 + $0x3e0] sm:$0xf0] }
 0x197   :  { %v896_v5 = vadd.f32 %v895_v56, %v894_v43  ;;  %v923_v6 = vrot.slane %v922_v57, 1  ;;  %2649 = vmatpush.bf16.msrb.mxu1 %v5100_v31  ;;  %v5069_v52 = vld [vmem:[#allocation14 + $0x5e0] sm:$0xf0]  ;;  %v4816_v60 = vor.u32 %v5807_v38, %v4813_v20 }
 0x198   :  { %v956_v44 = vsub.f32 %v948_v63, %v952_v0  ;;  %v909_v9 = vrot.slane %v6526_v1, 4  ;;  %v918_v50 = vmul.f32 %v6526_v1, %v6526_v1  ;;  %2655 = vmatpush.bf16.msrb.mxu2 %v4560_v37  ;;  %v5072_v61 = vor.u32 %v5871_v47, %v5069_v52  ;;  %v4525_v63 = vld [vmem:[#allocation14 + $0x1a0] sm:$0xf0] }
 0x199   :  { %v924_v13 = vadd.f32 %v923_v6, %v922_v57  ;;  %v6531_v14 = vmul.f32 0.125, %v896_v5  ;;  %v5325_v57 = vld [vmem:[#allocation14 + $0x7e0] sm:$0xf0]  ;;  %2668 = vmatpush.bf16.msrb.mxu3 %v4816_v60 }
 0x19a   :  { %v960_v18 = vmax.f32 %v956_v44, 0.0  ;;  %v910_v19 = vadd.f32 %v909_v9, %v6526_v1  ;;  %v937_v21 = vrot.slane %v918_v50, 4  ;;  %v846_v22 = vpop.f32.mrf.mxu2  ;;  %v859_v23 = vpop.f32.mrf.mxu3  ;;  %v5328_v4 = vor.u32 %v5935_v53, %v5325_v57  ;;  %v5799_v5 = vld [vmem:[#allocation14 + $0x384] sm:$0xf]  ;;  %2681 = vmatpush.bf16.msra.mxu0 %v5072_v61 }
 0x19b   :  { %v947_v28 = vmul.f32 0.125, %v924_v13  ;;  %v951_v29 = vmul.f32 %v6531_v14, %v6531_v14  ;;  %v6536_v30 = vadd.f32 %v859_v23, %v846_v22  ;;  %v4528_v44 = vor.u32 %v5735_v62, %v4525_v63  ;;  %v4781_v9 = vld [vmem:[#allocation14 + $0x3a0] sm:$0xf0] }
 0x19c   :  { %v6538_v34 = vadd.f32 1e-05, %v960_v18  ;;  %v911_v35 = vrot.slane %v910_v19, 2  ;;  %v938_v36 = vadd.f32 %v937_v21, %v918_v50  ;;  %v5863_v50 = vld [vmem:[#allocation14 + $0x584] sm:$0xf]  ;;  %2694 = vmatpush.bf16.msra.mxu1 %v5328_v4  ;;  %v4784_v18 = vor.u32 %v5799_v5, %v4781_v9 }
 0x19d   :  { %v955_v39 = vsub.f32 %v947_v28, %v951_v29  ;;  %v903_v40 = vrot.slane %v6536_v30, 4  ;;  %v917_v41 = vmul.f32 %v6536_v30, %v6536_v30  ;;  %v874_v42 = vpop.f32.mrf.mxu0  ;;  %v887_v43 = vpop.f32.mrf.mxu1  ;;  %v5927_v13 = vld [vmem:[#allocation14 + $0x784] sm:$0xf]  ;;  %2656 = vmatpush.bf16.msrb.mxu2 %v4528_v44  ;;  %v5040_v28 = vor.u32 %v5863_v50, %v5037_v12 }
 0x19e   :  { %6032 = vrsqrt.f32 %v6538_v34  ;;  %v912_v48 = vadd.f32 %v911_v35, %v910_v19  ;;  %v939_v49 = vrot.slane %v938_v36, 2  ;;  %v5293_v19 = vld [vmem:[#allocation14 + $0x7a0] sm:$0xf0]  ;;  %2669 = vmatpush.bf16.msrb.mxu3 %v4784_v18  ;;  %vm983_vm11 = vweird.f32 %v6538_v34 }
 0x19f   :  { %v959_v54 = vmax.f32 %v955_v39, 0.0  ;;  %v904_v55 = vadd.f32 %v903_v40, %v6536_v30  ;;  %v931_v56 = vrot.slane %v917_v41, 4  ;;  %v5727_v23 = vld [vmem:[#allocation14 + $0x144] sm:$0xf]  ;;  %v5296_v29 = vor.u32 %v5927_v13, %v5293_v19  ;;  %2682 = vmatpush.bf16.msra.mxu0 %v5040_v28 }
 0x1a0   :  { %v913_v58 = vrot.slane %v912_v48, 1  ;;  %v940_v59 = vadd.f32 %v939_v49, %v938_v36  ;;  %v4493_v25 = vld [vmem:[#allocation14 + $0x160] sm:$0xf0] }
 0x1a1   :  { %v6545_v0 = vadd.f32 1e-05, %v959_v54  ;;  %v905_v2 = vrot.slane %v904_v55, 2  ;;  %v932_v3 = vadd.f32 %v931_v56, %v917_v41  ;;  %v5791_v31 = vld [vmem:[#allocation14 + $0x344] sm:$0xf]  ;;  %v4496_v37 = vor.u32 %v5727_v23, %v4493_v25  ;;  %2695 = vmatpush.bf16.msra.mxu1 %v5296_v29 }
 0x1a2   :  { %v914_v6 = vadd.f32 %v913_v58, %v912_v48  ;;  %v941_v46 = vrot.slane %v940_v59, 1  ;;  %v848_v7 = vpop.f32.mrf.mxu2  ;;  %v861_v8 = vpop.f32.mrf.mxu3  ;;  %v4749_v32 = vld [vmem:[#allocation14 + $0x360] sm:$0xf0] }
 0x1a3   :  { %6034 = vrsqrt.f32 %v6545_v0  ;;  %v906_v10 = vadd.f32 %v905_v2, %v904_v55  ;;  %v933_v11 = vrot.slane %v932_v3, 2  ;;  %v5855_v38 = vld [vmem:[#allocation14 + $0x544] sm:$0xf]  ;;  %v4752_v41 = vor.u32 %v5791_v31, %v4749_v32  ;;  %2657 = vmatpush.bf16.msrb.mxu2 %v4496_v37 }
 0x1a4   :  { %v6548_v15 = vpop.eup %6032  ;;  %v942_v16 = vadd.f32 %v941_v46, %v940_v59  ;;  %v6550_v17 = vmul.f32 0.125, %v914_v6  ;;  %v5005_v39 = vld [vmem:[#allocation14 + $0x560] sm:$0xf0]  ;;  %vm973_vm0 = vweird.f32 %v6545_v0 }
 0x1a5   :  { %v907_v21 = vrot.slane %v906_v10, 1  ;;  %v934_v22 = vadd.f32 %v933_v11, %v932_v3  ;;  %v978_v33 = vmul.f32 %v6548_v15, %v6538_v34  ;;  %v5008_v42 = vor.u32 %v5855_v38, %v5005_v39  ;;  %v5919_v43 = vld [vmem:[#allocation14 + $0x744] sm:$0xf]  ;;  %2670 = vmatpush.bf16.msrb.mxu3 %v4752_v41 }
 0x1a6   :  { %v950_v26 = vmul.f32 0.125, %v942_v16  ;;  %v954_v27 = vmul.f32 %v6550_v17, %v6550_v17  ;;  %v5261_v20 = vld [vmem:[#allocation14 + $0x760] sm:$0xf0]  ;;  %vm984_vm10 = vweird.f32 %v6548_v15 }
 0x1a7   :  { %v908_v35 = vadd.f32 %v907_v21, %v906_v10  ;;  %v935_v36 = vrot.slane %v934_v22, 1  ;;  %v5719_v52 = vld [vmem:[#allocation14 + $0x104] sm:$0xf]  ;;  %v5264_v56 = vor.u32 %v5919_v43, %v5261_v20  ;;  %v979_v62 = vmul.f32 %v6548_v15, %v978_v33  ;;  %2683 = vmatpush.bf16.msra.mxu0 %v5008_v42  ;;  %vm6586_vm14 = vmor %vm983_vm11, %vm984_vm10 }
 0x1a8   :  { %v958_v40 = vsub.f32 %v950_v26, %v954_v27  ;;  %v4461_v53 = vld [vmem:[#allocation14 + $0x120] sm:$0xf0] }
 0x1a9   :  { %v6556_v47 = vpop.eup %6034  ;;  %v936_v48 = vadd.f32 %v935_v36, %v934_v22  ;;  %v6558_v49 = vmul.f32 0.125, %v908_v35  ;;  %v5783_v57 = vld [vmem:[#allocation14 + $0x304] sm:$0xf]  ;;  %2696 = vmatpush.bf16.msra.mxu1 %v5264_v56  ;;  %v4464_v2 = vor.u32 %v5719_v52, %v4461_v53  ;;  %v980_v21 = vmul.f32 0.5, %v979_v62 }
 0x1aa   :  { %v968_v54 = vmul.f32 %v6556_v47, %v6545_v0  ;;  %v962_v55 = vmax.f32 %v958_v40, 0.0  ;;  %v4717_v58 = vld [vmem:[#allocation14 + $0x320] sm:$0xf0]  ;;  %vm974_vm13 = vweird.f32 %v6556_v47 }
 0x1ab   :  { %v949_v59 = vmul.f32 0.125, %v936_v48  ;;  %v953_v60 = vmul.f32 %v6558_v49, %v6558_v49  ;;  %v5847_v61 = vld [vmem:[#allocation14 + $0x504] sm:$0xf]  ;;  %v4720_v3 = vor.u32 %v5783_v57, %v4717_v58  ;;  %2658 = vmatpush.bf16.msrb.mxu2 %v4464_v2  ;;  %v981_v41 = vsub.f32 1.5, %v980_v21  ;;  %vm975_vm2 = vmor %vm973_vm0, %vm974_vm13 }
 0x1ac   :  { %v6565_v63 = vadd.f32 1e-05, %v962_v55  ;;  %v4973_v4 = vld [vmem:[#allocation14 + $0x520] sm:$0xf0]  ;;  %v969_v9 = vmul.f32 %v6556_v47, %v968_v54 }
 0x1ad   :  { %v5911_v5 = vld [vmem:[#allocation14 + $0x704] sm:$0xf]  ;;  %v957_v6 = vsub.f32 %v949_v59, %v953_v60  ;;  %v4976_v46 = vor.u32 %v5847_v61, %v4973_v4  ;;  %2671 = vmatpush.bf16.msrb.mxu3 %v4720_v3  ;;  %v889_v3 = vld [vmem:[#allocation11] sm:$0xf] }
 0x1ae   :  { %v5229_v7 = vld [vmem:[#allocation14 + $0x720] sm:$0xf0]  ;;  %6036 = vrsqrt.f32 %v6565_v63  ;;  %v970_v31 = vmul.f32 0.5, %v969_v9  ;;  %vm1003_vm15 = vweird.f32 %v6565_v63 }
 0x1af   :  { %v5711_v8 = vld [vmem:[#allocation14 + $0xc4] sm:$0xf]  ;;  %v5232_v50 = vor.u32 %v5911_v5, %v5229_v7  ;;  %v961_v12 = vmax.f32 %v957_v6, 0.0  ;;  %2684 = vmatpush.bf16.msra.mxu0 %v4976_v46 }
 0x1b0   :  { %v4429_v44 = vld [vmem:[#allocation14 + $0xe0] sm:$0xf0]  ;;  %v971_v60 = vsub.f32 1.5, %v970_v31  ;;  %v1011_v31 = vperm.slane %v889_v3, 3 }
 0x1b1   :  { %v5775_v10 = vld [vmem:[#allocation14 + $0x2c4] sm:$0xf]  ;;  %v4432_v13 = vor.u32 %v5711_v8, %v4429_v44  ;;  %2697 = vmatpush.bf16.msra.mxu1 %v5232_v50  ;;  %v6569_v26 = vadd.f32 1e-05, %v961_v12  ;;  %v982_v44 = vmul.f32 %v6548_v15, %v981_v41 }
 0x1b2   :  { %v4685_v11 = vld [vmem:[#allocation14 + $0x2e0] sm:$0xf0]  ;;  %v972_v21 = vmul.f32 %v6556_v47, %v971_v60 }
 0x1b3   :  { %v4688_v16 = vor.u32 %v5775_v10, %v4685_v11  ;;  %v5839_v18 = vld [vmem:[#allocation14 + $0x4c4] sm:$0xf]  ;;  %2659 = vmatpush.bf16.msrb.mxu2 %v4432_v13  ;;  %6038 = vrsqrt.f32 %v6569_v26  ;;  %vm993_vm4 = vweird.f32 %v6569_v26 }
 0x1b4   :  { %v4941_v19 = vld [vmem:[#allocation14 + $0x4e0] sm:$0xf0]  ;;  %v6572_v40 = vpop.eup %6036 }
 0x1b5   :  { %v4944_v22 = vor.u32 %v5839_v18, %v4941_v19  ;;  %v5903_v23 = vld [vmem:[#allocation14 + $0x6c4] sm:$0xf]  ;;  %2672 = vmatpush.bf16.msrb.mxu3 %v4688_v16  ;;  %v998_v48 = vmul.f32 %v6572_v40, %v6565_v63  ;;  %vm1004_vm12 = vweird.f32 %v6572_v40 }
 0x1b6   :  { %v5197_v25 = vld [vmem:[#allocation14 + $0x6e0] sm:$0xf0]  ;;  %vm1005_vm1 = vmor %vm1003_vm15, %vm1004_vm12 }
 0x1b7   :  { %v5200_v27 = vor.u32 %v5903_v23, %v5197_v25  ;;  %v5703_v28 = vld [vmem:[#allocation14 + $0x84] sm:$0xf]  ;;  %2685 = vmatpush.bf16.msra.mxu0 %v4944_v22  ;;  %v999_v61 = vmul.f32 %v6572_v40, %v998_v48 }
 0x1b8   :  { %v4397_v29 = vld [vmem:[#allocation14 + $0xa0] sm:$0xf0] }
 0x1b9   :  { %v4400_v32 = vor.u32 %v5703_v28, %v4397_v29  ;;  %v5767_v33 = vld [vmem:[#allocation14 + $0x284] sm:$0xf]  ;;  %2698 = vmatpush.bf16.msra.mxu1 %v5200_v27  ;;  %v6039_v8 = vpop.eup %6038  ;;  %v1000_v9 = vmul.f32 0.5, %v999_v61  ;;  %v1009_v29 = vperm.slane %v889_v3, 1  ;;  %v5740_v28 = vld [vmem:[#allocation14 + $0x1a4] sm:$0xf0] }
 0x1ba   :  { %v4653_v35 = vld [vmem:[#allocation14 + $0x2a0] sm:$0xf0]  ;;  %v988_v11 = vmul.f32 %v6039_v8, %v6569_v26  ;;  %vm994_vm3 = vweird.f32 %v6039_v8 }
 0x1bb   :  { %v4656_v36 = vor.u32 %v5767_v33, %v4653_v35  ;;  %v5831_v37 = vld [vmem:[#allocation14 + $0x484] sm:$0xf]  ;;  %2660 = vmatpush.bf16.msrb.mxu2 %v4400_v32  ;;  %v1001_v22 = vsub.f32 1.5, %v1000_v9  ;;  %v986_v32 = vsel %vm6586_vm14, %v6548_v15, %v982_v44  ;;  %v1008_v35 = vperm.slane %v889_v3, 0  ;;  %vm995_vm5 = vmor %vm993_vm4, %vm994_vm3  ;;  %v5748_v9 = vld [vmem:[#allocation14 + $0x1e4] sm:$0xf0] }
 0x1bc   :  { %v4909_v38 = vld [vmem:[#allocation14 + $0x4a0] sm:$0xf0]  ;;  %v989_v23 = vmul.f32 %v6039_v8, %v988_v11  ;;  %v5075_v11 = vld [vmem:[#allocation14 + $0x5c8] sm:$0xf] }
 0x1bd   :  { %v5895_v39 = vld [vmem:[#allocation14 + $0x684] sm:$0xf]  ;;  %v4912_v42 = vor.u32 %v5831_v37, %v4909_v38  ;;  %2673 = vmatpush.bf16.msrb.mxu3 %v4656_v36  ;;  %v1002_v34 = vmul.f32 %v6572_v40, %v1001_v22  ;;  %v976_v37 = vsel %vm975_vm2, %v6556_v47, %v972_v21  ;;  %v1017_v38 = vmul.f32 %v1009_v29, %v986_v32  ;;  %v5804_v32 = vld [vmem:[#allocation14 + $0x3a4] sm:$0xf0] }
 0x1be   :  { %v5165_v43 = vld [vmem:[#allocation14 + $0x6a0] sm:$0xf0]  ;;  %v990_v33 = vmul.f32 0.5, %v989_v23  ;;  %v1016_v41 = vmul.f32 %v1008_v35, %v976_v37  ;;  %v5868_v35 = vld [vmem:[#allocation14 + $0x5a4] sm:$0xf0] }
 0x1bf   :  { %v5695_v20 = vld [vmem:[#allocation14 + $0x44] sm:$0xf]  ;;  %v5168_v52 = vor.u32 %v5895_v39, %v5165_v43  ;;  %2686 = vmatpush.bf16.msra.mxu0 %v4912_v42  ;;  %v1006_v36 = vsel %vm1005_vm1, %v6572_v40, %v1002_v34  ;;  %v1010_v39 = vperm.slane %v889_v3, 2  ;;  %v1021_v43 = vmul.f32 %v1017_v38, %v6522_v24  ;;  %v5932_v37 = vld [vmem:[#allocation14 + $0x7a4] sm:$0xf0] }
 0x1c0   :  { %v4365_v53 = vld [vmem:[#allocation14 + $0x60] sm:$0xf0]  ;;  %v991_v63 = vsub.f32 1.5, %v990_v33  ;;  %v1019_v15 = vmul.f32 %v1011_v31, %v1006_v36  ;;  %v1020_v47 = vmul.f32 %v1016_v41, %v6531_v14  ;;  %v4787_v31 = vld [vmem:[#allocation14 + $0x388] sm:$0xf] }
 0x1c1   :  { %v5759_v54 = vld [vmem:[#allocation14 + $0x244] sm:$0xf]  ;;  %v4368_v56 = vor.u32 %v5695_v20, %v4365_v53  ;;  %2699 = vmatpush.bf16.msra.mxu1 %v5168_v52  ;;  %v1028_v52 = vrot.slane %v1021_v43, 7  ;;  %v5043_v33 = vld [vmem:[#allocation14 + $0x588] sm:$0xf] }
 0x1c2   :  { %v4621_v55 = vld [vmem:[#allocation14 + $0x260] sm:$0xf0]  ;;  %v992_v0 = vmul.f32 %v6039_v8, %v991_v63  ;;  %v1023_v20 = vmul.f32 %v1019_v15, %v6550_v17  ;;  %v1041_v26 = vperm.slane %v1019_v15, 0  ;;  %v5299_v36 = vld [vmem:[#allocation14 + $0x788] sm:$0xf] }
 0x1c3   :  { %v4624_v57 = vor.u32 %v5759_v54, %v4621_v55  ;;  %v5823_v58 = vld [vmem:[#allocation14 + $0x444] sm:$0xf]  ;;  %2661 = vmatpush.bf16.msrb.mxu2 %v4368_v56  ;;  %v1039_v55 = vperm.slane %v1017_v38, 0  ;;  %v1038_v56 = vperm.slane %v1016_v41, 0  ;;  %v4788_v38 = vor.u32 %v5804_v32, %v4787_v31  ;;  %v4499_v15 = vld [vmem:[#allocation14 + $0x148] sm:$0xf] }
 0x1c4   :  { %v4877_v59 = vld [vmem:[#allocation14 + $0x460] sm:$0xf0]  ;;  %v996_v42 = vsel %vm995_vm5, %v6039_v8, %v992_v0  ;;  %v1030_v53 = vrot.slane %v1023_v20, 5  ;;  %v1045_v61 = vmul.f32 %v1041_v26, %v6526_v1  ;;  %v5044_v0 = vor.u32 %v5868_v35, %v5043_v33  ;;  %v5796_v43 = vld [vmem:[#allocation14 + $0x364] sm:$0xf0] }
 0x1c5   :  { %v5887_v62 = vld [vmem:[#allocation14 + $0x644] sm:$0xf]  ;;  %v4880_v4 = vor.u32 %v5823_v58, %v4877_v59  ;;  %2674 = vmatpush.bf16.msrb.mxu3 %v4624_v57  ;;  %v1018_v40 = vmul.f32 %v1010_v39, %v996_v42  ;;  %v890_v57 = vld [vmem:[#allocation13] sm:$0xf]  ;;  %v1031_v59 = vsel %vm382_vm9, %v1020_v47, %v1028_v52  ;;  %v1043_v14 = vmul.f32 %v1039_v55, %v6510_v45  ;;  %v5876_v45 = vld [vmem:[#allocation14 + $0x5e4] sm:$0xf0] }
 0x1c6   :  { %v5133_v2 = vld [vmem:[#allocation14 + $0x660] sm:$0xf0]  ;;  %v5076_v29 = vor.u32 %v5876_v45, %v5075_v11  ;;  %v5732_v39 = vld [vmem:[#allocation14 + $0x164] sm:$0xf0]  ;;  %v5300_v41 = vor.u32 %v5932_v37, %v5299_v36 }
 0x1c7   :  { %v5136_v5 = vor.u32 %v5887_v62, %v5133_v2  ;;  %v5687_v6 = vld [vmem:[#allocation14 + $0x4] sm:$0xf]  ;;  %2687 = vmatpush.bf16.msra.mxu0 %v4880_v4  ;;  %v1022_v48 = vmul.f32 %v1018_v40, %v6558_v49  ;;  %v1040_v58 = vperm.slane %v1018_v40, 0  ;;  %v1042_v49 = vmul.f32 %v1038_v56, %v6516_v51  ;;  %v4755_v42 = vld [vmem:[#allocation14 + $0x348] sm:$0xf] }
 0x1c8   :  { %v4333_v46 = vld [vmem:[#allocation14 + $0x20] sm:$0xf0]  ;;  %v5011_v20 = vld [vmem:[#allocation14 + $0x548] sm:$0xf]  ;;  %v4500_v52 = vor.u32 %v5732_v39, %v4499_v15 }
 0x1c9   :  { %v5751_v7 = vld [vmem:[#allocation14 + $0x204] sm:$0xf]  ;;  %v4336_v12 = vor.u32 %v5687_v6, %v4333_v46  ;;  %2700 = vmatpush.bf16.msra.mxu1 %v5136_v5  ;;  %v1029_v54 = vrot.slane %v1022_v48, 6  ;;  %v1044_v62 = vmul.f32 %v1040_v58, %v6536_v30  ;;  %v4563_v6 = vld [vmem:[#allocation14 + $0x1c8] sm:$0xf] }
 0x1ca   :  { %v4589_v50 = vld [vmem:[#allocation14 + $0x220] sm:$0xf0]  ;;  %v5940_v30 = vld [vmem:[#allocation14 + $0x7e4] sm:$0xf0] }
 0x1cb   :  { %v5815_v10 = vld [vmem:[#allocation14 + $0x404] sm:$0xf]  ;;  %v4592_v13 = vor.u32 %v5751_v7, %v4589_v50  ;;  %2662 = vmatpush.bf16.msrb.mxu2 %v4336_v12  ;;  %v1033_v24 = vsel %vm1032_vm6, %v1029_v54, %v1030_v53  ;;  %v4819_v50 = vld [vmem:[#allocation14 + $0x3c8] sm:$0xf]  ;;  %v4756_v53 = vor.u32 %v5796_v43, %v4755_v42 }
 0x1cc   :  { %v4845_v16 = vld [vmem:[#allocation14 + $0x420] sm:$0xf0]  ;;  %v1035_v17 = vsel %vm1034_vm7, %v1031_v59, %v1033_v24  ;;  %v5331_v12 = vld [vmem:[#allocation14 + $0x7c8] sm:$0xf] }
 0x1cd   :  { %v5879_v18 = vld [vmem:[#allocation14 + $0x604] sm:$0xf]  ;;  %v4848_v25 = vor.u32 %v5815_v10, %v4845_v16  ;;  %2675 = vmatpush.bf16.msrb.mxu3 %v4592_v13  ;;  %v1037_v60 = vsub.f32 %v890_v57, %v1035_v17  ;;  %v5812_v10 = vld [vmem:[#allocation14 + $0x3e4] sm:$0xf0]  ;;  %v5332_v34 = vor.u32 %v5940_v30, %v5331_v12 }
 0x1ce   :  { %v5101_v19 = vld [vmem:[#allocation14 + $0x620] sm:$0xf0]  ;;  %v5860_v40 = vld [vmem:[#allocation14 + $0x564] sm:$0xf0] }
 0x1cf   :  { %v5104_v27 = vor.u32 %v5879_v18, %v5101_v19  ;;  %2688 = vmatpush.bf16.msra.mxu0 %v4848_v25  ;;  %v1047_v2 = vperm.slane %v1037_v60, 0  ;;  %v1048_v3 = vperm.slane %v1037_v60, 1  ;;  %v1049_v4 = vperm.slane %v1037_v60, 2  ;;  %v5267_v47 = vld [vmem:[#allocation14 + $0x748] sm:$0xf] }
 0x1d0   :  { %v1050_v5 = vperm.slane %v1037_v60, 3  ;;  %v4564_v18 = vor.u32 %v5748_v9, %v4563_v6  ;;  %v4820_v19 = vor.u32 %v5812_v10, %v4819_v50  ;;  %v5924_v48 = vld [vmem:[#allocation14 + $0x764] sm:$0xf0]  ;;  %v5012_v56 = vor.u32 %v5860_v40, %v5011_v20 }
 0x1d1   :  { %2701 = vmatpush.bf16.msra.mxu1 %v5104_v27  ;;  %v1055_v46 = vadd.f32 %v1047_v2, %v1042_v49  ;;  %v1056_v7 = vadd.f32 %v1048_v3, %v1043_v14  ;;  %v1057_v8 = vadd.f32 %v1049_v4, %v1044_v62  ;;  %v4531_v27 = vld [vmem:[#allocation14 + $0x188] sm:$0xf]  ;;  %v5268_v26 = vor.u32 %v5924_v48, %v5267_v47 }
 0x1d2   :  { %v1058_v44 = vadd.f32 %v1050_v5, %v1045_v61  ;;  %v4532_v63 = vor.u32 %v5740_v28, %v4531_v27  ;;  %v4467_v54 = vld [vmem:[#allocation14 + $0x108] sm:$0xf] }
 0x1d3   :  { %v1059_v51 = vmax.f32 %v1055_v46, 0.0  ;;  %v1060_v13 = vmax.f32 %v1056_v7, 0.0  ;;  %v1061_v1 = vmax.f32 %v1057_v8, 0.0  ;;  %v5724_v55 = vld [vmem:[#allocation14 + $0x124] sm:$0xf0] }
 0x1d4   :  { %v1062_v16 = vmax.f32 %v1058_v44, 0.0  ;;  %v4723_v57 = vld [vmem:[#allocation14 + $0x308] sm:$0xf]  ;;  %v4468_v14 = vor.u32 %v5724_v55, %v4467_v54  ;;  %v5808_v54 = vld [vmem:[#allocation14 + $0x3cc] sm:$0xf] }
 0x1d5   :  { %v6612_v21 = vpack.c.bf16 %v1061_v1, %v1061_v1  ;;  %v6614_v22 = vpack.c.bf16 %v1059_v51, %v1059_v51  ;;  %v6616_v23 = vpack.c.bf16 %v1060_v13, %v1060_v13  ;;  %v5788_v58 = vld [vmem:[#allocation14 + $0x324] sm:$0xf0]  ;;  %v4821_v55 = vld [vmem:[#allocation14 + $0x3e8] sm:$0xf0] }
 0x1d6   :  { %v6618_v25 = vpack.c.bf16 %v1062_v16, %v1062_v16  ;;  %v4979_v59 = vld [vmem:[#allocation14 + $0x508] sm:$0xf]  ;;  %v4724_v49 = vor.u32 %v5788_v58, %v4723_v57  ;;  %v5077_v58 = vld [vmem:[#allocation14 + $0x5e8] sm:$0xf0] }
 0x1d7   :  { %2611 = vmatmul.bf16.vlgmr.msra.gmra.mxu2 %v6614_v22  ;;  %2624 = vmatmul.bf16.vlgmr.msra.gmra.mxu3 %v6616_v23  ;;  %v5852_v24 = vld [vmem:[#allocation14 + $0x524] sm:$0xf0] }
 0x1d8   :  { %2637 = vmatmul.bf16.vlgmr.msrb.gmra.mxu0 %v6612_v21  ;;  %2650 = vmatmul.bf16.vlgmr.msrb.gmra.mxu1 %v6618_v25  ;;  %v5235_v17 = vld [vmem:[#allocation14 + $0x708] sm:$0xf]  ;;  %v4980_v2 = vor.u32 %v5852_v24, %v4979_v59  ;;  %v5936_v59 = vld [vmem:[#allocation14 + $0x7cc] sm:$0xf] }
 0x1d9   :  { %2707 = vmatpush.bf16.msra.mxu2 %v4564_v18  ;;  %2720 = vmatpush.bf16.msra.mxu3 %v4820_v19  ;;  %v5916_v60 = vld [vmem:[#allocation14 + $0x724] sm:$0xf0]  ;;  %v5333_v24 = vld [vmem:[#allocation14 + $0x7e8] sm:$0xf0] }
 0x1da   :  { %2733 = vmatpush.bf16.msrb.mxu0 %v5076_v29  ;;  %2746 = vmatpush.bf16.msrb.mxu1 %v5332_v34  ;;  %v4435_v61 = vld [vmem:[#allocation14 + $0xc8] sm:$0xf]  ;;  %v5236_v3 = vor.u32 %v5916_v60, %v5235_v17 }
 0x1db   :  { %v5716_v62 = vld [vmem:[#allocation14 + $0xe4] sm:$0xf0] }
 0x1dc   :  { %v4691_v4 = vld [vmem:[#allocation14 + $0x2c8] sm:$0xf]  ;;  %v4436_v44 = vor.u32 %v5716_v62, %v4435_v61  ;;  %v5736_v61 = vld [vmem:[#allocation14 + $0x18c] sm:$0xf] }
 0x1dd   :  { %2708 = vmatpush.bf16.msra.mxu2 %v4532_v63  ;;  %2721 = vmatpush.bf16.msra.mxu3 %v4788_v38  ;;  %v5780_v5 = vld [vmem:[#allocation14 + $0x2e4] sm:$0xf0]  ;;  %v4533_v62 = vld [vmem:[#allocation14 + $0x1a8] sm:$0xf0] }
 0x1de   :  { %2734 = vmatpush.bf16.msrb.mxu0 %v5044_v0  ;;  %2747 = vmatpush.bf16.msrb.mxu1 %v5300_v41  ;;  %v4947_v6 = vld [vmem:[#allocation14 + $0x4c8] sm:$0xf]  ;;  %v4692_v9 = vor.u32 %v5780_v5, %v4691_v4  ;;  %v5800_v4 = vld [vmem:[#allocation14 + $0x38c] sm:$0xf] }
 0x1df   :  { %v5844_v46 = vld [vmem:[#allocation14 + $0x4e4] sm:$0xf0]  ;;  %v4789_v5 = vld [vmem:[#allocation14 + $0x3a8] sm:$0xf0] }
 0x1e0   :  { %v5203_v7 = vld [vmem:[#allocation14 + $0x6c8] sm:$0xf]  ;;  %v4948_v11 = vor.u32 %v5844_v46, %v4947_v6  ;;  %v5864_v6 = vld [vmem:[#allocation14 + $0x58c] sm:$0xf] }
 0x1e1   :  { %2709 = vmatpush.bf16.msra.mxu2 %v4500_v52  ;;  %2722 = vmatpush.bf16.msra.mxu3 %v4756_v53  ;;  %v5908_v8 = vld [vmem:[#allocation14 + $0x6e4] sm:$0xf0]  ;;  %v5744_v52 = vld [vmem:[#allocation14 + $0x1cc] sm:$0xf] }
 0x1e2   :  { %2735 = vmatpush.bf16.msrb.mxu0 %v5012_v56  ;;  %2748 = vmatpush.bf16.msrb.mxu1 %v5268_v26  ;;  %v4403_v50 = vld [vmem:[#allocation14 + $0x88] sm:$0xf]  ;;  %v5204_v45 = vor.u32 %v5908_v8, %v5203_v7  ;;  %v4565_v53 = vld [vmem:[#allocation14 + $0x1e8] sm:$0xf0] }
 0x1e3   :  { %v5708_v10 = vld [vmem:[#allocation14 + $0xa4] sm:$0xf0]  ;;  %v5872_v56 = vld [vmem:[#allocation14 + $0x5cc] sm:$0xf] }
 0x1e4   :  { %v4659_v12 = vld [vmem:[#allocation14 + $0x288] sm:$0xf]  ;;  %v4404_v18 = vor.u32 %v5708_v10, %v4403_v50  ;;  %v5045_v46 = vld [vmem:[#allocation14 + $0x5a8] sm:$0xf0] }
 0x1e5   :  { %2710 = vmatpush.bf16.msra.mxu2 %v4468_v14  ;;  %2723 = vmatpush.bf16.msra.mxu3 %v4724_v49  ;;  %v5772_v51 = vld [vmem:[#allocation14 + $0x2a4] sm:$0xf0]  ;;  %v4568_v14 = vor.u32 %v5744_v52, %v4565_v53  ;;  %v4824_v49 = vor.u32 %v5808_v54, %v4821_v55  ;;  %v5928_v7 = vld [vmem:[#allocation14 + $0x78c] sm:$0xf] }
 0x1e6   :  { %2736 = vmatpush.bf16.msrb.mxu0 %v4980_v2  ;;  %2749 = vmatpush.bf16.msrb.mxu1 %v5236_v3  ;;  %v4915_v13 = vld [vmem:[#allocation14 + $0x488] sm:$0xf]  ;;  %v4660_v19 = vor.u32 %v5772_v51, %v4659_v12  ;;  %v5080_v2 = vor.u32 %v5872_v56, %v5077_v58  ;;  %v5336_v3 = vor.u32 %v5936_v59, %v5333_v24  ;;  %v5301_v8 = vld [vmem:[#allocation14 + $0x7a8] sm:$0xf0] }
 0x1e7   :  { %2663 = vmatmul.bf16.vlgmr.msrb.gmra.mxu2 %v6614_v22  ;;  %2676 = vmatmul.bf16.vlgmr.msrb.gmra.mxu3 %v6616_v23  ;;  %v5836_v1 = vld [vmem:[#allocation14 + $0x4a4] sm:$0xf0]  ;;  %v5728_v50 = vld [vmem:[#allocation14 + $0x14c] sm:$0xf] }
 0x1e8   :  { %v5171_v16 = vld [vmem:[#allocation14 + $0x688] sm:$0xf]  ;;  %2689 = vmatmul.bf16.vlgmr.msra.gmra.mxu0 %v6612_v21  ;;  %2702 = vmatmul.bf16.vlgmr.msra.gmra.mxu1 %v6618_v25  ;;  %v4916_v29 = vor.u32 %v5836_v1, %v4915_v13  ;;  %v4501_v10 = vld [vmem:[#allocation14 + $0x168] sm:$0xf0] }
 0x1e9   :  { %v5900_v30 = vld [vmem:[#allocation14 + $0x6a4] sm:$0xf0]  ;;  %2711 = vmatpush.bf16.msra.mxu2 %v4436_v44  ;;  %2724 = vmatpush.bf16.msra.mxu3 %v4692_v9  ;;  %v4536_v44 = vor.u32 %v5736_v61, %v4533_v62  ;;  %v4792_v9 = vor.u32 %v5800_v4, %v4789_v5  ;;  %v5792_v12 = vld [vmem:[#allocation14 + $0x34c] sm:$0xf] }
 0x1ea   :  { %v4371_v27 = vld [vmem:[#allocation14 + $0x48] sm:$0xf]  ;;  %2737 = vmatpush.bf16.msrb.mxu0 %v4948_v11  ;;  %2750 = vmatpush.bf16.msrb.mxu1 %v5204_v45  ;;  %v5172_v34 = vor.u32 %v5900_v30, %v5171_v16  ;;  %v5048_v11 = vor.u32 %v5864_v6, %v5045_v46  ;;  %v5304_v45 = vor.u32 %v5928_v7, %v5301_v8  ;;  %v4757_v51 = vld [vmem:[#allocation14 + $0x368] sm:$0xf0] }
 0x1eb   :  { %v5700_v28 = vld [vmem:[#allocation14 + $0x64] sm:$0xf0]  ;;  %v5856_v13 = vld [vmem:[#allocation14 + $0x54c] sm:$0xf] }
 0x1ec   :  { %v4627_v31 = vld [vmem:[#allocation14 + $0x248] sm:$0xf]  ;;  %v4372_v38 = vor.u32 %v5700_v28, %v4371_v27  ;;  %v5013_v1 = vld [vmem:[#allocation14 + $0x568] sm:$0xf0] }
 0x1ed   :  { %v5764_v32 = vld [vmem:[#allocation14 + $0x264] sm:$0xf0]  ;;  %2712 = vmatpush.bf16.msra.mxu2 %v4404_v18  ;;  %2725 = vmatpush.bf16.msra.mxu3 %v4660_v19  ;;  %v5920_v16 = vld [vmem:[#allocation14 + $0x74c] sm:$0xf]  ;;  %v4504_v18 = vor.u32 %v5728_v50, %v4501_v10  ;;  %v4760_v19 = vor.u32 %v5792_v12, %v4757_v51 }
 0x1ee   :  { %v4883_v33 = vld [vmem:[#allocation14 + $0x448] sm:$0xf]  ;;  %v4628_v15 = vor.u32 %v5764_v32, %v4627_v31  ;;  %2738 = vmatpush.bf16.msrb.mxu0 %v4916_v29  ;;  %2751 = vmatpush.bf16.msrb.mxu1 %v5172_v34  ;;  %v5269_v30 = vld [vmem:[#allocation14 + $0x768] sm:$0xf0]  ;;  %v5016_v29 = vor.u32 %v5856_v13, %v5013_v1 }
 0x1ef   :  { %v5828_v35 = vld [vmem:[#allocation14 + $0x464] sm:$0xf0]  ;;  %v5720_v27 = vld [vmem:[#allocation14 + $0x10c] sm:$0xf]  ;;  %v5272_v34 = vor.u32 %v5920_v16, %v5269_v30 }
 0x1f0   :  { %v5139_v36 = vld [vmem:[#allocation14 + $0x648] sm:$0xf]  ;;  %v4884_v42 = vor.u32 %v5828_v35, %v4883_v33  ;;  %v4469_v28 = vld [vmem:[#allocation14 + $0x128] sm:$0xf0] }
 0x1f1   :  { %v5892_v37 = vld [vmem:[#allocation14 + $0x664] sm:$0xf0]  ;;  %2713 = vmatpush.bf16.msra.mxu2 %v4372_v38  ;;  %2726 = vmatpush.bf16.msra.mxu3 %v4628_v15  ;;  %v5784_v31 = vld [vmem:[#allocation14 + $0x30c] sm:$0xf] }
 0x1f2   :  { %v4339_v63 = vld [vmem:[#allocation14 + $0x8] sm:$0xf]  ;;  %v5140_v43 = vor.u32 %v5892_v37, %v5139_v36  ;;  %2739 = vmatpush.bf16.msrb.mxu0 %v4884_v42  ;;  %v4725_v32 = vld [vmem:[#allocation14 + $0x328] sm:$0xf0] }
 0x1f3   :  { %v5692_v39 = vld [vmem:[#allocation14 + $0x24] sm:$0xf0]  ;;  %v5848_v33 = vld [vmem:[#allocation14 + $0x50c] sm:$0xf]  ;;  %v4728_v38 = vor.u32 %v5784_v31, %v4725_v32  ;;  %v5877_v32 = vld [vmem:[#allocation14 + $0x5ec] sm:$0xf0] }
 0x1f4   :  { %v4595_v0 = vld [vmem:[#allocation14 + $0x208] sm:$0xf]  ;;  %v4340_v26 = vor.u32 %v5692_v39, %v4339_v63  ;;  %2752 = vmatpush.bf16.msrb.mxu1 %v5140_v43  ;;  %v4981_v35 = vld [vmem:[#allocation14 + $0x528] sm:$0xf0]  ;;  %v4472_v63 = vor.u32 %v5720_v27, %v4469_v28  ;;  %v4827_v27 = vld [vmem:[#allocation14 + $0x3d0] sm:$0xf] }
 0x1f5   :  { %v5756_v41 = vld [vmem:[#allocation14 + $0x224] sm:$0xf0]  ;;  %v5912_v36 = vld [vmem:[#allocation14 + $0x70c] sm:$0xf]  ;;  %v5813_v28 = vld [vmem:[#allocation14 + $0x3ec] sm:$0xf0] }
 0x1f6   :  { %v4851_v20 = vld [vmem:[#allocation14 + $0x408] sm:$0xf]  ;;  %v4596_v57 = vor.u32 %v5756_v41, %v4595_v0  ;;  %2714 = vmatpush.bf16.msra.mxu2 %v4340_v26  ;;  %v5237_v37 = vld [vmem:[#allocation14 + $0x728] sm:$0xf0]  ;;  %v4984_v0 = vor.u32 %v5848_v33, %v4981_v35  ;;  %v5339_v33 = vld [vmem:[#allocation14 + $0x7d0] sm:$0xf] }
 0x1f7   :  { %v5820_v40 = vld [vmem:[#allocation14 + $0x424] sm:$0xf0]  ;;  %v5712_v15 = vld [vmem:[#allocation14 + $0xcc] sm:$0xf]  ;;  %v5240_v41 = vor.u32 %v5912_v36, %v5237_v37  ;;  %v5941_v35 = vld [vmem:[#allocation14 + $0x7ec] sm:$0xf0] }
 0x1f8   :  { %v5107_v47 = vld [vmem:[#allocation14 + $0x608] sm:$0xf]  ;;  %v4852_v17 = vor.u32 %v5820_v40, %v4851_v20  ;;  %2727 = vmatpush.bf16.msra.mxu3 %v4596_v57  ;;  %v4437_v39 = vld [vmem:[#allocation14 + $0xe8] sm:$0xf0] }
 0x1f9   :  { %v5884_v48 = vld [vmem:[#allocation14 + $0x624] sm:$0xf0]  ;;  %2715 = vmatmul.bf16.vlgmr.msra.gmra.mxu2 %v6614_v22  ;;  %v5776_v42 = vld [vmem:[#allocation14 + $0x2cc] sm:$0xf]  ;;  %v4440_v52 = vor.u32 %v5712_v15, %v4437_v39  ;;  %v4539_v15 = vld [vmem:[#allocation14 + $0x190] sm:$0xf] }
 0x1fa   :  { %v5108_v60 = vor.u32 %v5884_v48, %v5107_v47  ;;  %2740 = vmatpush.bf16.msrb.mxu0 %v4852_v17  ;;  %2759 = vmatpush.bf16.msrb.mxu2 %v4568_v14  ;;  %v4693_v43 = vld [vmem:[#allocation14 + $0x2e8] sm:$0xf0]  ;;  %v5741_v39 = vld [vmem:[#allocation14 + $0x1ac] sm:$0xf0] }
 0x1fb   :  { %2728 = vmatmul.bf16.vlgmr.msra.gmra.mxu3 %v6616_v23  ;;  %v5840_v20 = vld [vmem:[#allocation14 + $0x4cc] sm:$0xf]  ;;  %v4696_v53 = vor.u32 %v5776_v42, %v4693_v43  ;;  %v4795_v42 = vld [vmem:[#allocation14 + $0x390] sm:$0xf] }
 0x1fc   :  { %2753 = vmatpush.bf16.msrb.mxu1 %v5108_v60  ;;  %2772 = vmatpush.bf16.msrb.mxu3 %v4824_v49  ;;  %v4949_v40 = vld [vmem:[#allocation14 + $0x4e8] sm:$0xf0]  ;;  %v5805_v43 = vld [vmem:[#allocation14 + $0x3ac] sm:$0xf0] }
 0x1fd   :  { %2741 = vmatmul.bf16.vlgmr.msrb.gmra.mxu0 %v6612_v21  ;;  %v5904_v47 = vld [vmem:[#allocation14 + $0x6cc] sm:$0xf]  ;;  %v4952_v56 = vor.u32 %v5840_v20, %v4949_v40  ;;  %v5051_v20 = vld [vmem:[#allocation14 + $0x590] sm:$0xf] }
 0x1fe   :  { %2785 = vmatpush.bf16.msra.mxu0 %v5080_v2  ;;  %2760 = vmatpush.bf16.msrb.mxu2 %v4536_v44  ;;  %v5205_v48 = vld [vmem:[#allocation14 + $0x6e8] sm:$0xf0]  ;;  %v5869_v40 = vld [vmem:[#allocation14 + $0x5ac] sm:$0xf0] }
 0x1ff   :  { %2754 = vmatmul.bf16.vlgmr.msrb.gmra.mxu1 %v6618_v25  ;;  %v5704_v54 = vld [vmem:[#allocation14 + $0x8c] sm:$0xf]  ;;  %v5208_v26 = vor.u32 %v5904_v47, %v5205_v48  ;;  %v5307_v47 = vld [vmem:[#allocation14 + $0x790] sm:$0xf] }
 0x200   :  { %2798 = vmatpush.bf16.msra.mxu1 %v5336_v3  ;;  %2773 = vmatpush.bf16.msrb.mxu3 %v4792_v9  ;;  %v4405_v55 = vld [vmem:[#allocation14 + $0xa8] sm:$0xf0]  ;;  %v5933_v48 = vld [vmem:[#allocation14 + $0x7ac] sm:$0xf0] }
 0x201   :  { %v5768_v57 = vld [vmem:[#allocation14 + $0x28c] sm:$0xf]  ;;  %v4408_v14 = vor.u32 %v5704_v54, %v4405_v55  ;;  %v4507_v54 = vld [vmem:[#allocation14 + $0x150] sm:$0xf] }
 0x202   :  { %2786 = vmatpush.bf16.msra.mxu0 %v5048_v11  ;;  %2761 = vmatpush.bf16.msrb.mxu2 %v4504_v18  ;;  %v4661_v58 = vld [vmem:[#allocation14 + $0x2a8] sm:$0xf0]  ;;  %v4571_v18 = vld [vmem:[#allocation14 + $0x1d0] sm:$0xf] }
 0x203   :  { %v5832_v59 = vld [vmem:[#allocation14 + $0x48c] sm:$0xf]  ;;  %v4664_v49 = vor.u32 %v5768_v57, %v4661_v58  ;;  %v5733_v55 = vld [vmem:[#allocation14 + $0x16c] sm:$0xf0] }
 0x204   :  { %2799 = vmatpush.bf16.msra.mxu1 %v5304_v45  ;;  %2774 = vmatpush.bf16.msrb.mxu3 %v4760_v19  ;;  %v4917_v24 = vld [vmem:[#allocation14 + $0x4a8] sm:$0xf0]  ;;  %v5749_v19 = vld [vmem:[#allocation14 + $0x1ec] sm:$0xf0] }
 0x205   :  { %v5896_v17 = vld [vmem:[#allocation14 + $0x68c] sm:$0xf]  ;;  %v4920_v2 = vor.u32 %v5832_v59, %v4917_v24  ;;  %v4763_v57 = vld [vmem:[#allocation14 + $0x350] sm:$0xf] }
 0x206   :  { %2787 = vmatpush.bf16.msra.mxu0 %v5016_v29  ;;  %2762 = vmatpush.bf16.msrb.mxu2 %v4472_v63  ;;  %v5173_v60 = vld [vmem:[#allocation14 + $0x6a8] sm:$0xf0]  ;;  %v5083_v29 = vld [vmem:[#allocation14 + $0x5d0] sm:$0xf]  ;;  %v4572_v63 = vor.u32 %v5749_v19, %v4571_v18 }
 0x207   :  { %v5696_v61 = vld [vmem:[#allocation14 + $0x4c] sm:$0xf]  ;;  %v5176_v3 = vor.u32 %v5896_v17, %v5173_v60  ;;  %v5797_v58 = vld [vmem:[#allocation14 + $0x36c] sm:$0xf0] }
 0x208   :  { %2800 = vmatpush.bf16.msra.mxu1 %v5272_v34  ;;  %2775 = vmatpush.bf16.msrb.mxu3 %v4728_v38  ;;  %v4373_v62 = vld [vmem:[#allocation14 + $0x68] sm:$0xf0]  ;;  %v4828_v38 = vor.u32 %v5813_v28, %v4827_v27  ;;  %v5019_v59 = vld [vmem:[#allocation14 + $0x550] sm:$0xf] }
 0x209   :  { %v5760_v4 = vld [vmem:[#allocation14 + $0x24c] sm:$0xf]  ;;  %v4376_v9 = vor.u32 %v5696_v61, %v4373_v62  ;;  %v5861_v24 = vld [vmem:[#allocation14 + $0x56c] sm:$0xf0] }
 0x20a   :  { %2788 = vmatpush.bf16.msra.mxu0 %v4984_v0  ;;  %2763 = vmatpush.bf16.msrb.mxu2 %v4440_v52  ;;  %v4629_v5 = vld [vmem:[#allocation14 + $0x268] sm:$0xf0]  ;;  %v5084_v0 = vor.u32 %v5877_v32, %v5083_v29  ;;  %v4540_v52 = vor.u32 %v5741_v39, %v4539_v15  ;;  %v5275_v17 = vld [vmem:[#allocation14 + $0x750] sm:$0xf] }
 0x20b   :  { %v5824_v6 = vld [vmem:[#allocation14 + $0x44c] sm:$0xf]  ;;  %v4632_v50 = vor.u32 %v5760_v4, %v4629_v5  ;;  %v5925_v60 = vld [vmem:[#allocation14 + $0x76c] sm:$0xf0] }
 0x20c   :  { %2801 = vmatpush.bf16.msra.mxu1 %v5240_v41  ;;  %2776 = vmatpush.bf16.msrb.mxu3 %v4696_v53  ;;  %v4885_v46 = vld [vmem:[#allocation14 + $0x468] sm:$0xf0]  ;;  %v5340_v41 = vor.u32 %v5941_v35, %v5339_v33  ;;  %v4796_v53 = vor.u32 %v5805_v43, %v4795_v42  ;;  %v4475_v61 = vld [vmem:[#allocation14 + $0x110] sm:$0xf] }
 0x20d   :  { %v5888_v7 = vld [vmem:[#allocation14 + $0x64c] sm:$0xf]  ;;  %v4888_v12 = vor.u32 %v5824_v6, %v4885_v46  ;;  %v5725_v62 = vld [vmem:[#allocation14 + $0x12c] sm:$0xf0] }
 0x20e   :  { %2789 = vmatpush.bf16.msra.mxu0 %v4952_v56  ;;  %v5141_v8 = vld [vmem:[#allocation14 + $0x668] sm:$0xf0]  ;;  %2764 = vmatpush.bf16.msrb.mxu2 %v4408_v14  ;;  %v5052_v56 = vor.u32 %v5869_v40, %v5051_v20  ;;  %v4508_v14 = vor.u32 %v5733_v55, %v4507_v54  ;;  %v4731_v4 = vld [vmem:[#allocation14 + $0x310] sm:$0xf] }
 0x20f   :  { %v5688_v44 = vld [vmem:[#allocation14 + $0xc] sm:$0xf]  ;;  %v5144_v51 = vor.u32 %v5888_v7, %v5141_v8  ;;  %v5789_v5 = vld [vmem:[#allocation14 + $0x32c] sm:$0xf0] }
 0x210   :  { %2802 = vmatpush.bf16.msra.mxu1 %v5208_v26  ;;  %2777 = vmatpush.bf16.msrb.mxu3 %v4664_v49  ;;  %v4341_v10 = vld [vmem:[#allocation14 + $0x28] sm:$0xf0]  ;;  %v5308_v26 = vor.u32 %v5933_v48, %v5307_v47  ;;  %v4764_v49 = vor.u32 %v5797_v58, %v4763_v57  ;;  %v4987_v6 = vld [vmem:[#allocation14 + $0x510] sm:$0xf] }
 0x211   :  { %v5752_v11 = vld [vmem:[#allocation14 + $0x20c] sm:$0xf]  ;;  %v4344_v34 = vor.u32 %v5688_v44, %v4341_v10  ;;  %v5853_v46 = vld [vmem:[#allocation14 + $0x52c] sm:$0xf0]  ;;  %v4476_v44 = vor.u32 %v5725_v62, %v4475_v61  ;;  %v5809_v61 = vld [vmem:[#allocation14 + $0x3d4] sm:$0xf] }
 0x212   :  { %v4597_v45 = vld [vmem:[#allocation14 + $0x228] sm:$0xf0]  ;;  %2790 = vmatpush.bf16.msra.mxu0 %v4920_v2  ;;  %2765 = vmatpush.bf16.msrb.mxu2 %v4376_v9  ;;  %v5020_v2 = vor.u32 %v5861_v24, %v5019_v59  ;;  %v5243_v7 = vld [vmem:[#allocation14 + $0x710] sm:$0xf]  ;;  %v4732_v9 = vor.u32 %v5789_v5, %v4731_v4  ;;  %v4829_v62 = vld [vmem:[#allocation14 + $0x3f0] sm:$0xf0] }
 0x213   :  { %v5816_v13 = vld [vmem:[#allocation14 + $0x40c] sm:$0xf]  ;;  %v4600_v31 = vor.u32 %v5752_v11, %v4597_v45  ;;  %v5917_v8 = vld [vmem:[#allocation14 + $0x72c] sm:$0xf0]  ;;  %v4988_v11 = vor.u32 %v5853_v46, %v4987_v6  ;;  %v5085_v5 = vld [vmem:[#allocation14 + $0x5f0] sm:$0xf0] }
 0x214   :  { %2803 = vmatpush.bf16.msra.mxu1 %v5176_v3  ;;  %v4853_v1 = vld [vmem:[#allocation14 + $0x428] sm:$0xf0]  ;;  %2778 = vmatpush.bf16.msrb.mxu3 %v4632_v50  ;;  %v5276_v3 = vor.u32 %v5925_v60, %v5275_v17  ;;  %v4443_v50 = vld [vmem:[#allocation14 + $0xd0] sm:$0xf]  ;;  %v5244_v45 = vor.u32 %v5917_v8, %v5243_v7  ;;  %v5937_v6 = vld [vmem:[#allocation14 + $0x7d4] sm:$0xf] }
 0x215   :  { %v5880_v16 = vld [vmem:[#allocation14 + $0x60c] sm:$0xf]  ;;  %v4856_v36 = vor.u32 %v5816_v13, %v4853_v1  ;;  %v5717_v10 = vld [vmem:[#allocation14 + $0xec] sm:$0xf0]  ;;  %v5341_v46 = vld [vmem:[#allocation14 + $0x7f0] sm:$0xf0] }
 0x216   :  { %v5109_v30 = vld [vmem:[#allocation14 + $0x628] sm:$0xf0]  ;;  %2791 = vmatpush.bf16.msra.mxu0 %v4888_v12  ;;  %2766 = vmatpush.bf16.msrb.mxu2 %v4344_v34  ;;  %v4699_v12 = vld [vmem:[#allocation14 + $0x2d0] sm:$0xf]  ;;  %v4444_v18 = vor.u32 %v5717_v10, %v4443_v50  ;;  %v5737_v50 = vld [vmem:[#allocation14 + $0x194] sm:$0xf] }
 0x217   :  { %v5112_v37 = vor.u32 %v5880_v16, %v5109_v30  ;;  %v4955_v13 = vld [vmem:[#allocation14 + $0x4d0] sm:$0xf]  ;;  %v4541_v10 = vld [vmem:[#allocation14 + $0x1b0] sm:$0xf0] }
 0x218   :  { %2804 = vmatpush.bf16.msra.mxu1 %v5144_v51  ;;  %2779 = vmatpush.bf16.msrb.mxu3 %v4600_v31  ;;  %v5781_v51 = vld [vmem:[#allocation14 + $0x2ec] sm:$0xf0] }
 0x219   :  { %2767 = vmatmul.bf16.vlgmr.msrb.gmra.mxu2 %v6614_v22  ;;  %v5845_v1 = vld [vmem:[#allocation14 + $0x4ec] sm:$0xf0]  ;;  %v4700_v19 = vor.u32 %v5781_v51, %v4699_v12  ;;  %v5801_v12 = vld [vmem:[#allocation14 + $0x394] sm:$0xf] }
 0x21a   :  { %2792 = vmatpush.bf16.msra.mxu0 %v4856_v36  ;;  %2811 = vmatpush.bf16.msra.mxu2 %v4572_v63  ;;  %v5211_v16 = vld [vmem:[#allocation14 + $0x6d0] sm:$0xf]  ;;  %v4956_v29 = vor.u32 %v5845_v1, %v4955_v13  ;;  %v4797_v51 = vld [vmem:[#allocation14 + $0x3b0] sm:$0xf0] }
 0x21b   :  { %2780 = vmatmul.bf16.vlgmr.msrb.gmra.mxu3 %v6616_v23  ;;  %v5909_v30 = vld [vmem:[#allocation14 + $0x6ec] sm:$0xf0]  ;;  %v5865_v13 = vld [vmem:[#allocation14 + $0x594] sm:$0xf] }
 0x21c   :  { %2805 = vmatpush.bf16.msra.mxu1 %v5112_v37  ;;  %2824 = vmatpush.bf16.msra.mxu3 %v4828_v38  ;;  %v4411_v27 = vld [vmem:[#allocation14 + $0x90] sm:$0xf]  ;;  %v5212_v34 = vor.u32 %v5909_v30, %v5211_v16  ;;  %v5053_v1 = vld [vmem:[#allocation14 + $0x5b0] sm:$0xf0] }
 0x21d   :  { %2793 = vmatmul.bf16.vlgmr.msra.gmra.mxu0 %v6612_v21  ;;  %v5709_v28 = vld [vmem:[#allocation14 + $0xac] sm:$0xf0]  ;;  %v5929_v16 = vld [vmem:[#allocation14 + $0x794] sm:$0xf] }
 0x21e   :  { %2837 = vmatpush.bf16.msrb.mxu0 %v5084_v0  ;;  %2812 = vmatpush.bf16.msra.mxu2 %v4540_v52  ;;  %v4667_v31 = vld [vmem:[#allocation14 + $0x290] sm:$0xf]  ;;  %v4412_v63 = vor.u32 %v5709_v28, %v4411_v27  ;;  %v5309_v30 = vld [vmem:[#allocation14 + $0x7b0] sm:$0xf0] }
 0x21f   :  { %2806 = vmatmul.bf16.vlgmr.msra.gmra.mxu1 %v6618_v25  ;;  %v5773_v32 = vld [vmem:[#allocation14 + $0x2ac] sm:$0xf0]  ;;  %v5729_v27 = vld [vmem:[#allocation14 + $0x154] sm:$0xf] }
 0x220   :  { %2850 = vmatpush.bf16.msrb.mxu1 %v5340_v41  ;;  %2825 = vmatpush.bf16.msra.mxu3 %v4796_v53  ;;  %v4923_v33 = vld [vmem:[#allocation14 + $0x490] sm:$0xf]  ;;  %v4668_v38 = vor.u32 %v5773_v32, %v4667_v31  ;;  %v4509_v28 = vld [vmem:[#allocation14 + $0x170] sm:$0xf0] }
 0x221   :  { %v5837_v35 = vld [vmem:[#allocation14 + $0x4ac] sm:$0xf0]  ;;  %v5793_v31 = vld [vmem:[#allocation14 + $0x354] sm:$0xf] }
 0x222   :  { %2838 = vmatpush.bf16.msrb.mxu0 %v5052_v56  ;;  %2813 = vmatpush.bf16.msra.mxu2 %v4508_v14  ;;  %v5179_v36 = vld [vmem:[#allocation14 + $0x690] sm:$0xf]  ;;  %v4924_v0 = vor.u32 %v5837_v35, %v4923_v33  ;;  %v5745_v14 = vld [vmem:[#allocation14 + $0x1d4] sm:$0xf] }
 0x223   :  { %v5901_v37 = vld [vmem:[#allocation14 + $0x6ac] sm:$0xf0]  ;;  %v4765_v32 = vld [vmem:[#allocation14 + $0x370] sm:$0xf0] }
 0x224   :  { %2851 = vmatpush.bf16.msrb.mxu1 %v5308_v26  ;;  %2826 = vmatpush.bf16.msra.mxu3 %v4764_v49  ;;  %v4379_v15 = vld [vmem:[#allocation14 + $0x50] sm:$0xf]  ;;  %v5180_v41 = vor.u32 %v5901_v37, %v5179_v36  ;;  %v4573_v49 = vld [vmem:[#allocation14 + $0x1f0] sm:$0xf0] }
 0x225   :  { %v5701_v39 = vld [vmem:[#allocation14 + $0x6c] sm:$0xf0]  ;;  %v5857_v33 = vld [vmem:[#allocation14 + $0x554] sm:$0xf] }
 0x226   :  { %2839 = vmatpush.bf16.msrb.mxu0 %v5020_v2  ;;  %2814 = vmatpush.bf16.msra.mxu2 %v4476_v44  ;;  %v4635_v42 = vld [vmem:[#allocation14 + $0x250] sm:$0xf]  ;;  %v4380_v53 = vor.u32 %v5701_v39, %v4379_v15  ;;  %v5873_v2 = vld [vmem:[#allocation14 + $0x5d4] sm:$0xf]  ;;  %v4576_v44 = vor.u32 %v5745_v14, %v4573_v49 }
 0x227   :  { %v5765_v43 = vld [vmem:[#allocation14 + $0x26c] sm:$0xf0]  ;;  %v5021_v35 = vld [vmem:[#allocation14 + $0x570] sm:$0xf0] }
 0x228   :  { %2852 = vmatpush.bf16.msrb.mxu1 %v5276_v3  ;;  %2827 = vmatpush.bf16.msra.mxu3 %v4732_v9  ;;  %v4891_v20 = vld [vmem:[#allocation14 + $0x450] sm:$0xf]  ;;  %v4636_v54 = vor.u32 %v5765_v43, %v4635_v42  ;;  %v4832_v9 = vor.u32 %v5809_v61, %v4829_v62  ;;  %v5921_v36 = vld [vmem:[#allocation14 + $0x754] sm:$0xf] }
 0x229   :  { %v5829_v40 = vld [vmem:[#allocation14 + $0x46c] sm:$0xf0]  ;;  %v5277_v37 = vld [vmem:[#allocation14 + $0x770] sm:$0xf0] }
 0x22a   :  { %2840 = vmatpush.bf16.msrb.mxu0 %v4988_v11  ;;  %2815 = vmatpush.bf16.msra.mxu2 %v4444_v18  ;;  %v5147_v47 = vld [vmem:[#allocation14 + $0x650] sm:$0xf]  ;;  %v4892_v57 = vor.u32 %v5829_v40, %v4891_v20  ;;  %v5088_v11 = vor.u32 %v5873_v2, %v5085_v5  ;;  %v4544_v18 = vor.u32 %v5737_v50, %v4541_v10  ;;  %v5721_v15 = vld [vmem:[#allocation14 + $0x114] sm:$0xf] }
 0x22b   :  { %v5893_v48 = vld [vmem:[#allocation14 + $0x66c] sm:$0xf0]  ;;  %v4477_v39 = vld [vmem:[#allocation14 + $0x130] sm:$0xf0] }
 0x22c   :  { %2853 = vmatpush.bf16.msrb.mxu1 %v5244_v45  ;;  %2828 = vmatpush.bf16.msra.mxu3 %v4700_v19  ;;  %v4347_v52 = vld [vmem:[#allocation14 + $0x10] sm:$0xf]  ;;  %v5148_v58 = vor.u32 %v5893_v48, %v5147_v47  ;;  %v5344_v45 = vor.u32 %v5937_v6, %v5341_v46  ;;  %v4800_v19 = vor.u32 %v5801_v12, %v4797_v51  ;;  %v5785_v42 = vld [vmem:[#allocation14 + $0x314] sm:$0xf] }
 0x22d   :  { %v5693_v55 = vld [vmem:[#allocation14 + $0x2c] sm:$0xf0]  ;;  %v4733_v43 = vld [vmem:[#allocation14 + $0x330] sm:$0xf0] }
 0x22e   :  { %2841 = vmatpush.bf16.msrb.mxu0 %v4956_v29  ;;  %2816 = vmatpush.bf16.msra.mxu2 %v4412_v63  ;;  %v4603_v56 = vld [vmem:[#allocation14 + $0x210] sm:$0xf]  ;;  %v4348_v3 = vor.u32 %v5693_v55, %v4347_v52  ;;  %v5056_v29 = vor.u32 %v5865_v13, %v5053_v1  ;;  %v4512_v63 = vor.u32 %v5729_v27, %v4509_v28  ;;  %v5849_v20 = vld [vmem:[#allocation14 + $0x514] sm:$0xf] }
 0x22f   :  { %v5757_v26 = vld [vmem:[#allocation14 + $0x22c] sm:$0xf0]  ;;  %v4989_v40 = vld [vmem:[#allocation14 + $0x530] sm:$0xf0]  ;;  %v4480_v52 = vor.u32 %v5721_v15, %v4477_v39  ;;  %v4835_v15 = vld [vmem:[#allocation14 + $0x3d8] sm:$0xf] }
 0x230   :  { %2854 = vmatpush.bf16.msrb.mxu1 %v5212_v34  ;;  %2829 = vmatpush.bf16.msra.mxu3 %v4668_v38  ;;  %v4859_v59 = vld [vmem:[#allocation14 + $0x410] sm:$0xf]  ;;  %v4604_v4 = vor.u32 %v5757_v26, %v4603_v56  ;;  %v5312_v34 = vor.u32 %v5929_v16, %v5309_v30  ;;  %v4768_v38 = vor.u32 %v5793_v31, %v4765_v32  ;;  %v5913_v47 = vld [vmem:[#allocation14 + $0x714] sm:$0xf]  ;;  %v5814_v39 = vld [vmem:[#allocation14 + $0x3f4] sm:$0xf0] }
 0x231   :  { %v5821_v24 = vld [vmem:[#allocation14 + $0x42c] sm:$0xf0]  ;;  %v5245_v48 = vld [vmem:[#allocation14 + $0x730] sm:$0xf0]  ;;  %v4992_v56 = vor.u32 %v5849_v20, %v4989_v40  ;;  %v5347_v20 = vld [vmem:[#allocation14 + $0x7d8] sm:$0xf] }
 0x232   :  { %2842 = vmatpush.bf16.msrb.mxu0 %v4924_v0  ;;  %v5115_v17 = vld [vmem:[#allocation14 + $0x610] sm:$0xf]  ;;  %2817 = vmatpush.bf16.msra.mxu2 %v4380_v53  ;;  %v4860_v7 = vor.u32 %v5821_v24, %v4859_v59  ;;  %v5024_v0 = vor.u32 %v5857_v33, %v5021_v35  ;;  %v4736_v53 = vor.u32 %v5785_v42, %v4733_v43  ;;  %v4445_v55 = vld [vmem:[#allocation14 + $0xf0] sm:$0xf0]  ;;  %v5878_v43 = vld [vmem:[#allocation14 + $0x5f4] sm:$0xf0] }
 0x233   :  { %v5885_v60 = vld [vmem:[#allocation14 + $0x62c] sm:$0xf0]  ;;  %v5248_v26 = vor.u32 %v5913_v47, %v5245_v48  ;;  %v5841_v59 = vld [vmem:[#allocation14 + $0x4d4] sm:$0xf]  ;;  %v5942_v40 = vld [vmem:[#allocation14 + $0x7f4] sm:$0xf0] }
 0x234   :  { %2855 = vmatpush.bf16.msrb.mxu1 %v5180_v41  ;;  %2830 = vmatpush.bf16.msra.mxu3 %v4636_v54  ;;  %v5116_v8 = vor.u32 %v5885_v60, %v5115_v17  ;;  %v5280_v41 = vor.u32 %v5921_v36, %v5277_v37  ;;  %v5713_v54 = vld [vmem:[#allocation14 + $0xd4] sm:$0xf] }
 0x235   :  { %v4957_v24 = vld [vmem:[#allocation14 + $0x4f0] sm:$0xf0]  ;;  %v4448_v14 = vor.u32 %v5713_v54, %v4445_v55  ;;  %v4547_v54 = vld [vmem:[#allocation14 + $0x198] sm:$0xf] }
 0x236   :  { %2843 = vmatpush.bf16.msrb.mxu0 %v4892_v57  ;;  %2818 = vmatpush.bf16.msra.mxu2 %v4348_v3  ;;  %v5777_v57 = vld [vmem:[#allocation14 + $0x2d4] sm:$0xf]  ;;  %v4960_v2 = vor.u32 %v5841_v59, %v4957_v24  ;;  %v5742_v55 = vld [vmem:[#allocation14 + $0x1b4] sm:$0xf0] }
 0x237   :  { %v5905_v17 = vld [vmem:[#allocation14 + $0x6d4] sm:$0xf]  ;;  %v5059_v59 = vld [vmem:[#allocation14 + $0x598] sm:$0xf] }
 0x238   :  { %2856 = vmatpush.bf16.msrb.mxu1 %v5148_v58  ;;  %2831 = vmatpush.bf16.msra.mxu3 %v4604_v4  ;;  %v4701_v58 = vld [vmem:[#allocation14 + $0x2f0] sm:$0xf0]  ;;  %v5870_v24 = vld [vmem:[#allocation14 + $0x5b4] sm:$0xf0] }
 0x239   :  { %2819 = vmatmul.bf16.vlgmr.msra.gmra.mxu2 %v6614_v22  ;;  %v5213_v60 = vld [vmem:[#allocation14 + $0x6f0] sm:$0xf0]  ;;  %v4704_v49 = vor.u32 %v5777_v57, %v4701_v58  ;;  %v4803_v57 = vld [vmem:[#allocation14 + $0x398] sm:$0xf] }
 0x23a   :  { %2844 = vmatpush.bf16.msrb.mxu0 %v4860_v7  ;;  %2863 = vmatpush.bf16.msrb.mxu2 %v4576_v44  ;;  %v5705_v61 = vld [vmem:[#allocation14 + $0x94] sm:$0xf]  ;;  %v5216_v3 = vor.u32 %v5905_v17, %v5213_v60  ;;  %v5806_v58 = vld [vmem:[#allocation14 + $0x3b4] sm:$0xf0] }
 0x23b   :  { %2832 = vmatmul.bf16.vlgmr.msra.gmra.mxu3 %v6616_v23  ;;  %v4413_v62 = vld [vmem:[#allocation14 + $0xb0] sm:$0xf0]  ;;  %v5315_v17 = vld [vmem:[#allocation14 + $0x798] sm:$0xf] }
 0x23c   :  { %2857 = vmatpush.bf16.msrb.mxu1 %v5116_v8  ;;  %2876 = vmatpush.bf16.msrb.mxu3 %v4832_v9  ;;  %v5769_v4 = vld [vmem:[#allocation14 + $0x294] sm:$0xf]  ;;  %v4416_v44 = vor.u32 %v5705_v61, %v4413_v62  ;;  %v5934_v60 = vld [vmem:[#allocation14 + $0x7b4] sm:$0xf0] }
 0x23d   :  { %2845 = vmatmul.bf16.vlgmr.msrb.gmra.mxu0 %v6612_v21  ;;  %v4669_v5 = vld [vmem:[#allocation14 + $0x2b0] sm:$0xf0]  ;;  %v4515_v61 = vld [vmem:[#allocation14 + $0x158] sm:$0xf] }
 0x23e   :  { %2889 = vmatpush.bf16.msra.mxu0 %v5088_v11  ;;  %2864 = vmatpush.bf16.msrb.mxu2 %v4544_v18  ;;  %v5833_v6 = vld [vmem:[#allocation14 + $0x494] sm:$0xf]  ;;  %v4672_v9 = vor.u32 %v5769_v4, %v4669_v5  ;;  %v5734_v62 = vld [vmem:[#allocation14 + $0x174] sm:$0xf0] }
 0x23f   :  { %2858 = vmatmul.bf16.vlgmr.msrb.gmra.mxu1 %v6618_v25  ;;  %v4925_v46 = vld [vmem:[#allocation14 + $0x4b0] sm:$0xf0]  ;;  %v4771_v4 = vld [vmem:[#allocation14 + $0x358] sm:$0xf] }
 0x240   :  { %2902 = vmatpush.bf16.msra.mxu1 %v5344_v45  ;;  %2877 = vmatpush.bf16.msrb.mxu3 %v4800_v19  ;;  %v5897_v7 = vld [vmem:[#allocation14 + $0x694] sm:$0xf]  ;;  %v4928_v11 = vor.u32 %v5833_v6, %v4925_v46  ;;  %v5798_v5 = vld [vmem:[#allocation14 + $0x374] sm:$0xf0] }
 0x241   :  { %v5181_v8 = vld [vmem:[#allocation14 + $0x6b0] sm:$0xf0]  ;;  %v5027_v6 = vld [vmem:[#allocation14 + $0x558] sm:$0xf] }
 0x242   :  { %2890 = vmatpush.bf16.msra.mxu0 %v5056_v29  ;;  %2865 = vmatpush.bf16.msrb.mxu2 %v4512_v63  ;;  %v5697_v50 = vld [vmem:[#allocation14 + $0x54] sm:$0xf]  ;;  %v5184_v45 = vor.u32 %v5897_v7, %v5181_v8  ;;  %v4579_v63 = vld [vmem:[#allocation14 + $0x1d8] sm:$0xf] }
 0x243   :  { %v4381_v10 = vld [vmem:[#allocation14 + $0x70] sm:$0xf0]  ;;  %v5862_v46 = vld [vmem:[#allocation14 + $0x574] sm:$0xf0] }
 0x244   :  { %2903 = vmatpush.bf16.msra.mxu1 %v5312_v34  ;;  %2878 = vmatpush.bf16.msrb.mxu3 %v4768_v38  ;;  %v5761_v12 = vld [vmem:[#allocation14 + $0x254] sm:$0xf]  ;;  %v4384_v19 = vor.u32 %v5697_v50, %v4381_v10  ;;  %v5750_v38 = vld [vmem:[#allocation14 + $0x1f4] sm:$0xf0] }
 0x245   :  { %v4637_v51 = vld [vmem:[#allocation14 + $0x270] sm:$0xf0]  ;;  %v5283_v7 = vld [vmem:[#allocation14 + $0x758] sm:$0xf] }
 0x246   :  { %2891 = vmatpush.bf16.msra.mxu0 %v5024_v0  ;;  %2866 = vmatpush.bf16.msrb.mxu2 %v4480_v52  ;;  %v5825_v13 = vld [vmem:[#allocation14 + $0x454] sm:$0xf]  ;;  %v4640_v27 = vor.u32 %v5761_v12, %v4637_v51  ;;  %v5091_v0 = vld [vmem:[#allocation14 + $0x5d8] sm:$0xf]  ;;  %v4580_v52 = vor.u32 %v5750_v38, %v4579_v63  ;;  %v5028_v12 = vor.u32 %v5862_v46, %v5027_v6 }
 0x247   :  { %v4893_v1 = vld [vmem:[#allocation14 + $0x470] sm:$0xf0]  ;;  %v5926_v8 = vld [vmem:[#allocation14 + $0x774] sm:$0xf0] }
 0x248   :  { %2904 = vmatpush.bf16.msra.mxu1 %v5280_v41  ;;  %2879 = vmatpush.bf16.msrb.mxu3 %v4736_v53  ;;  %v5889_v16 = vld [vmem:[#allocation14 + $0x654] sm:$0xf]  ;;  %v4896_v31 = vor.u32 %v5825_v13, %v4893_v1  ;;  %v4836_v53 = vor.u32 %v5814_v39, %v4835_v15  ;;  %v5284_v51 = vor.u32 %v5926_v8, %v5283_v7  ;;  %v4739_v13 = vld [vmem:[#allocation14 + $0x318] sm:$0xf] }
 0x249   :  { %v5149_v30 = vld [vmem:[#allocation14 + $0x670] sm:$0xf0]  ;;  %v5790_v1 = vld [vmem:[#allocation14 + $0x334] sm:$0xf0] }
 0x24a   :  { %2892 = vmatpush.bf16.msra.mxu0 %v4992_v56  ;;  %2867 = vmatpush.bf16.msrb.mxu2 %v4448_v14  ;;  %v5689_v18 = vld [vmem:[#allocation14 + $0x14] sm:$0xf]  ;;  %v5152_v32 = vor.u32 %v5889_v16, %v5149_v30  ;;  %v5092_v56 = vor.u32 %v5878_v43, %v5091_v0  ;;  %v4548_v14 = vor.u32 %v5742_v55, %v4547_v54  ;;  %v4995_v16 = vld [vmem:[#allocation14 + $0x518] sm:$0xf] }
 0x24b   :  { %v4349_v28 = vld [vmem:[#allocation14 + $0x30] sm:$0xf0]  ;;  %v5854_v30 = vld [vmem:[#allocation14 + $0x534] sm:$0xf0] }
 0x24c   :  { %2905 = vmatpush.bf16.msra.mxu1 %v5248_v26  ;;  %2880 = vmatpush.bf16.msrb.mxu3 %v4704_v49  ;;  %v5753_v29 = vld [vmem:[#allocation14 + $0x214] sm:$0xf]  ;;  %v4352_v41 = vor.u32 %v5689_v18, %v4349_v28  ;;  %v5348_v26 = vor.u32 %v5942_v40, %v5347_v20  ;;  %v4804_v49 = vor.u32 %v5806_v58, %v4803_v57  ;;  %v5251_v18 = vld [vmem:[#allocation14 + $0x718] sm:$0xf] }
 0x24d   :  { %v4605_v34 = vld [vmem:[#allocation14 + $0x230] sm:$0xf0]  ;;  %v4740_v28 = vor.u32 %v5790_v1, %v4739_v13  ;;  %v4963_v63 = vld [vmem:[#allocation14 + $0x4d8] sm:$0xf] }
 0x24e   :  { %2893 = vmatpush.bf16.msra.mxu0 %v4960_v2  ;;  %2868 = vmatpush.bf16.msrb.mxu2 %v4416_v44  ;;  %v5817_v33 = vld [vmem:[#allocation14 + $0x414] sm:$0xf]  ;;  %v4608_v42 = vor.u32 %v5753_v29, %v4605_v34  ;;  %v5060_v2 = vor.u32 %v5870_v24, %v5059_v59  ;;  %v4516_v44 = vor.u32 %v5734_v62, %v4515_v61  ;;  %v4451_v29 = vld [vmem:[#allocation14 + $0xd8] sm:$0xf] }
 0x24f   :  { %v4861_v35 = vld [vmem:[#allocation14 + $0x430] sm:$0xf0]  ;;  %v5718_v34 = vld [vmem:[#allocation14 + $0xf4] sm:$0xf0] }
 0x250   :  { %2906 = vmatpush.bf16.msra.mxu1 %v5216_v3  ;;  %2881 = vmatpush.bf16.msrb.mxu3 %v4672_v9  ;;  %v5881_v36 = vld [vmem:[#allocation14 + $0x614] sm:$0xf]  ;;  %v4864_v47 = vor.u32 %v5817_v33, %v4861_v35  ;;  %v5316_v3 = vor.u32 %v5934_v60, %v5315_v17  ;;  %v4772_v9 = vor.u32 %v5798_v5, %v4771_v4  ;;  %v5846_v15 = vld [vmem:[#allocation14 + $0x4f4] sm:$0xf0] }
 0x251   :  { %v5117_v37 = vld [vmem:[#allocation14 + $0x630] sm:$0xf0]  ;;  %v5219_v39 = vld [vmem:[#allocation14 + $0x6d8] sm:$0xf] }
 0x252   :  { %2894 = vmatpush.bf16.msra.mxu0 %v4928_v11  ;;  %2869 = vmatpush.bf16.msrb.mxu2 %v4384_v19  ;;  %v5120_v48 = vor.u32 %v5881_v36, %v5117_v37  ;;  %v4483_v11 = vld [vmem:[#allocation14 + $0x118] sm:$0xf] }
 0x253   :  { %v5918_v19 = vld [vmem:[#allocation14 + $0x734] sm:$0xf0] }
 0x254   :  { %2907 = vmatpush.bf16.msra.mxu1 %v5184_v45  ;;  %2882 = vmatpush.bf16.msrb.mxu3 %v4640_v27  ;;  %v5726_v45 = vld [vmem:[#allocation14 + $0x134] sm:$0xf0] }
 0x255   :  { %v2638_v50 = vpop.f32.mrf.mxu0  ;;  %v2651_v10 = vpop.f32.mrf.mxu1  ;;  %v4484_v27 = vor.u32 %v5726_v45, %v4483_v11  ;;  %v4707_v36 = vld [vmem:[#allocation14 + $0x2d8] sm:$0xf] }
 0x256   :  { %2895 = vmatpush.bf16.msra.mxu0 %v4896_v31  ;;  %2870 = vmatpush.bf16.msrb.mxu2 %v4352_v41  ;;  %v4996_v31 = vor.u32 %v5854_v30, %v4995_v16  ;;  %v5782_v37 = vld [vmem:[#allocation14 + $0x2f4] sm:$0xf0] }
 0x257   :  { %v5910_v0 = vld [vmem:[#allocation14 + $0x6f4] sm:$0xf0]  ;;  %v4708_v43 = vor.u32 %v5782_v37, %v4707_v36  ;;  %v4581_v36 = vld [vmem:[#allocation14 + $0x1f8] sm:$0xf0] }
 0x258   :  { %2908 = vmatpush.bf16.msra.mxu1 %v5152_v32  ;;  %2883 = vmatpush.bf16.msrb.mxu3 %v4608_v42  ;;  %v5252_v32 = vor.u32 %v5918_v19, %v5251_v18  ;;  %v4452_v42 = vor.u32 %v5718_v34, %v4451_v29  ;;  %v4675_v54 = vld [vmem:[#allocation14 + $0x298] sm:$0xf]  ;;  %v5810_v37 = vld [vmem:[#allocation14 + $0x3dc] sm:$0xf] }
 0x259   :  { %2871 = vmatmul.bf16.vlgmr.msrb.gmra.mxu2 %v6614_v22  ;;  %v5774_v55 = vld [vmem:[#allocation14 + $0x2b4] sm:$0xf0] }
 0x25a   :  { %2896 = vmatpush.bf16.msra.mxu0 %v4864_v47  ;;  %2915 = vmatpush.bf16.msra.mxu2 %v4580_v52  ;;  %v2612_v33 = vpop.f32.mrf.mxu2  ;;  %v2625_v35 = vpop.f32.mrf.mxu3  ;;  %v4419_v47 = vld [vmem:[#allocation14 + $0x98] sm:$0xf]  ;;  %v4964_v52 = vor.u32 %v5846_v15, %v4963_v63  ;;  %v4837_v63 = vld [vmem:[#allocation14 + $0x3f8] sm:$0xf0] }
 0x25b   :  { %2884 = vmatmul.bf16.vlgmr.msrb.gmra.mxu3 %v6616_v23  ;;  %v2626_v38 = vadd.f32 %v2625_v35, %v2612_v33  ;;  %v5838_v57 = vld [vmem:[#allocation14 + $0x4b4] sm:$0xf0]  ;;  %v5093_v15 = vld [vmem:[#allocation14 + $0x5f8] sm:$0xf0] }
 0x25c   :  { %2909 = vmatpush.bf16.msra.mxu1 %v5120_v48  ;;  %2928 = vmatpush.bf16.msra.mxu3 %v4836_v53  ;;  %v5710_v48 = vld [vmem:[#allocation14 + $0xb4] sm:$0xf0]  ;;  %v5220_v53 = vor.u32 %v5910_v0, %v5219_v39 }
 0x25d   :  { %2897 = vmatmul.bf16.vlgmr.msra.gmra.mxu0 %v6612_v21  ;;  %v2639_v41 = vadd.f32 %v2638_v50, %v2626_v38  ;;  %v2640_v20 = vpop.f32.mrf.mxu0  ;;  %v2653_v40 = vpop.f32.mrf.mxu1  ;;  %v5187_v58 = vld [vmem:[#allocation14 + $0x698] sm:$0xf]  ;;  %v5874_v38 = vld [vmem:[#allocation14 + $0x5dc] sm:$0xf] }
 0x25e   :  { %2941 = vmatpush.bf16.msrb.mxu0 %v5092_v56  ;;  %2916 = vmatpush.bf16.msra.mxu2 %v4548_v14  ;;  %v4931_v56 = vld [vmem:[#allocation14 + $0x498] sm:$0xf]  ;;  %v4420_v14 = vor.u32 %v5710_v48, %v4419_v47  ;;  %v5349_v20 = vld [vmem:[#allocation14 + $0x7f8] sm:$0xf0] }
 0x25f   :  { %2910 = vmatmul.bf16.vlgmr.msra.gmra.mxu1 %v6618_v25  ;;  %v5902_v59 = vld [vmem:[#allocation14 + $0x6b4] sm:$0xf0] }
 0x260   :  { %2954 = vmatpush.bf16.msrb.mxu1 %v5348_v26  ;;  %2929 = vmatpush.bf16.msra.mxu3 %v4804_v49  ;;  %v6644_v26 = vadd.f32 %v2651_v10, %v2639_v41  ;;  %v4387_v24 = vld [vmem:[#allocation14 + $0x58] sm:$0xf]  ;;  %v4676_v49 = vor.u32 %v5774_v55, %v4675_v54  ;;  %v5738_v54 = vld [vmem:[#allocation14 + $0x19c] sm:$0xf] }
 0x261   :  { %v5702_v61 = vld [vmem:[#allocation14 + $0x74] sm:$0xf0] }
 0x262   :  { %2942 = vmatpush.bf16.msrb.mxu0 %v5060_v2  ;;  %2917 = vmatpush.bf16.msra.mxu2 %v4516_v44  ;;  %v3021_v17 = vrot.slane %v6644_v26, 4  ;;  %v3069_v60 = vmul.f32 %v6644_v26, %v6644_v26  ;;  %v4643_v62 = vld [vmem:[#allocation14 + $0x258] sm:$0xf]  ;;  %v4932_v2 = vor.u32 %v5838_v57, %v4931_v56  ;;  %v2614_v4 = vpop.f32.mrf.mxu2  ;;  %v2627_v5 = vpop.f32.mrf.mxu3  ;;  %v4388_v1 = vor.u32 %v5702_v61, %v4387_v24  ;;  %v5802_v24 = vld [vmem:[#allocation14 + $0x39c] sm:$0xf] }
 0x263   :  { %v5766_v6 = vld [vmem:[#allocation14 + $0x274] sm:$0xf0]  ;;  %v4840_v57 = vor.u32 %v5810_v37, %v4837_v63  ;;  %v5061_v61 = vld [vmem:[#allocation14 + $0x5b8] sm:$0xf0] }
 0x264   :  { %2955 = vmatpush.bf16.msrb.mxu1 %v5316_v3  ;;  %2930 = vmatpush.bf16.msra.mxu3 %v4772_v9  ;;  %v5188_v3 = vor.u32 %v5902_v59, %v5187_v58  ;;  %v4899_v46 = vld [vmem:[#allocation14 + $0x458] sm:$0xf]  ;;  %v3022_v8 = vadd.f32 %v3021_v17, %v6644_v26  ;;  %v3077_v44 = vrot.slane %v3069_v60, 4  ;;  %v4644_v16 = vor.u32 %v5766_v6, %v4643_v62  ;;  %v4549_v59 = vld [vmem:[#allocation14 + $0x1b8] sm:$0xf0] }
 0x265   :  { %v5830_v7 = vld [vmem:[#allocation14 + $0x474] sm:$0xf0]  ;;  %v2690_v30 = vpop.f32.mrf.mxu0  ;;  %v2703_v18 = vpop.f32.mrf.mxu1  ;;  %v5096_v17 = vor.u32 %v5874_v38, %v5093_v15  ;;  %v5930_v6 = vld [vmem:[#allocation14 + $0x79c] sm:$0xf] }
 0x266   :  { %2943 = vmatpush.bf16.msrb.mxu0 %v5028_v12  ;;  %2918 = vmatpush.bf16.msra.mxu2 %v4484_v27  ;;  %v5155_v9 = vld [vmem:[#allocation14 + $0x658] sm:$0xf]  ;;  %v3078_v13 = vadd.f32 %v3077_v44, %v3069_v60  ;;  %v5786_v38 = vld [vmem:[#allocation14 + $0x31c] sm:$0xf] }
 0x267   :  { %v5894_v50 = vld [vmem:[#allocation14 + $0x674] sm:$0xf0]  ;;  %v4741_v15 = vld [vmem:[#allocation14 + $0x338] sm:$0xf0] }
 0x268   :  { %2956 = vmatpush.bf16.msrb.mxu1 %v5284_v51  ;;  %2931 = vmatpush.bf16.msra.mxu3 %v4740_v28  ;;  %v4355_v10 = vld [vmem:[#allocation14 + $0x18] sm:$0xf]  ;;  %v3023_v51 = vrot.slane %v3022_v8, 2  ;;  %v4900_v28 = vor.u32 %v5830_v7, %v4899_v46  ;;  %v5156_v29 = vor.u32 %v5894_v50, %v5155_v9  ;;  %v3079_v35 = vrot.slane %v3078_v13, 2  ;;  %v5317_v46 = vld [vmem:[#allocation14 + $0x7b8] sm:$0xf0] }
 0x269   :  { %v5694_v11 = vld [vmem:[#allocation14 + $0x34] sm:$0xf0]  ;;  %v4552_v7 = vor.u32 %v5738_v54, %v4549_v59  ;;  %v4453_v59 = vld [vmem:[#allocation14 + $0xf8] sm:$0xf0] }
 0x26a   :  { %2944 = vmatpush.bf16.msrb.mxu0 %v4996_v31  ;;  %2919 = vmatpush.bf16.msra.mxu2 %v4452_v42  ;;  %v4611_v45 = vld [vmem:[#allocation14 + $0x218] sm:$0xf]  ;;  %v3024_v33 = vadd.f32 %v3023_v51, %v3022_v8  ;;  %v3080_v0 = vadd.f32 %v3079_v35, %v3078_v13  ;;  %v4356_v41 = vor.u32 %v5694_v11, %v4355_v10  ;;  %v5730_v8 = vld [vmem:[#allocation14 + $0x15c] sm:$0xf] }
 0x26b   :  { %v5758_v12 = vld [vmem:[#allocation14 + $0x234] sm:$0xf0]  ;;  %v4517_v11 = vld [vmem:[#allocation14 + $0x178] sm:$0xf0]  ;;  %v5320_v51 = vor.u32 %v5930_v6, %v5317_v46 }
 0x26c   :  { %2957 = vmatpush.bf16.msrb.mxu1 %v5252_v32  ;;  %2932 = vmatpush.bf16.msra.mxu3 %v4708_v43  ;;  %v4867_v19 = vld [vmem:[#allocation14 + $0x418] sm:$0xf]  ;;  %v5746_v32 = vld [vmem:[#allocation14 + $0x1dc] sm:$0xf]  ;;  %v3025_v39 = vrot.slane %v3024_v33, 1  ;;  %v4612_v42 = vor.u32 %v5758_v12, %v4611_v45  ;;  %v3081_v56 = vrot.slane %v3080_v0, 1 }
 0x26d   :  { %v5822_v27 = vld [vmem:[#allocation14 + $0x434] sm:$0xf0]  ;;  %v5938_v43 = vld [vmem:[#allocation14 + $0x7dc] sm:$0xf]  ;;  %v4584_v48 = vor.u32 %v5746_v32, %v4581_v36  ;;  %v2692_v4 = vpop.f32.mrf.mxu0  ;;  %v2705_v5 = vpop.f32.mrf.mxu1 }
 0x26e   :  { %2945 = vmatpush.bf16.msrb.mxu0 %v4964_v52  ;;  %2920 = vmatpush.bf16.msra.mxu2 %v4420_v14  ;;  %v5123_v34 = vld [vmem:[#allocation14 + $0x618] sm:$0xf]  ;;  %v4868_v40 = vor.u32 %v5822_v27, %v4867_v19  ;;  %v2664_v52 = vpop.f32.mrf.mxu2  ;;  %v3026_v55 = vadd.f32 %v3025_v39, %v3024_v33  ;;  %v5352_v60 = vor.u32 %v5938_v43, %v5349_v20  ;;  %v4805_v14 = vld [vmem:[#allocation14 + $0x3b8] sm:$0xf0] }
 0x26f   :  { %v5886_v31 = vld [vmem:[#allocation14 + $0x634] sm:$0xf0]  ;;  %v3082_v62 = vadd.f32 %v3081_v56, %v3080_v0  ;;  %v4808_v10 = vor.u32 %v5802_v24, %v4805_v14  ;;  %v5794_v45 = vld [vmem:[#allocation14 + $0x35c] sm:$0xf] }
 0x270   :  { %2958 = vmatpush.bf16.msrb.mxu1 %v5220_v53  ;;  %2933 = vmatpush.bf16.msra.mxu3 %v4676_v49  ;;  %v5124_v47 = vor.u32 %v5886_v31, %v5123_v34  ;;  %v2677_v53 = vpop.f32.mrf.mxu3  ;;  %v5866_v49 = vld [vmem:[#allocation14 + $0x59c] sm:$0xf] }
 0x271   :  { %v2678_v58 = vadd.f32 %v2677_v53, %v2664_v52  ;;  %v3133_v44 = vmul.f32 0.125, %v3082_v62  ;;  %v5064_v12 = vor.u32 %v5866_v49, %v5061_v61  ;;  %v4773_v13 = vld [vmem:[#allocation14 + $0x378] sm:$0xf0] }
 0x272   :  { %2946 = vmatpush.bf16.msrb.mxu0 %v4932_v2  ;;  %2921 = vmatpush.bf16.msra.mxu2 %v4388_v1  ;;  %v6650_v2 = vmul.f32 0.125, %v3026_v55  ;;  %v5858_v1 = vld [vmem:[#allocation14 + $0x55c] sm:$0xf]  ;;  %v4776_v63 = vor.u32 %v5794_v45, %v4773_v13 }
 0x273   :  { %v5722_v32 = vld [vmem:[#allocation14 + $0x11c] sm:$0xf] }
 0x274   :  { %2959 = vmatpush.bf16.msrb.mxu1 %v5188_v3  ;;  %2934 = vmatpush.bf16.msra.mxu3 %v4644_v16  ;;  %v2691_v3 = vadd.f32 %v2690_v30, %v2678_v58  ;;  %v3141_v9 = vmul.f32 %v6650_v2, %v6650_v2  ;;  %v5029_v16 = vld [vmem:[#allocation14 + $0x578] sm:$0xf0]  ;;  %v4744_v58 = vor.u32 %v5786_v38, %v4741_v15 }
 0x275   :  { %v4485_v33 = vld [vmem:[#allocation14 + $0x138] sm:$0xf0]  ;;  %v5032_v39 = vor.u32 %v5858_v1, %v5029_v16 }
 0x276   :  { %2947 = vmatpush.bf16.msrb.mxu0 %v4900_v28  ;;  %2922 = vmatpush.bf16.msra.mxu2 %v4356_v41  ;;  %v6654_v50 = vadd.f32 %v2703_v18, %v2691_v3  ;;  %v3149_v30 = vsub.f32 %v3133_v44, %v3141_v9  ;;  %v5922_v18 = vld [vmem:[#allocation14 + $0x75c] sm:$0xf]  ;;  %v2666_v34 = vpop.f32.mrf.mxu2 }
 0x277   :  { %v5285_v28 = vld [vmem:[#allocation14 + $0x778] sm:$0xf0] }
 0x278   :  { %2960 = vmatpush.bf16.msrb.mxu1 %v5156_v29  ;;  %2935 = vmatpush.bf16.msra.mxu3 %v4612_v42  ;;  %v3027_v19 = vrot.slane %v6654_v50, 4  ;;  %v3070_v27 = vmul.f32 %v6654_v50, %v6654_v50  ;;  %v4520_v29 = vor.u32 %v5730_v8, %v4517_v11  ;;  %v2679_v31 = vpop.f32.mrf.mxu3  ;;  %v3157_v35 = vmax.f32 %v3149_v30, 0.0  ;;  %v5850_v41 = vld [vmem:[#allocation14 + $0x51c] sm:$0xf] }
 0x279   :  { %2923 = vmatmul.bf16.vlgmr.msra.gmra.mxu2 %v6614_v22  ;;  %v5288_v0 = vor.u32 %v5922_v18, %v5285_v28  ;;  %v4997_v42 = vld [vmem:[#allocation14 + $0x538] sm:$0xf0] }
 0x27a   :  { %2948 = vmatpush.bf16.msrb.mxu0 %v4868_v40  ;;  %2967 = vmatpush.bf16.msrb.mxu2 %v4584_v48  ;;  %v3028_v36 = vadd.f32 %v3027_v19, %v6654_v50  ;;  %v3083_v37 = vrot.slane %v3070_v27, 4  ;;  %v5914_v43 = vld [vmem:[#allocation14 + $0x71c] sm:$0xf]  ;;  %v6664_v20 = vadd.f32 1e-05, %v3157_v35  ;;  %v2742_v55 = vpop.f32.mrf.mxu0 }
 0x27b   :  { %2936 = vmatmul.bf16.vlgmr.msra.gmra.mxu3 %v6616_v23  ;;  %v5253_v48 = vld [vmem:[#allocation14 + $0x738] sm:$0xf0] }
 0x27c   :  { %2961 = vmatpush.bf16.msrb.mxu1 %v5124_v47  ;;  %2980 = vmatpush.bf16.msrb.mxu3 %v4840_v57  ;;  %v3029_v40 = vrot.slane %v3028_v36, 2  ;;  %v3084_v47 = vadd.f32 %v3083_v37, %v3070_v27  ;;  %v5714_v52 = vld [vmem:[#allocation14 + $0xdc] sm:$0xf]  ;;  %v2755_v56 = vpop.f32.mrf.mxu1  ;;  %v4488_v57 = vor.u32 %v5722_v32, %v4485_v33  ;;  %6040 = vrsqrt.f32 %v6664_v20 }
 0x27d   :  { %2949 = vmatmul.bf16.vlgmr.msrb.gmra.mxu0 %v6612_v21  ;;  %v5778_v24 = vld [vmem:[#allocation14 + $0x2dc] sm:$0xf]  ;;  %v4456_v8 = vor.u32 %v5714_v52, %v4453_v59  ;;  %vm3179_vm11 = vweird.f32 %v6664_v20 }
 0x27e   :  { %2993 = vmatpush.bf16.msra.mxu0 %v5096_v17  ;;  %2968 = vmatpush.bf16.msrb.mxu2 %v4552_v7  ;;  %v3030_v53 = vadd.f32 %v3029_v40, %v3028_v36  ;;  %v3085_v54 = vrot.slane %v3084_v47, 2  ;;  %v5000_v17 = vor.u32 %v5850_v41, %v4997_v42  ;;  %v4709_v14 = vld [vmem:[#allocation14 + $0x2f8] sm:$0xf0] }
 0x27f   :  { %2962 = vmatmul.bf16.vlgmr.msrb.gmra.mxu1 %v6618_v25  ;;  %v5842_v49 = vld [vmem:[#allocation14 + $0x4dc] sm:$0xf]  ;;  %v4712_v44 = vor.u32 %v5778_v24, %v4709_v14 }
 0x280   :  { %3006 = vmatpush.bf16.msra.mxu1 %v5352_v60  ;;  %2981 = vmatpush.bf16.msrb.mxu3 %v4808_v10  ;;  %v5256_v60 = vor.u32 %v5914_v43, %v5253_v48  ;;  %v4965_v61 = vld [vmem:[#allocation14 + $0x4f8] sm:$0xf0]  ;;  %v3031_v62 = vrot.slane %v3030_v53, 1  ;;  %v3086_v3 = vadd.f32 %v3085_v54, %v3084_v47 }
 0x281   :  { %v5906_v4 = vld [vmem:[#allocation14 + $0x6dc] sm:$0xf]  ;;  %v4968_v11 = vor.u32 %v5842_v49, %v4965_v61 }
 0x282   :  { %2994 = vmatpush.bf16.msra.mxu0 %v5064_v12  ;;  %2969 = vmatpush.bf16.msrb.mxu2 %v4520_v29  ;;  %v5221_v5 = vld [vmem:[#allocation14 + $0x6f8] sm:$0xf0]  ;;  %v3032_v46 = vadd.f32 %v3031_v62, %v3030_v53  ;;  %v3087_v7 = vrot.slane %v3086_v3, 1  ;;  %v2716_v12 = vpop.f32.mrf.mxu2  ;;  %v6669_v34 = vpop.eup %6040 }
 0x283   :  { %v5706_v6 = vld [vmem:[#allocation14 + $0x9c] sm:$0xf]  ;;  %v5224_v45 = vor.u32 %v5906_v4, %v5221_v5  ;;  %v2744_v35 = vpop.f32.mrf.mxu0  ;;  %vm3180_vm8 = vweird.f32 %v6669_v34 }
 0x284   :  { %3007 = vmatpush.bf16.msra.mxu1 %v5320_v51  ;;  %2982 = vmatpush.bf16.msrb.mxu3 %v4776_v63  ;;  %v4421_v9 = vld [vmem:[#allocation14 + $0xb8] sm:$0xf0]  ;;  %v2729_v51 = vpop.f32.mrf.mxu3  ;;  %v3088_v30 = vadd.f32 %v3087_v7, %v3086_v3  ;;  %v6667_v19 = vmul.f32 0.125, %v3032_v46  ;;  %v2757_v36 = vpop.f32.mrf.mxu1  ;;  %vm3181_vm12 = vmor %vm3179_vm11, %vm3180_vm8  ;;  %vm3304_vm11 = vcmask 1044484  }
 0x285   :  { %v5770_v10 = vld [vmem:[#allocation14 + $0x29c] sm:$0xf]  ;;  %v2730_v27 = vadd.f32 %v2729_v51, %v2716_v12  ;;  %v4424_v29 = vor.u32 %v5706_v6, %v4421_v9 }
 0x286   :  { %2995 = vmatpush.bf16.msra.mxu0 %v5032_v39  ;;  %2970 = vmatpush.bf16.msrb.mxu2 %v4488_v57  ;;  %v4677_v13 = vld [vmem:[#allocation14 + $0x2b8] sm:$0xf0]  ;;  %v3134_v31 = vmul.f32 0.125, %v3088_v30  ;;  %v3142_v32 = vmul.f32 %v6667_v19, %v6667_v19  ;;  %v3174_v57 = vmul.f32 %v6669_v34, %v6664_v20 }
 0x287   :  { %v5834_v1 = vld [vmem:[#allocation14 + $0x49c] sm:$0xf]  ;;  %v2743_v33 = vadd.f32 %v2742_v55, %v2730_v27  ;;  %v4680_v37 = vor.u32 %v5770_v10, %v4677_v13 }
 0x288   :  { %3008 = vmatpush.bf16.msra.mxu1 %v5288_v0  ;;  %2983 = vmatpush.bf16.msrb.mxu3 %v4744_v58  ;;  %v4933_v16 = vld [vmem:[#allocation14 + $0x4b8] sm:$0xf0]  ;;  %v3150_v43 = vsub.f32 %v3134_v31, %v3142_v32  ;;  %v3175_v9 = vmul.f32 %v6669_v34, %v3174_v57 }
 0x289   :  { %v5898_v18 = vld [vmem:[#allocation14 + $0x69c] sm:$0xf]  ;;  %v4936_v15 = vor.u32 %v5834_v1, %v4933_v16  ;;  %v6673_v40 = vadd.f32 %v2755_v56, %v2743_v33 }
 0x28a   :  { %2996 = vmatpush.bf16.msra.mxu0 %v5000_v17  ;;  %v5189_v28 = vld [vmem:[#allocation14 + $0x6b8] sm:$0xf0]  ;;  %2971 = vmatpush.bf16.msrb.mxu2 %v4456_v8  ;;  %v3158_v58 = vmax.f32 %v3150_v43, 0.0  ;;  %v2718_v61 = vpop.f32.mrf.mxu2  ;;  %v3176_v16 = vmul.f32 0.5, %v3175_v9 }
 0x28b   :  { %v5698_v63 = vld [vmem:[#allocation14 + $0x5c] sm:$0xf]  ;;  %v5192_v39 = vor.u32 %v5898_v18, %v5189_v28  ;;  %v3033_v59 = vrot.slane %v6673_v40, 4  ;;  %v3071_v24 = vmul.f32 %v6673_v40, %v6673_v40 }
 0x28c   :  { %3009 = vmatpush.bf16.msra.mxu1 %v5256_v60  ;;  %2984 = vmatpush.bf16.msrb.mxu3 %v4712_v44  ;;  %v4389_v38 = vld [vmem:[#allocation14 + $0x78] sm:$0xf0]  ;;  %v2731_v62 = vpop.f32.mrf.mxu3  ;;  %v3166_v6 = vadd.f32 1e-05, %v3158_v58  ;;  %v3177_v32 = vsub.f32 1.5, %v3176_v16 }
 0x28d   :  { %v5762_v0 = vld [vmem:[#allocation14 + $0x25c] sm:$0xf]  ;;  %v4392_v53 = vor.u32 %v5698_v63, %v4389_v38  ;;  %v3034_v46 = vadd.f32 %v3033_v59, %v6673_v40  ;;  %v3089_v7 = vrot.slane %v3071_v24, 4 }
 0x28e   :  { %2997 = vmatpush.bf16.msra.mxu0 %v4968_v11  ;;  %v4645_v41 = vld [vmem:[#allocation14 + $0x278] sm:$0xf0]  ;;  %2972 = vmatpush.bf16.msrb.mxu2 %v4424_v29  ;;  %6042 = vrsqrt.f32 %v3166_v6  ;;  %v3178_v38 = vmul.f32 %v6669_v34, %v3177_v32  ;;  %vm3189_vm13 = vweird.f32 %v3166_v6 }
 0x28f   :  { %v5826_v42 = vld [vmem:[#allocation14 + $0x45c] sm:$0xf]  ;;  %v4648_v17 = vor.u32 %v5762_v0, %v4645_v41  ;;  %v3035_v10 = vrot.slane %v3034_v46, 2  ;;  %v3090_v11 = vadd.f32 %v3089_v7, %v3071_v24 }
 0x290   :  { %3010 = vmatpush.bf16.msra.mxu1 %v5224_v45  ;;  %v4901_v47 = vld [vmem:[#allocation14 + $0x478] sm:$0xf0]  ;;  %2985 = vmatpush.bf16.msrb.mxu3 %v4680_v37  ;;  %v6688_v37 = vld [vmem:[#allocation16] sm:$0xff] }
 0x291   :  { %v5890_v48 = vld [vmem:[#allocation14 + $0x65c] sm:$0xf]  ;;  %v4904_v14 = vor.u32 %v5826_v42, %v4901_v47  ;;  %v3036_v13 = vadd.f32 %v3035_v10, %v3034_v46  ;;  %v3091_v1 = vrot.slane %v3090_v11, 2  ;;  %v3254_v0 = vperm.slane %v6688_v37, 0 }
 0x292   :  { %v5157_v52 = vld [vmem:[#allocation14 + $0x678] sm:$0xf0]  ;;  %2998 = vmatpush.bf16.msra.mxu0 %v4936_v15  ;;  %2973 = vmatpush.bf16.msrb.mxu2 %v4392_v53  ;;  %v3182_v42 = vsel %vm3181_vm12, %v6669_v34, %v3178_v38 }
 0x293   :  { %v5690_v54 = vld [vmem:[#allocation14 + $0x1c] sm:$0xf]  ;;  %v5160_v49 = vor.u32 %v5890_v48, %v5157_v52  ;;  %v3037_v30 = vrot.slane %v3036_v13, 1  ;;  %v3092_v27 = vadd.f32 %v3091_v1, %v3090_v11  ;;  %v6700_v48 = vmul.f32 %v3254_v0, %v3182_v42 }
 0x294   :  { %v4357_v55 = vld [vmem:[#allocation14 + $0x38] sm:$0xf0]  ;;  %3011 = vmatpush.bf16.msra.mxu1 %v5192_v39  ;;  %2986 = vmatpush.bf16.msrb.mxu3 %v4648_v17  ;;  %v6043_v18 = vpop.eup %6042 }
 0x295   :  { %v5754_v56 = vld [vmem:[#allocation14 + $0x21c] sm:$0xf]  ;;  %v4360_v44 = vor.u32 %v5690_v54, %v4357_v55  ;;  %v3038_v28 = vadd.f32 %v3037_v30, %v3036_v13  ;;  %v3093_v29 = vrot.slane %v3092_v27, 1  ;;  %v3184_v31 = vmul.f32 %v6043_v18, %v3166_v6 }
 0x296   :  { %v4613_v60 = vld [vmem:[#allocation14 + $0x238] sm:$0xf0]  ;;  %2999 = vmatpush.bf16.msra.mxu0 %v4904_v14  ;;  %vm3190_vm10 = vweird.f32 %v6043_v18  ;;  %v3278_v34 = vmul.f32 %v6700_v48, %v6650_v2 }
 0x297   :  { %v5818_v3 = vld [vmem:[#allocation14 + $0x41c] sm:$0xf]  ;;  %v4616_v45 = vor.u32 %v5754_v56, %v4613_v60  ;;  %2974 = vmatpush.bf16.msrb.mxu2 %v4360_v44  ;;  %v3185_v33 = vmul.f32 %v6043_v18, %v3184_v31  ;;  %v3094_v35 = vadd.f32 %v3093_v29, %v3092_v27  ;;  %v6686_v36 = vmul.f32 0.125, %v3038_v28  ;;  %vm3191_vm14 = vmor %vm3189_vm13, %vm3190_vm10 }
 0x298   :  { %v4869_v4 = vld [vmem:[#allocation14 + $0x438] sm:$0xf0]  ;;  %3012 = vmatpush.bf16.msra.mxu1 %v5160_v49 }
 0x299   :  { %v5882_v5 = vld [vmem:[#allocation14 + $0x61c] sm:$0xf]  ;;  %v4872_v12 = vor.u32 %v5818_v3, %v4869_v4  ;;  %2987 = vmatpush.bf16.msrb.mxu3 %v4616_v45  ;;  %v3186_v63 = vmul.f32 0.5, %v3185_v33 }
 0x29a   :  { %v5125_v8 = vld [vmem:[#allocation14 + $0x638] sm:$0xf0]  ;;  %2975 = vmatmul.bf16.vlgmr.msrb.gmra.mxu2 %v6614_v22  ;;  %v3255_v22 = vperm.slane %v6688_v37, 1 }
 0x29b   :  { %v5128_v51 = vor.u32 %v5882_v5, %v5125_v8  ;;  %3000 = vmatpush.bf16.msra.mxu0 %v4872_v12  ;;  %v3187_v15 = vsub.f32 1.5, %v3186_v63 }
 0x29c   :  { %2988 = vmatmul.bf16.vlgmr.msrb.gmra.mxu3 %v6616_v23  ;;  %v3143_v23 = vmul.f32 %v6686_v36, %v6686_v36  ;;  %v2807_v39 = vpop.f32.mrf.mxu1  ;;  %v2768_v52 = vpop.f32.mrf.mxu2 }
 0x29d   :  { %3013 = vmatpush.bf16.msra.mxu1 %v5128_v51  ;;  %v3188_v41 = vmul.f32 %v6043_v18, %v3187_v15 }
 0x29e   :  { %3001 = vmatmul.bf16.vlgmr.msra.gmra.mxu0 %v6612_v21  ;;  %v3135_v21 = vmul.f32 0.125, %v3094_v35  ;;  %v2781_v53 = vpop.f32.mrf.mxu3 }
 0x29f   :  { %v3192_v43 = vsel %vm3191_vm14, %v6043_v18, %v3188_v41  ;;  %v2782_v55 = vadd.f32 %v2781_v53, %v2768_v52 }
 0x2a0   :  { %3014 = vmatmul.bf16.vlgmr.msra.gmra.mxu1 %v6618_v25  ;;  %v2794_v25 = vpop.f32.mrf.mxu0  ;;  %v6698_v47 = vmul.f32 %v3255_v22, %v3192_v43  ;;  %v3151_v20 = vsub.f32 %v3135_v21, %v3143_v23 }
 0x2a1   :  { %v2795_v59 = vadd.f32 %v2794_v25, %v2782_v55 }
 0x2a2   :  { %v3279_v54 = vmul.f32 %v6698_v47, %v6667_v19  ;;  %v3159_v58 = vmax.f32 %v3151_v20, 0.0  ;;  %v3256_v20 = vperm.slane %v6688_v37, 2 }
 0x2a3   :  { %v6706_v56 = vadd.f32 %v2807_v39, %v2795_v59 }
 0x2a4   :  { %v3294_v57 = vrot.slane %v3279_v54, 7  ;;  %v2809_v17 = vpop.f32.mrf.mxu1  ;;  %v3167_v14 = vadd.f32 1e-05, %v3159_v58  ;;  %v2770_v61 = vpop.f32.mrf.mxu2 }
 0x2a5   :  { %v3039_v49 = vrot.slane %v6706_v56, 4  ;;  %v3072_v19 = vmul.f32 %v6706_v56, %v6706_v56  ;;  %v3257_v17 = vperm.slane %v6688_v37, 3 }
 0x2a6   :  { %v6709_v60 = vsel %vm382_vm9, %v3278_v34, %v3294_v57  ;;  %v2783_v62 = vpop.f32.mrf.mxu3  ;;  %6044 = vrsqrt.f32 %v3167_v14  ;;  %vm3199_vm15 = vweird.f32 %v3167_v14 }
 0x2a7   :  { %v3040_v3 = vadd.f32 %v3039_v49, %v6706_v56  ;;  %v3095_v4 = vrot.slane %v3072_v19, 4 }
 0x2a8   :  { %v2796_v24 = vpop.f32.mrf.mxu0 }
 0x2a9   :  { %v3041_v5 = vrot.slane %v3040_v3, 2  ;;  %v3096_v6 = vadd.f32 %v3095_v4, %v3072_v19 }
 0x2ab   :  { %v3042_v2 = vadd.f32 %v3041_v5, %v3040_v3  ;;  %v3097_v46 = vrot.slane %v3096_v6, 2 }
 0x2ac   :  { %v6045_v44 = vpop.eup %6044 }
 0x2ad   :  { %v3043_v7 = vrot.slane %v3042_v2, 1  ;;  %v3098_v8 = vadd.f32 %v3097_v46, %v3096_v6  ;;  %v3194_v12 = vmul.f32 %v6045_v44, %v3167_v14  ;;  %vm3200_vm9 = vweird.f32 %v6045_v44 }
 0x2ae   :  { %vm3201_vm0 = vmor %vm3199_vm15, %vm3200_vm9 }
 0x2af   :  { %v3044_v9 = vadd.f32 %v3043_v7, %v3042_v2  ;;  %v3099_v10 = vrot.slane %v3098_v8, 1  ;;  %v3195_v16 = vmul.f32 %v6045_v44, %v3194_v12 }
 0x2b1   :  { %v3100_v11 = vadd.f32 %v3099_v10, %v3098_v8  ;;  %v3128_v45 = vmul.f32 0.125, %v3044_v9  ;;  %v3196_v29 = vmul.f32 0.5, %v3195_v16 }
 0x2b3   :  { %v3136_v51 = vmul.f32 0.125, %v3100_v11  ;;  %v3144_v13 = vmul.f32 %v3128_v45, %v3128_v45  ;;  %v3197_v35 = vsub.f32 1.5, %v3196_v29 }
 0x2b5   :  { %v3152_v1 = vsub.f32 %v3136_v51, %v3144_v13  ;;  %v3198_v23 = vmul.f32 %v6045_v44, %v3197_v35 }
 0x2b7   :  { %v3160_v30 = vmax.f32 %v3152_v1, 0.0  ;;  %v3202_v54 = vsel %vm3201_vm0, %v6045_v44, %v3198_v23 }
 0x2b8   :  { %v6722_v24 = vmul.f32 %v3256_v20, %v3202_v54 }
 0x2b9   :  { %v3168_v28 = vadd.f32 1e-05, %v3160_v30 }
 0x2ba   :  { %v2846_v27 = vpop.f32.mrf.mxu0  ;;  %v3280_v3 = vmul.f32 %v6722_v24, %v6686_v36 }
 0x2bb   :  { %6046 = vrsqrt.f32 %v3168_v28  ;;  %vm3209_vm2 = vweird.f32 %v3168_v28 }
 0x2bc   :  { %v2859_v18 = vpop.f32.mrf.mxu1  ;;  %v2820_v31 = vpop.f32.mrf.mxu2  ;;  %v3295_v46 = vrot.slane %v3280_v3, 6 }
 0x2be   :  { %v2833_v32 = vpop.f32.mrf.mxu3 }
 0x2bf   :  { %v2834_v33 = vadd.f32 %v2833_v32, %v2820_v31 }
 0x2c1   :  { %v2847_v63 = vadd.f32 %v2846_v27, %v2834_v33  ;;  %v6047_v22 = vpop.eup %6046 }
 0x2c2   :  { %v2848_v38 = vpop.f32.mrf.mxu0  ;;  %v3204_v25 = vmul.f32 %v6047_v22, %v3168_v28  ;;  %vm3210_vm1 = vweird.f32 %v6047_v22 }
 0x2c3   :  { %v6715_v21 = vadd.f32 %v2859_v18, %v2847_v63  ;;  %vm3211_vm3 = vmor %vm3209_vm2, %vm3210_vm1  ;;  %vm3306_vm1 = vcmask 1046534   ;;  %vm3308_vm2 = vcmask 1045508  }
 0x2c4   :  { %v2861_v15 = vpop.f32.mrf.mxu1  ;;  %v3205_v41 = vmul.f32 %v6047_v22, %v3204_v25  ;;  %v2822_v42 = vpop.f32.mrf.mxu2 }
 0x2c5   :  { %v3045_v39 = vrot.slane %v6715_v21, 4  ;;  %v3073_v0 = vmul.f32 %v6715_v21, %v6715_v21 }
 0x2c6   :  { %v2835_v43 = vpop.f32.mrf.mxu3  ;;  %v3206_v55 = vmul.f32 0.5, %v3205_v41 }
 0x2c7   :  { %v3046_v52 = vadd.f32 %v3045_v39, %v6715_v21  ;;  %v3101_v53 = vrot.slane %v3073_v0, 4 }
 0x2c8   :  { %v3207_v59 = vsub.f32 1.5, %v3206_v55 }
 0x2c9   :  { %v3047_v57 = vrot.slane %v3046_v52, 2  ;;  %v3102_v58 = vadd.f32 %v3101_v53, %v3073_v0 }
 0x2ca   :  { %v3208_v49 = vmul.f32 %v6047_v22, %v3207_v59 }
 0x2cb   :  { %v3048_v34 = vadd.f32 %v3047_v57, %v3046_v52  ;;  %v3103_v14 = vrot.slane %v3102_v58, 2 }
 0x2cc   :  { %v3212_v62 = vsel %vm3211_vm3, %v6047_v22, %v3208_v49  ;;  %vm3310_vm3 = vcmask 1043456  }
 0x2cd   :  { %v3049_v19 = vrot.slane %v3048_v34, 1  ;;  %v3104_v61 = vadd.f32 %v3103_v14, %v3102_v58  ;;  %v6727_v4 = vmul.f32 %v3257_v17, %v3212_v62 }
 0x2cf   :  { %v3050_v5 = vadd.f32 %v3049_v19, %v3048_v34  ;;  %v3105_v6 = vrot.slane %v3104_v61, 1  ;;  %v3281_v2 = vmul.f32 %v6727_v4, %v3128_v45 }
 0x2d1   :  { %v3296_v7 = vrot.slane %v3281_v2, 5  ;;  %v3106_v8 = vadd.f32 %v3105_v6, %v3104_v61  ;;  %v6730_v44 = vmul.f32 0.125, %v3050_v5 }
 0x2d3   :  { %v3302_v9 = vsel %vm1032_vm6, %v3295_v46, %v3296_v7  ;;  %v3137_v11 = vmul.f32 0.125, %v3106_v8  ;;  %v3145_v36 = vmul.f32 %v6730_v44, %v6730_v44 }
 0x2d4   :  { %v6735_v10 = vsel %vm1034_vm7, %v6709_v60, %v3302_v9 }
 0x2d5   :  { %v3153_v13 = vsub.f32 %v3137_v11, %v3145_v36 }
 0x2d7   :  { %v3161_v30 = vmax.f32 %v3153_v13, 0.0 }
 0x2d9   :  { %v3169_v31 = vadd.f32 1e-05, %v3161_v30 }
 0x2da   :  { %v2898_v12 = vpop.f32.mrf.mxu0 }
 0x2db   :  { %6048 = vrsqrt.f32 %v3169_v31  ;;  %vm3219_vm5 = vweird.f32 %v3169_v31 }
 0x2dc   :  { %v2911_v51 = vpop.f32.mrf.mxu1  ;;  %v2872_v1 = vpop.f32.mrf.mxu2 }
 0x2de   :  { %v2885_v45 = vpop.f32.mrf.mxu3 }
 0x2df   :  { %v2886_v16 = vadd.f32 %v2885_v45, %v2872_v1  ;;  %v3258_v1 = vperm.slane %v6688_v37, 4 }
 0x2e1   :  { %v2899_v27 = vadd.f32 %v2898_v12, %v2886_v16  ;;  %v6049_v41 = vpop.eup %6048 }
 0x2e2   :  { %v2900_v18 = vpop.f32.mrf.mxu0  ;;  %v3214_v53 = vmul.f32 %v6049_v41, %v3169_v31  ;;  %vm3220_vm4 = vweird.f32 %v6049_v41 }
 0x2e3   :  { %v6739_v29 = vadd.f32 %v2911_v51, %v2899_v27  ;;  %vm3221_vm6 = vmor %vm3219_vm5, %vm3220_vm4 }
 0x2e4   :  { %v2913_v28 = vpop.f32.mrf.mxu1  ;;  %v2874_v33 = vpop.f32.mrf.mxu2  ;;  %v3215_v58 = vmul.f32 %v6049_v41, %v3214_v53  ;;  %v5974_v53 = vld [vmem:[#allocation17 + $0xf8] sm:$0xff] }
 0x2e5   :  { %v3051_v60 = vrot.slane %v6739_v29, 4  ;;  %v3074_v32 = vmul.f32 %v6739_v29, %v6739_v29  ;;  %v3259_v33 = vperm.slane %v6688_v37, 5  ;;  %3926 = vmatpush.bf16.msrb.mxu1 %v5974_v53 }
 0x2e6   :  { %v2887_v35 = vpop.f32.mrf.mxu3  ;;  %v3216_v49 = vmul.f32 0.5, %v3215_v58 }
 0x2e7   :  { %v3052_v63 = vadd.f32 %v3051_v60, %v6739_v29  ;;  %v3107_v38 = vrot.slane %v3074_v32, 4 }
 0x2e8   :  { %v3217_v3 = vsub.f32 1.5, %v3216_v49 }
 0x2e9   :  { %v3053_v15 = vrot.slane %v3052_v63, 2  ;;  %v3108_v22 = vadd.f32 %v3107_v38, %v3074_v32 }
 0x2ea   :  { %v3218_v8 = vmul.f32 %v6049_v41, %v3217_v3  ;;  %v5956_v3 = vld [vmem:[#allocation17 + $0x68] sm:$0xff] }
 0x2eb   :  { %v3054_v23 = vadd.f32 %v3053_v15, %v3052_v63  ;;  %v3109_v25 = vrot.slane %v3108_v22, 2 }
 0x2ec   :  { %v3222_v30 = vsel %vm3221_vm6, %v6049_v41, %v3218_v8  ;;  %v5950_v41 = vld [vmem:[#allocation17 + $0x38] sm:$0xff] }
 0x2ed   :  { %v3055_v39 = vrot.slane %v3054_v23, 1  ;;  %v3110_v0 = vadd.f32 %v3109_v25, %v3108_v22  ;;  %v6752_v32 = vmul.f32 %v3258_v1, %v3222_v30  ;;  %3887 = vmatpush.bf16.msra.mxu2 %v5950_v41  ;;  %v5969_v41 = vld [vmem:[#allocation17 + $0xd0] sm:$0xff] }
 0x2ef   :  { %v3056_v42 = vadd.f32 %v3055_v39, %v3054_v23  ;;  %v3111_v43 = vrot.slane %v3110_v0, 1  ;;  %v3282_v23 = vmul.f32 %v6752_v32, %v6730_v44  ;;  %v5949_v44 = vld [vmem:[#allocation17 + $0x30] sm:$0xff] }
 0x2f1   :  { %v3112_v20 = vadd.f32 %v3111_v43, %v3110_v0  ;;  %v3130_v52 = vmul.f32 0.125, %v3056_v42  ;;  %v5958_v42 = vld [vmem:[#allocation17 + $0x78] sm:$0xff]  ;;  %3888 = vmatpush.bf16.msra.mxu2 %v5949_v44  ;;  %v5968_v44 = vld [vmem:[#allocation17 + $0xc8] sm:$0xff] }
 0x2f2   :  { %v5966_v43 = vld [vmem:[#allocation17 + $0xb8] sm:$0xff]  ;;  %3900 = vmatpush.bf16.msra.mxu3 %v5958_v42 }
 0x2f3   :  { %v3138_v54 = vmul.f32 0.125, %v3112_v20  ;;  %v3146_v55 = vmul.f32 %v3130_v52, %v3130_v52  ;;  %3913 = vmatpush.bf16.msrb.mxu0 %v5966_v43 }
 0x2f5   :  { %v3154_v57 = vsub.f32 %v3138_v54, %v3146_v55 }
 0x2f7   :  { %v3162_v59 = vmax.f32 %v3154_v57, 0.0  ;;  %v3297_v57 = vrot.slane %v3282_v23, 4  ;;  %v5945_v23 = vld [vmem:[#allocation17 + $0x10] sm:$0xff] }
 0x2f9   :  { %v3170_v14 = vadd.f32 1e-05, %v3162_v59  ;;  %v5957_v59 = vld [vmem:[#allocation17 + $0x70] sm:$0xff] }
 0x2fa   :  { %v2950_v17 = vpop.f32.mrf.mxu0  ;;  %3901 = vmatpush.bf16.msra.mxu3 %v5957_v59 }
 0x2fb   :  { %6050 = vrsqrt.f32 %v3170_v14  ;;  %vm3229_vm8 = vweird.f32 %v3170_v14 }
 0x2fc   :  { %v2963_v34 = vpop.f32.mrf.mxu1  ;;  %v2924_v19 = vpop.f32.mrf.mxu2 }
 0x2fe   :  { %v2937_v61 = vpop.f32.mrf.mxu3  ;;  %3902 = vmatpush.bf16.msra.mxu3 %v5956_v3  ;;  %v5967_v3 = vld [vmem:[#allocation17 + $0xc0] sm:$0xff] }
 0x2ff   :  { %v2938_v62 = vadd.f32 %v2937_v61, %v2924_v19 }
 0x301   :  { %v2951_v5 = vadd.f32 %v2950_v17, %v2938_v62  ;;  %v6051_v46 = vpop.eup %6050  ;;  %v5965_v17 = vld [vmem:[#allocation17 + $0xb0] sm:$0xff]  ;;  %v5948_v62 = vld [vmem:[#allocation17 + $0x28] sm:$0xff] }
 0x302   :  { %v2952_v6 = vpop.f32.mrf.mxu0  ;;  %v3224_v9 = vmul.f32 %v6051_v46, %v3170_v14  ;;  %vm3230_vm7 = vweird.f32 %v6051_v46  ;;  %v5973_v14 = vld [vmem:[#allocation17 + $0xf0] sm:$0xff]  ;;  %3914 = vmatpush.bf16.msrb.mxu0 %v5965_v17  ;;  %3889 = vmatpush.bf16.msra.mxu2 %v5948_v62  ;;  %v5959_v62 = vld [vmem:[#allocation17 + $0x80] sm:$0xff] }
 0x303   :  { %v6745_v7 = vadd.f32 %v2963_v34, %v2951_v5  ;;  %vm3231_vm10 = vmor %vm3229_vm8, %vm3230_vm7  ;;  %3927 = vmatpush.bf16.msrb.mxu1 %v5973_v14  ;;  %v5964_v5 = vld [vmem:[#allocation17 + $0xa8] sm:$0xff] }
 0x304   :  { %v2965_v2 = vpop.f32.mrf.mxu1  ;;  %v3225_v12 = vmul.f32 %v6051_v46, %v3224_v9  ;;  %v2926_v51 = vpop.f32.mrf.mxu2  ;;  %v5972_v6 = vld [vmem:[#allocation17 + $0xe8] sm:$0xff] }
 0x305   :  { %v3057_v11 = vrot.slane %v6745_v7, 4  ;;  %v3075_v36 = vmul.f32 %v6745_v7, %v6745_v7  ;;  %v5971_v51 = vld [vmem:[#allocation17 + $0xe0] sm:$0xff] }
 0x306   :  { %v2939_v13 = vpop.f32.mrf.mxu3  ;;  %v3226_v27 = vmul.f32 0.5, %v3225_v12  ;;  %3915 = vmatpush.bf16.msrb.mxu0 %v5964_v5  ;;  %v5963_v12 = vld [vmem:[#allocation17 + $0xa0] sm:$0xff]  ;;  %v5982_v5 = vld [vmem:[#allocation17 + $0x138] sm:$0xff] }
 0x307   :  { %v3058_v45 = vadd.f32 %v3057_v11, %v6745_v7  ;;  %v3113_v16 = vrot.slane %v3075_v36, 4  ;;  %3928 = vmatpush.bf16.msrb.mxu1 %v5972_v6  ;;  %v5947_v11 = vld [vmem:[#allocation17 + $0x20] sm:$0xff]  ;;  %v5990_v6 = vld [vmem:[#allocation17 + $0x178] sm:$0xff] }
 0x308   :  { %v3227_v60 = vsub.f32 1.5, %v3226_v27  ;;  %3890 = vmatpush.bf16.msra.mxu2 %v5947_v11  ;;  %v5946_v27 = vld [vmem:[#allocation17 + $0x18] sm:$0xff] }
 0x309   :  { %v3059_v18 = vrot.slane %v3058_v45, 2  ;;  %v3114_v28 = vadd.f32 %v3113_v16, %v3075_v36  ;;  %v5955_v36 = vld [vmem:[#allocation17 + $0x60] sm:$0xff] }
 0x30a   :  { %v3228_v63 = vmul.f32 %v6051_v46, %v3227_v60  ;;  %3903 = vmatpush.bf16.msra.mxu3 %v5955_v36  ;;  %3916 = vmatpush.bf16.msrb.mxu0 %v5963_v12  ;;  %v5970_v60 = vld [vmem:[#allocation17 + $0xd8] sm:$0xff] }
 0x30b   :  { %v3060_v31 = vadd.f32 %v3059_v18, %v3058_v45  ;;  %v3115_v35 = vrot.slane %v3114_v28, 2  ;;  %3929 = vmatpush.bf16.msrb.mxu1 %v5971_v51  ;;  %v5954_v18 = vld [vmem:[#allocation17 + $0x58] sm:$0xff]  ;;  %v5981_v51 = vld [vmem:[#allocation17 + $0x130] sm:$0xff] }
 0x30c   :  { %v3232_v22 = vsel %vm3231_vm10, %v6051_v46, %v3228_v63  ;;  %3891 = vmatpush.bf16.msra.mxu2 %v5946_v27 }
 0x30d   :  { %v3061_v38 = vrot.slane %v3060_v31, 1  ;;  %v3116_v15 = vadd.f32 %v3115_v35, %v3114_v28  ;;  %v6757_v25 = vmul.f32 %v3259_v33, %v3232_v22  ;;  %v5962_v28 = vld [vmem:[#allocation17 + $0x98] sm:$0xff] }
 0x30e   :  { %3904 = vmatpush.bf16.msra.mxu3 %v5954_v18  ;;  %3917 = vmatpush.bf16.msrb.mxu0 %v5962_v28  ;;  %v5980_v28 = vld [vmem:[#allocation17 + $0x128] sm:$0xff] }
 0x30f   :  { %v3062_v39 = vadd.f32 %v3061_v38, %v3060_v31  ;;  %v3117_v0 = vrot.slane %v3116_v15, 1  ;;  %v3283_v20 = vmul.f32 %v6757_v25, %v3130_v52  ;;  %3930 = vmatpush.bf16.msrb.mxu1 %v5970_v60  ;;  %v5988_v60 = vld [vmem:[#allocation17 + $0x168] sm:$0xff] }
 0x310   :  { %3892 = vmatpush.bf16.msra.mxu2 %v5945_v23  ;;  %v5995_v23 = vld [vmem:[#allocation17 + $0x1a0] sm:$0xff] }
 0x311   :  { %v3118_v54 = vadd.f32 %v3117_v0, %v3116_v15  ;;  %v6760_v55 = vmul.f32 0.125, %v3062_v39  ;;  %v3298_v58 = vrot.slane %v3283_v20, 3  ;;  %v5953_v39 = vld [vmem:[#allocation17 + $0x50] sm:$0xff] }
 0x312   :  { %v5961_v0 = vld [vmem:[#allocation17 + $0x90] sm:$0xff]  ;;  %3905 = vmatpush.bf16.msra.mxu3 %v5953_v39  ;;  %v6003_v39 = vld [vmem:[#allocation17 + $0x1e0] sm:$0xff] }
 0x313   :  { %v6762_v34 = vsel %vm3304_vm11, %v3297_v57, %v3298_v58  ;;  %v3139_v49 = vmul.f32 0.125, %v3118_v54  ;;  %v3147_v52 = vmul.f32 %v6760_v55, %v6760_v55  ;;  %3918 = vmatpush.bf16.msrb.mxu0 %v5961_v0  ;;  %3931 = vmatpush.bf16.msrb.mxu1 %v5969_v41  ;;  %v5944_v54 = vld [vmem:[#allocation17 + $0x8] sm:$0xff]  ;;  %v5978_v41 = vld [vmem:[#allocation17 + $0x118] sm:$0xff] }
 0x314   :  { %v5952_v57 = vld [vmem:[#allocation17 + $0x48] sm:$0xff]  ;;  %3893 = vmatpush.bf16.msra.mxu2 %v5944_v54 }
 0x315   :  { %v3155_v2 = vsub.f32 %v3139_v49, %v3147_v52  ;;  %v5960_v58 = vld [vmem:[#allocation17 + $0x88] sm:$0xff] }
 0x316   :  { %3906 = vmatpush.bf16.msra.mxu3 %v5952_v57 }
 0x317   :  { %v3163_v13 = vmax.f32 %v3155_v2, 0.0  ;;  %3919 = vmatpush.bf16.msrb.mxu0 %v5960_v58  ;;  %3932 = vmatpush.bf16.msrb.mxu1 %v5968_v44  ;;  %v5977_v58 = vld [vmem:[#allocation17 + $0x110] sm:$0xff] }
 0x318   :  { %v5985_v44 = vld [vmem:[#allocation17 + $0x150] sm:$0xff] }
 0x319   :  { %v6768_v33 = vadd.f32 1e-05, %v3163_v13  ;;  %v5989_v13 = vld [vmem:[#allocation17 + $0x170] sm:$0xff] }
 0x31b   :  { %v3002_v19 = vpop.f32.mrf.mxu0  ;;  %6052 = vrsqrt.f32 %v6768_v33  ;;  %3920 = vmatpush.bf16.msrb.mxu0 %v5959_v62  ;;  %3933 = vmatpush.bf16.msrb.mxu1 %v5967_v3  ;;  %vm3239_vm13 = vweird.f32 %v6768_v33  ;;  %v5976_v62 = vld [vmem:[#allocation17 + $0x108] sm:$0xff] }
 0x31c   :  { %v5984_v3 = vld [vmem:[#allocation17 + $0x148] sm:$0xff] }
 0x31d   :  { %v3015_v61 = vpop.f32.mrf.mxu1  ;;  %v2976_v46 = vpop.f32.mrf.mxu2 }
 0x31f   :  { %v2989_v8 = vpop.f32.mrf.mxu3 }
 0x320   :  { %v2990_v9 = vadd.f32 %v2989_v8, %v2976_v46  ;;  %v5998_v8 = vld [vmem:[#allocation17 + $0x1b8] sm:$0xff] }
 0x321   :  { %v6775_v14 = vpop.eup %6052  ;;  %3965 = vmatpush.bf16.msra.mxu0 %v5998_v8  ;;  %v3261_v8 = vperm.slane %v6688_v37, 7 }
 0x322   :  { %v3003_v1 = vadd.f32 %v3002_v19, %v2990_v9  ;;  %v5943_v19 = vld [vmem:[#allocation17] sm:$0xff]  ;;  %v6006_v9 = vld [vmem:[#allocation17 + $0x1f8] sm:$0xff]  ;;  %v3234_v11 = vmul.f32 %v6775_v14, %v6768_v33  ;;  %vm3240_vm12 = vweird.f32 %v6775_v14  ;;  %v5992_v33 = vld [vmem:[#allocation17 + $0x188] sm:$0xff] }
 0x323   :  { %v3004_v45 = vpop.f32.mrf.mxu0  ;;  %3894 = vmatpush.bf16.msra.mxu2 %v5943_v19  ;;  %3978 = vmatpush.bf16.msra.mxu1 %v6006_v9  ;;  %vm3241_vm14 = vmor %vm3239_vm13, %vm3240_vm12 }
 0x324   :  { %v6766_v30 = vadd.f32 %v3015_v61, %v3003_v1  ;;  %v5951_v61 = vld [vmem:[#allocation17 + $0x40] sm:$0xff]  ;;  %v5997_v1 = vld [vmem:[#allocation17 + $0x1b0] sm:$0xff]  ;;  %v3235_v27 = vmul.f32 %v6775_v14, %v3234_v11 }
 0x325   :  { %v3017_v16 = vpop.f32.mrf.mxu1  ;;  %v2978_v63 = vpop.f32.mrf.mxu2  ;;  %3907 = vmatpush.bf16.msra.mxu3 %v5951_v61  ;;  %3966 = vmatpush.bf16.msra.mxu0 %v5997_v1  ;;  %v5983_v11 = vld [vmem:[#allocation17 + $0x140] sm:$0xff] }
 0x326   :  { %v3063_v31 = vrot.slane %v6766_v30, 4  ;;  %v3076_v35 = vmul.f32 %v6766_v30, %v6766_v30  ;;  %v6005_v16 = vld [vmem:[#allocation17 + $0x1f0] sm:$0xff] }
 0x327   :  { %v2991_v38 = vpop.f32.mrf.mxu3  ;;  %3939 = vmatpush.bf16.msrb.mxu2 %v5982_v5  ;;  %3979 = vmatpush.bf16.msra.mxu1 %v6005_v16 }
 0x328   :  { %v3064_v15 = vadd.f32 %v3063_v31, %v6766_v30  ;;  %v3119_v22 = vrot.slane %v3076_v35, 4  ;;  %v5996_v31 = vld [vmem:[#allocation17 + $0x1a8] sm:$0xff]  ;;  %v3236_v38 = vmul.f32 0.5, %v3235_v27 }
 0x329   :  { %3952 = vmatpush.bf16.msrb.mxu3 %v5990_v6  ;;  %3967 = vmatpush.bf16.msra.mxu0 %v5996_v31  ;;  %v6000_v6 = vld [vmem:[#allocation17 + $0x1c8] sm:$0xff] }
 0x32a   :  { %v3065_v42 = vrot.slane %v3064_v15, 2  ;;  %v3120_v43 = vadd.f32 %v3119_v22, %v3076_v35  ;;  %v6004_v35 = vld [vmem:[#allocation17 + $0x1e8] sm:$0xff]  ;;  %v5987_v22 = vld [vmem:[#allocation17 + $0x160] sm:$0xff]  ;;  %v3237_v0 = vsub.f32 1.5, %v3236_v38 }
 0x32b   :  { %3940 = vmatpush.bf16.msrb.mxu2 %v5981_v51  ;;  %3980 = vmatpush.bf16.msra.mxu1 %v6004_v35  ;;  %v5999_v51 = vld [vmem:[#allocation17 + $0x1c0] sm:$0xff] }
 0x32c   :  { %v3066_v20 = vadd.f32 %v3065_v42, %v3064_v15  ;;  %v3121_v53 = vrot.slane %v3120_v43, 2  ;;  %v5979_v15 = vld [vmem:[#allocation17 + $0x120] sm:$0xff]  ;;  %v5986_v42 = vld [vmem:[#allocation17 + $0x158] sm:$0xff]  ;;  %v3238_v54 = vmul.f32 %v6775_v14, %v3237_v0 }
 0x32d   :  { %3953 = vmatpush.bf16.msrb.mxu3 %v5989_v13  ;;  %3968 = vmatpush.bf16.msra.mxu0 %v5995_v23 }
 0x32e   :  { %v3067_v59 = vrot.slane %v3066_v20, 1  ;;  %v3122_v17 = vadd.f32 %v3121_v53, %v3120_v43  ;;  %v5994_v43 = vld [vmem:[#allocation17 + $0x198] sm:$0xff]  ;;  %v3242_v19 = vsel %vm3241_vm14, %v6775_v14, %v3238_v54  ;;  %v5975_v14 = vld [vmem:[#allocation17 + $0x100] sm:$0xff] }
 0x32f   :  { %3941 = vmatpush.bf16.msrb.mxu2 %v5980_v28  ;;  %3981 = vmatpush.bf16.msra.mxu1 %v6003_v39  ;;  %v6002_v53 = vld [vmem:[#allocation17 + $0x1d8] sm:$0xff]  ;;  %v3316_v28 = vperm.slane %v6722_v24, 0 }
 0x330   :  { %v3068_v49 = vadd.f32 %v3067_v59, %v3066_v20  ;;  %v3123_v52 = vrot.slane %v3122_v17, 1 }
 0x331   :  { %3954 = vmatpush.bf16.msrb.mxu3 %v5988_v60  ;;  %3969 = vmatpush.bf16.msra.mxu0 %v5994_v43  ;;  %v3318_v60 = vperm.slane %v6752_v32, 0  ;;  %v3324_v32 = vmul.f32 %v3316_v28, %v6673_v40 }
 0x332   :  { %v3124_v2 = vadd.f32 %v3123_v52, %v3122_v17  ;;  %v6777_v46 = vmul.f32 0.125, %v3068_v49  ;;  %v5993_v17 = vld [vmem:[#allocation17 + $0x190] sm:$0xff]  ;;  %v3260_v52 = vperm.slane %v6688_v37, 6  ;;  %v3314_v37 = vperm.slane %v6700_v48, 0  ;;  %v3020_v48 = vld [vmem:[%s6826_s9] sm:$0xff] }
 0x333   :  { %3942 = vmatpush.bf16.msrb.mxu2 %v5979_v15  ;;  %3982 = vmatpush.bf16.msra.mxu1 %v6002_v53  ;;  %v6001_v49 = vld [vmem:[#allocation17 + $0x1d0] sm:$0xff]  ;;  %v3326_v0 = vmul.f32 %v3318_v60, %v6715_v21 }
 0x334   :  { %v3140_v36 = vmul.f32 0.125, %v3124_v2  ;;  %v3148_v12 = vmul.f32 %v6777_v46, %v6777_v46  ;;  %v3276_v2 = vmul.f32 %v3260_v52, %v3242_v19  ;;  %v3322_v15 = vmul.f32 %v3314_v37, %v6644_v26 }
 0x335   :  { %3955 = vmatpush.bf16.msrb.mxu3 %v5987_v22  ;;  %3970 = vmatpush.bf16.msra.mxu0 %v5993_v17 }
 0x336   :  { %v3156_v45 = vsub.f32 %v3140_v36, %v3148_v12  ;;  %v5991_v12 = vld [vmem:[#allocation17 + $0x180] sm:$0xff]  ;;  %v3284_v13 = vmul.f32 %v3276_v2, %v6760_v55  ;;  %v3317_v55 = vperm.slane %v6727_v4, 0 }
 0x337   :  { %3943 = vmatpush.bf16.msrb.mxu2 %v5978_v41  ;;  %3983 = vmatpush.bf16.msra.mxu1 %v6001_v49 }
 0x338   :  { %v3164_v18 = vmax.f32 %v3156_v45, 0.0  ;;  %v3299_v16 = vrot.slane %v3284_v13, 2  ;;  %v3325_v22 = vmul.f32 %v3317_v55, %v6706_v56 }
 0x339   :  { %3956 = vmatpush.bf16.msrb.mxu3 %v5986_v42  ;;  %3971 = vmatpush.bf16.msra.mxu0 %v5992_v33 }
 0x33a   :  { %v3172_v63 = vadd.f32 1e-05, %v3164_v18  ;;  %v3315_v18 = vperm.slane %v6698_v47, 0 }
 0x33b   :  { %3944 = vmatpush.bf16.msrb.mxu2 %v5977_v58  ;;  %3984 = vmatpush.bf16.msra.mxu1 %v6000_v6 }
 0x33c   :  { %6054 = vrsqrt.f32 %v3172_v63  ;;  %vm3249_vm15 = vweird.f32 %v3172_v63  ;;  %v3323_v4 = vmul.f32 %v3315_v18, %v6654_v50 }
 0x33d   :  { %3957 = vmatpush.bf16.msrb.mxu3 %v5985_v44  ;;  %3972 = vmatpush.bf16.msra.mxu0 %v5991_v12 }
 0x33f   :  { %3945 = vmatpush.bf16.msrb.mxu2 %v5976_v62  ;;  %3985 = vmatpush.bf16.msra.mxu1 %v5999_v51 }
 0x341   :  { %3958 = vmatpush.bf16.msrb.mxu3 %v5984_v3 }
 0x342   :  { %v6055_v20 = vpop.eup %6054 }
 0x343   :  { %v3244_v57 = vmul.f32 %v6055_v20, %v3172_v63  ;;  %vm3250_vm9 = vweird.f32 %v6055_v20  ;;  %3946 = vmatpush.bf16.msrb.mxu2 %v5975_v14  ;;  %v3319_v63 = vperm.slane %v6757_v25, 0 }
 0x344   :  { %vm3251_vm0 = vmor %vm3249_vm15, %vm3250_vm9 }
 0x345   :  { %v3245_v59 = vmul.f32 %v6055_v20, %v3244_v57  ;;  %3959 = vmatpush.bf16.msrb.mxu3 %v5983_v11  ;;  %v3327_v25 = vmul.f32 %v3319_v63, %v6739_v29  ;;  %v6027_v11 = vld [vmem:[%s6828_s11] ss:$0 sm:$0xff]  ;;  %s6355_s11 = smov [#allocation19]  }
 0x346   :  { %s3998_s14 = sshll.u32 %s6355_s11, 4  ;;  %s3999_s14 = int_to_ptr.vmem [resolvable:$true] %s3998_s14 }
 0x347   :  { %v3246_v61 = vmul.f32 0.5, %v3245_v59 }
 0x349   :  { %v3247_v5 = vsub.f32 1.5, %v3246_v61 }
 0x34b   :  { %v3248_v9 = vmul.f32 %v6055_v20, %v3247_v5 }
 0x34d   :  { %v3252_v36 = vsel %vm3251_vm0, %v6055_v20, %v3248_v9 }
 0x34e   :  { %v3277_v1 = vmul.f32 %v3261_v8, %v3252_v36 }
 0x350   :  { %v3285_v45 = vmul.f32 %v3277_v1, %v6777_v46  ;;  %v3320_v46 = vperm.slane %v3276_v2, 0  ;;  %v3321_v35 = vperm.slane %v3277_v1, 0 }
 0x352   :  { %v3300_v27 = vrot.slane %v3285_v45, 1  ;;  %v3328_v23 = vmul.f32 %v3320_v46, %v6745_v7  ;;  %v3329_v39 = vmul.f32 %v3321_v35, %v6766_v30 }
 0x354   :  { %v3307_v31 = vsel %vm3306_vm1, %v3299_v16, %v3300_v27 }
 0x355   :  { %v3309_v38 = vsel %vm3308_vm2, %v6762_v34, %v3307_v31 }
 0x356   :  { %v3311_v47 = vsel %vm3310_vm3, %v6735_v10, %v3309_v38 }
 0x357   :  { %v3313_v24 = vsub.f32 %v3020_v48, %v3311_v47 }
 0x359   :  { %v3331_v34 = vperm.slane %v3313_v24, 0  ;;  %v3332_v41 = vperm.slane %v3313_v24, 1  ;;  %v3333_v10 = vperm.slane %v3313_v24, 2  ;;  %v3334_v42 = vperm.slane %v3313_v24, 3 }
 0x35a   :  { %v3335_v26 = vperm.slane %v3313_v24, 4  ;;  %v3336_v43 = vperm.slane %v3313_v24, 5  ;;  %v3337_v20 = vperm.slane %v3313_v24, 6  ;;  %v3338_v50 = vperm.slane %v3313_v24, 7 }
 0x35b   :  { %v3347_v53 = vadd.f32 %v3331_v34, %v3322_v15  ;;  %v3348_v40 = vadd.f32 %v3332_v41, %v3323_v4  ;;  %v3349_v54 = vadd.f32 %v3333_v10, %v3324_v32  ;;  %v3350_v56 = vadd.f32 %v3334_v42, %v3325_v22 }
 0x35c   :  { %v3351_v57 = vadd.f32 %v3335_v26, %v3326_v0  ;;  %v3352_v7 = vadd.f32 %v3336_v43, %v3327_v25  ;;  %v3353_v58 = vadd.f32 %v3337_v20, %v3328_v23  ;;  %v3354_v30 = vadd.f32 %v3338_v50, %v3329_v39 }
 0x35d   :  { %v3355_v44 = vmax.f32 %v3347_v53, 0.0  ;;  %v3356_v21 = vmax.f32 %v3348_v40, 0.0  ;;  %v3357_v59 = vmax.f32 %v3349_v54, 0.0  ;;  %v3358_v29 = vmax.f32 %v3350_v56, 0.0 }
 0x35e   :  { %v3359_v61 = vmax.f32 %v3351_v57, 0.0  ;;  %v3360_v62 = vmax.f32 %v3352_v7, 0.0  ;;  %v3361_v3 = vmax.f32 %v3353_v58, 0.0  ;;  %v3362_v5 = vmax.f32 %v3354_v30, 0.0 }
 0x35f   :  { %v3363_v17 = vpack.c.bf16 %v3355_v44, %v3355_v44  ;;  %v3364_v49 = vpack.c.bf16 %v3356_v21, %v3356_v21  ;;  %v3365_v52 = vpack.c.bf16 %v3357_v59, %v3357_v59  ;;  %v3366_v19 = vpack.c.bf16 %v3358_v29, %v3358_v29 }
 0x360   :  { %v3367_v33 = vpack.c.bf16 %v3359_v61, %v3359_v61  ;;  %v3368_v6 = vpack.c.bf16 %v3360_v62, %v3360_v62  ;;  %v3369_v2 = vpack.c.bf16 %v3361_v3, %v3361_v3  ;;  %v3370_v8 = vpack.c.bf16 %v3362_v5, %v3362_v5 }
 0x361   :  { %3895 = vmatmul.bf16.vlgmr.msra.gmra.mxu2 %v3363_v17  ;;  %3908 = vmatmul.bf16.vlgmr.msra.gmra.mxu3 %v3364_v49 }
 0x362   :  { %3921 = vmatmul.bf16.vlgmr.msrb.gmra.mxu0 %v3365_v52  ;;  %3934 = vmatmul.bf16.vlgmr.msrb.gmra.mxu1 %v3366_v19 }
 0x371   :  { %3947 = vmatmul.bf16.vlgmr.msrb.gmra.mxu2 %v3367_v33  ;;  %3960 = vmatmul.bf16.vlgmr.msrb.gmra.mxu3 %v3368_v6 }
 0x372   :  { %3973 = vmatmul.bf16.vlgmr.msra.gmra.mxu0 %v3369_v2  ;;  %3986 = vmatmul.bf16.vlgmr.msra.gmra.mxu1 %v3370_v8 }
 0x3df   :  { %v3922_v9 = vpop.f32.mrf.mxu0  ;;  %v3935_v14 = vpop.f32.mrf.mxu1 }
 0x3e4   :  { %v3896_v36 = vpop.f32.mrf.mxu2  ;;  %v3909_v12 = vpop.f32.mrf.mxu3 }
 0x3e5   :  { %v3897_v51 = vadd.f32 %v6027_v11, %v3896_v36 }
 0x3e7   :  { %v3924_v13 = vpop.f32.mrf.mxu0  ;;  %v3937_v1 = vpop.f32.mrf.mxu1  ;;  %v3910_v45 = vadd.f32 %v3909_v12, %v3897_v51 }
 0x3e9   :  { %v3923_v27 = vadd.f32 %v3922_v9, %v3910_v45 }
 0x3eb   :  { %v3936_v55 = vadd.f32 %v3935_v14, %v3923_v27 }
 0x3ec   :  { %v3898_v37 = vpop.f32.mrf.mxu2  ;;  %v3911_v16 = vpop.f32.mrf.mxu3 }
 0x3ef   :  { %v3974_v18 = vpop.f32.mrf.mxu0  ;;  %v3987_v28 = vpop.f32.mrf.mxu1 }
 0x3f4   :  { %v3948_v60 = vpop.f32.mrf.mxu2  ;;  %v3961_v46 = vpop.f32.mrf.mxu3 }
 0x3f5   :  { %v3949_v31 = vadd.f32 %v3948_v60, %v3936_v55 }
 0x3f7   :  { %v3962_v35 = vadd.f32 %v3961_v46, %v3949_v31  ;;  %v3976_v48 = vpop.f32.mrf.mxu0  ;;  %v3989_v63 = vpop.f32.mrf.mxu1 }
 0x3f9   :  { %v3975_v38 = vadd.f32 %v3974_v18, %v3962_v35 }
 0x3fb   :  { %v3988_v47 = vadd.f32 %v3987_v28, %v3975_v38 }
 0x3fc   :  { %v3950_v15 = vpop.f32.mrf.mxu2  ;;  %v3963_v24 = vpop.f32.mrf.mxu3 }
 0x3fd   :  { %6056 = vtanh.f32 %v3988_v47 }
 0x403   :  { %v6057_v4 = vpop.eup %6056 }
 0x404   :  { %3992 = vst [vmem:[#allocation19] sm:$0xff] %v6057_v4 }
 0x405   :  { %4003 = dma.vmem_to_hbm [thread:$0]  %s3999_s14, 128, %s4001_s17, [#allocation4]  }
 0x406   :  { %6334 = dma.done.wait [#allocation4], 128  }
 0x407   :  { %6335 = vsyncadd [#allocation4], 4294967168 }
 0x408   :  { %4008 = vsyncpa [#allocation3], 1 }
 0x409   :  { %4009 = vsyncpa [#allocation6], 1 }
 0x40a   :  { %4010 = vsyncpa [#allocation9], 1 }
 0x40b   :  { %4011 = vsyncpa [#allocation12], 1 }
 0x40c   :  { %4012 = vsyncpa [#allocation15], 1 }
 0x40d   :  { %4013 = vsyncpa [#allocation18], 1 }
 0x40e   :  { %4014 = vsyncpa [#allocation4], 1 }

</bundles_post_ra>
